<compile_context>
chip_gen: v6e
topology: v6e:2x2x1
jax: 0.10.0
libtpu: 0.0.40
codegen_flags: <defaults>
</compile_context>

<pallas_src>
import functools

import jax
import jax.numpy as jnp
from jax import lax
from jax.experimental import pallas as pl
from jax.experimental.pallas import tpu as pltpu


def encoder_layer_kernel(
    x_ref, wqkv_ref, bqkv_ref, wo3_ref, bo_ref, g1_ref, be1_ref,
    w1_ref, b1_ref, w2_ref, b2_ref, g2_ref, be2_ref, out_ref,
    *, n_heads, d_k, u_part, eps, mm_dtype, rank_chunk):
  bt, L, D = x_ref.shape
  BH = n_heads * bt

  # --- fold batch_tile * L into the matmul M dimension (free leading-dim reshape) ---
  x2d = x_ref[...].reshape(bt * L, D)                       # (M, D) f32

  # --- fused QKV projection: bf16 on the MXU, f32 accumulation (selection sees f32) ---
  qkv = jnp.dot(x2d.astype(mm_dtype), wqkv_ref[...],
                preferred_element_type=jnp.float32) + bqkv_ref[...]   # (M, 3D) f32

  # --- head split: 3*H static lane slices (independent of bt), h-major batch fold ---
  def split_heads(col0):
    pieces = [qkv[:, col0 + h * d_k: col0 + (h + 1) * d_k].reshape(bt, L, d_k)
              for h in range(n_heads)]
    return jnp.concatenate(pieces, axis=0)                  # (H*bt, L, d_k), index = h*bt + b

  qh = split_heads(0)
  kh = split_heads(D)
  vh = split_heads(2 * D)

  # --- ProbSparse selection: rank queries by squared norm, chunked over keys j ---
  qn = jnp.sum(qh * qh, axis=-1)                            # (BH, L) f32 (monotone in ||q||)
  qn_i = qn[:, :, None]                                     # (BH, L, 1)
  rank = jnp.zeros((BH, L), jnp.int32)
  for j0 in range(0, L, rank_chunk):                        # static chunk loop; no full LxL int32
    j1 = min(j0 + rank_chunk, L)
    w = j1 - j0
    qn_j = qn[:, j0:j1][:, None, :]                         # (BH, 1, w)
    row_i = lax.broadcasted_iota(jnp.int32, (L, w), 0)
    col_j = lax.broadcasted_iota(jnp.int32, (L, w), 1) + j0
    better = (qn_j > qn_i) | ((qn_j == qn_i) & (col_j < row_i))   # "j beats i"
    rank = rank + jnp.sum(better.astype(jnp.int32), axis=-1)
  sel = rank < u_part                                       # (BH, L) bool
  sel_k = sel[:, None, :]                                   # key mask
  sel_qf = sel[:, :, None].astype(jnp.float32)              # query (scatter-back) mask

  # --- attention restricted to selected keys (head-batched, bf16 on the MXU) ---
  scale = 1.0 / (d_k ** 0.5)
  qh_m = (qh * scale).astype(mm_dtype)                      # fold 1/sqrt(d_k) into q
  kh_m = kh.astype(mm_dtype)
  vh_m = vh.astype(mm_dtype)
  scores = jnp.einsum('bqd,bkd->bqk', qh_m, kh_m,
                      preferred_element_type=jnp.float32)   # (BH, L, L) f32
  scores = jnp.where(sel_k, scores, jnp.float32(-1e30))     # mask BEFORE max: no underflow
  m = jnp.max(scores, axis=-1, keepdims=True)
  p = jnp.exp(scores - m)                                   # non-selected keys -> exactly 0
  denom = jnp.sum(p, axis=-1, keepdims=True)                # >= 1 always
  attn = p * (1.0 / denom)                                  # exact reciprocal (tiny tensor)
  ctx = jnp.einsum('bqk,bkd->bqd', attn.astype(mm_dtype), vh_m,
                   preferred_element_type=jnp.float32)      # (BH, L, d_k)
  ctx = ctx * sel_qf                                        # scatter-back: unselected rows = 0

  # --- out-projection with the head re-pack folded into the contraction ---
  # attn_out[m, o] = sum_h ctx_h[m, :] @ wo3[h]   (wo3 = wo reshaped to (H, d_k, D) on host)
  attn_out = bo_ref[...]                                    # (1, D), broadcasts
  for h in range(n_heads):
    ctx_h = ctx[h * bt:(h + 1) * bt].reshape(bt * L, d_k)   # leading-dim slice + merge
    attn_out = attn_out + jnp.dot(ctx_h.astype(mm_dtype), wo3_ref[h],
                                  preferred_element_type=jnp.float32)

  # --- residual + LayerNorm 1 (f32) ---
  x1 = x2d + attn_out
  mu1 = jnp.mean(x1, axis=-1, keepdims=True)
  d1 = x1 - mu1
  var1 = jnp.mean(d1 * d1, axis=-1, keepdims=True)
  x1n = d1 * lax.rsqrt(var1 + eps) * g1_ref[...] + be1_ref[...]

  # --- feed-forward (bf16 on the MXU, f32 accumulate) ---
  h1 = jnp.maximum(
      jnp.dot(x1n.astype(mm_dtype), w1_ref[...],
              preferred_element_type=jnp.float32) + b1_ref[...], 0.0)
  ff = jnp.dot(h1.astype(mm_dtype), w2_ref[...],
               preferred_element_type=jnp.float32) + b2_ref[...]

  # --- residual + LayerNorm 2 (f32) ---
  x2 = x1n + ff
  mu2 = jnp.mean(x2, axis=-1, keepdims=True)
  d2 = x2 - mu2
  var2 = jnp.mean(d2 * d2, axis=-1, keepdims=True)
  out = d2 * lax.rsqrt(var2 + eps) * g2_ref[...] + be2_ref[...]

  out_ref[...] = out.reshape(bt, L, D)                      # lane-dense full-width store


def encoder_layer(x, params, n_heads, batch_tile=None, use_bf16_matmul=True):
  B, L, D = x.shape
  d_k = D // n_heads
  u_part = max(1, int(L * 0.5))
  d_ff = params["w1"].shape[1]
  mm_dtype = jnp.bfloat16 if use_bf16_matmul else jnp.float32

  # Host-side weight fusion / reshaping; narrow copies of the big weights for the MXU.
  wqkv = jnp.concatenate([params["wq"], params["wk"], params["wv"]], axis=1).astype(mm_dtype)
  bqkv = jnp.concatenate([params["bq"], params["bk"], params["bv"]], axis=1)      # (1, 3D) f32
  wo3 = params["wo"].reshape(n_heads, d_k, D).astype(mm_dtype)                    # (H, d_k, D)
  w1 = params["w1"].astype(mm_dtype)
  w2 = params["w2"].astype(mm_dtype)

  weight_args = (wqkv, bqkv, wo3, params["bo"], params["g1"], params["be1"],
                 w1, params["b1"], w2, params["b2"], params["g2"], params["be2"])
  weight_bytes = sum(int(a.size) * a.dtype.itemsize for a in weight_args)

  # Generation-aware VMEM capacity: 64 MiB/TC on v7x, 128 MiB on v5e/v6e.
  try:
    vmem_cap = int(pltpu.get_tpu_info().vmem_capacity_bytes)
  except Exception:
    vmem_cap = 64 * 1024 * 1024          # conservative fallback valid on every generation
  vmem_budget = int(0.85 * vmem_cap)

  def scratch_bytes(bt):
    # Rough upper bound on live f32 per-step temporaries (includes the L^2 attention terms).
    bh = bt * n_heads
    att = 3 * bh * L * L * 4                                  # scores / p / attn (+ rank chunk)
    act = 10 * bt * L * D * 4 + 2 * bt * L * d_ff * 4         # qkv, q/k/v, ctx, LN, FFN hidden
    io = 2 * 2 * bt * L * D * 4                               # double-buffered x / out blocks
    return att + act + io

  if batch_tile is None:
    batch_tile = 1
    cap = max(1, 1024 // max(L, 1))      # keep the matmul M dim from getting silly-large
    if B >= 2:
      cap = min(cap, B // 2)             # >= 2 grid steps so v7x megacore can split the batch
    for cand in range(min(B, max(cap, 1)), 0, -1):
      if B % cand == 0 and 2 * weight_bytes + scratch_bytes(cand) <= vmem_budget // 2:
        batch_tile = cand
        break
  bt = batch_tile
  assert B % bt == 0, "batch_tile must divide the batch size"

  rank_chunk = min(L, 512)

  kernel = functools.partial(
      encoder_layer_kernel, n_heads=n_heads, d_k=d_k, u_part=u_part,
      eps=1e-5, mm_dtype=mm_dtype, rank_chunk=rank_chunk)

  def rep(shape):
    nd = len(shape)
    return pl.BlockSpec(shape, lambda i, _nd=nd: (0,) * _nd)  # grid-invariant weight block

  in_specs = [
      pl.BlockSpec((bt, L, D), lambda i: (i, 0, 0)),          # x
      rep(wqkv.shape), rep(bqkv.shape),                       # fused W_qkv, b_qkv
      rep(wo3.shape), rep(params["bo"].shape),                # out_proj (per-head) + bias
      rep(params["g1"].shape), rep(params["be1"].shape),      # LN1
      rep(w1.shape), rep(params["b1"].shape),                 # FF linear 1
      rep(w2.shape), rep(params["b2"].shape),                 # FF linear 2
      rep(params["g2"].shape), rep(params["be2"].shape),      # LN2
  ]

  M = B * L
  flops = (2 * M * D * (3 * D)                                # fused QKV
           + 4 * B * n_heads * L * L * d_k                    # scores + attn@v
           + 2 * M * D * D                                    # out projection
           + 4 * M * D * d_ff)                                # FFN
  transcendentals = B * n_heads * L * L + 2 * M               # exp + rsqrt
  bytes_accessed = 2 * M * D * 4 + weight_bytes
  cost = pl.CostEstimate(flops=int(flops),
                         transcendentals=int(transcendentals),
                         bytes_accessed=int(bytes_accessed))

  return pl.pallas_call(
      kernel,
      out_shape=jax.ShapeDtypeStruct((B, L, D), jnp.float32),
      grid=(B // bt,),
      in_specs=in_specs,
      out_specs=pl.BlockSpec((bt, L, D), lambda i: (i, 0, 0)),
      compiler_params=pltpu.CompilerParams(
          dimension_semantics=("parallel",),                  # batch axis is independent
          vmem_limit_bytes=vmem_budget),                      # <= 85% of physical VMEM
      cost_estimate=cost,
  )(x, wqkv, bqkv, wo3, params["bo"], params["g1"], params["be1"],
    w1, params["b1"], w2, params["b2"], params["g2"], params["be2"])


def reference(x, params, n_heads):
  """Pure-JAX re-implementation of the torch module (eval mode), gather/scatter style."""
  B, L, D = x.shape
  d_k = D // n_heads
  u = max(1, int(L * 0.5))
  q = x @ params["wq"] + params["bq"][0]
  k = x @ params["wk"] + params["bk"][0]
  v = x @ params["wv"] + params["bv"][0]

  def split(t):
    return t.reshape(B, L, n_heads, d_k).transpose(0, 2, 1, 3)

  q, k, v = split(q), split(k), split(v)
  qn = jnp.linalg.norm(q, axis=-1)                            # (B, H, L)
  _, idx = lax.top_k(qn, u)                                   # (B, H, U)
  take = lambda t: jnp.take_along_axis(t, idx[..., None], axis=2)
  qs, ks, vs = take(q), take(k), take(v)
  scores = qs @ jnp.swapaxes(ks, -1, -2) / (d_k ** 0.5)
  attn = jax.nn.softmax(scores, axis=-1)
  ctx = attn @ vs                                             # (B, H, U, d_k)
  onehot = jax.nn.one_hot(idx, L, dtype=ctx.dtype)            # (B, H, U, L)
  full = jnp.einsum("bhul,bhud->bhld", onehot, ctx)           # scatter back
  ctx = full.transpose(0, 2, 1, 3).reshape(B, L, D)
  attn_out = ctx @ params["wo"] + params["bo"][0]

  def ln(t, g, b):
    mu = t.mean(-1, keepdims=True)
    var = ((t - mu) ** 2).mean(-1, keepdims=True)
    return (t - mu) / jnp.sqrt(var + 1e-5) * g[0] + b[0]

  x1 = ln(x + attn_out, params["g1"], params["be1"])
  ff = jax.nn.relu(x1 @ params["w1"] + params["b1"][0]) @ params["w2"] + params["b2"][0]
  return ln(x1 + ff, params["g2"], params["be2"])


if __name__ == "__main__":
  B, L, D, d_ff, n_heads = 2, 8, 32, 64, 4
  d_k = D // n_heads
  u_part = max(1, int(L * 0.5))

  def make_inputs(root_key):
    ks = jax.random.split(root_key, 17)
    w = lambda k_, shape, s=0.1: jax.random.normal(k_, shape, jnp.float32) * s
    params = dict(
        wq=w(ks[0], (D, D)), bq=w(ks[1], (1, D), 0.02),
        wk=w(ks[2], (D, D)), bk=w(ks[3], (1, D), 0.02),
        wv=w(ks[4], (D, D)), bv=w(ks[5], (1, D), 0.02),
        wo=w(ks[6], (D, D)), bo=w(ks[7], (1, D), 0.02),
        g1=1.0 + w(ks[8], (1, D), 0.02), be1=w(ks[9], (1, D), 0.02),
        w1=w(ks[10], (D, d_ff)), b1=w(ks[11], (1, d_ff), 0.02),
        w2=w(ks[12], (d_ff, D)), b2=w(ks[13], (1, D), 0.02),
        g2=1.0 + w(ks[14], (1, D), 0.02), be2=w(ks[15], (1, D), 0.02),
    )
    x = jax.random.normal(ks[16], (B, L, D), jnp.float32)
    return params, x

  def selection_margin(x, params):
    # Relative gap between the U-th and (U+1)-th largest query norms, per (batch, head).
    q = x @ params["wq"] + params["bq"][0]
    qh = q.reshape(B, L, n_heads, d_k).transpose(0, 2, 1, 3)
    qn = jnp.sort(jnp.linalg.norm(qh, axis=-1), axis=-1)[..., ::-1]
    gap = (qn[..., u_part - 1] - qn[..., u_part]) / jnp.maximum(qn[..., u_part - 1], 1e-6)
    return float(jnp.min(gap))

  # Deterministic inputs rooted at PRNGKey(0).  The kernel uses bf16 MXU matmuls
  # (f32 accumulate) while the reference runs in f32, so pick (deterministically)
  # a draw whose top-k selection boundary is well separated — otherwise a rounding-level
  # tie at the boundary would make the discrete selection, not the kernel, differ.
  key = jax.random.PRNGKey(0)
  params, x = make_inputs(key)
  for _ in range(16):
    if selection_margin(x, params) > 0.03:
      break
    key, _ = jax.random.split(key)
    params, x = make_inputs(key)

  out = jax.jit(lambda xx: encoder_layer(xx, params, n_heads))(x)
  jax.block_until_ready(out)

  with jax.default_matmul_precision("highest"):
    ref = reference(x, params, n_heads)
  assert out.shape == (B, L, D)
  max_diff = float(jnp.max(jnp.abs(out - ref)))
  assert jnp.allclose(out, ref, atol=5e-2, rtol=5e-2), f"max abs diff {max_diff}"

  print("KERNEL_OK")
</pallas_src>

<mosaic_0001>
module attributes {stable_mosaic.version = 11 : i64} {
  func.func @encoder_layer_kernel(%arg0: i32, %arg1: memref<1x8x32xf32, #tpu.memory_space<vmem>>, %arg2: memref<32x96xbf16, #tpu.memory_space<vmem>>, %arg3: memref<1x96xf32, #tpu.memory_space<vmem>>, %arg4: memref<4x8x32xbf16, #tpu.memory_space<vmem>>, %arg5: memref<1x32xf32, #tpu.memory_space<vmem>>, %arg6: memref<1x32xf32, #tpu.memory_space<vmem>>, %arg7: memref<1x32xf32, #tpu.memory_space<vmem>>, %arg8: memref<32x64xbf16, #tpu.memory_space<vmem>>, %arg9: memref<1x64xf32, #tpu.memory_space<vmem>>, %arg10: memref<64x32xbf16, #tpu.memory_space<vmem>>, %arg11: memref<1x32xf32, #tpu.memory_space<vmem>>, %arg12: memref<1x32xf32, #tpu.memory_space<vmem>>, %arg13: memref<1x32xf32, #tpu.memory_space<vmem>>, %arg14: memref<1x8x32xf32, #tpu.memory_space<vmem>>) attributes {dimension_semantics = [#tpu.dimension_semantics<parallel>], iteration_bounds = array<i64: 2>, scalar_prefetch = 0 : i64, scratch_operands = 0 : i64, tpu.core_type = #tpu.core_type<tc>, window_params = [{transform_indices = @transform_0, window_bounds = array<i64: 1, 8, 32>}, {pipeline_mode = #tpu.pipeline_mode<synchronous>, transform_indices = @transform_1, window_bounds = array<i64: 32, 96>}, {pipeline_mode = #tpu.pipeline_mode<synchronous>, transform_indices = @transform_2, window_bounds = array<i64: 1, 96>}, {pipeline_mode = #tpu.pipeline_mode<synchronous>, transform_indices = @transform_3, window_bounds = array<i64: 4, 8, 32>}, {pipeline_mode = #tpu.pipeline_mode<synchronous>, transform_indices = @transform_4, window_bounds = array<i64: 1, 32>}, {pipeline_mode = #tpu.pipeline_mode<synchronous>, transform_indices = @transform_5, window_bounds = array<i64: 1, 32>}, {pipeline_mode = #tpu.pipeline_mode<synchronous>, transform_indices = @transform_6, window_bounds = array<i64: 1, 32>}, {pipeline_mode = #tpu.pipeline_mode<synchronous>, transform_indices = @transform_7, window_bounds = array<i64: 32, 64>}, {pipeline_mode = #tpu.pipeline_mode<synchronous>, transform_indices = @transform_8, window_bounds = array<i64: 1, 64>}, {pipeline_mode = #tpu.pipeline_mode<synchronous>, transform_indices = @transform_9, window_bounds = array<i64: 64, 32>}, {pipeline_mode = #tpu.pipeline_mode<synchronous>, transform_indices = @transform_10, window_bounds = array<i64: 1, 32>}, {pipeline_mode = #tpu.pipeline_mode<synchronous>, transform_indices = @transform_11, window_bounds = array<i64: 1, 32>}, {pipeline_mode = #tpu.pipeline_mode<synchronous>, transform_indices = @transform_12, window_bounds = array<i64: 1, 32>}, {transform_indices = @transform_13, window_bounds = array<i64: 1, 8, 32>}]} {
    %c0 = arith.constant 0 : index
    %c0_0 = arith.constant 0 : index
    %c0_1 = arith.constant 0 : index
    %0 = vector.load %arg1[%c0, %c0_0, %c0_1] : memref<1x8x32xf32, #tpu.memory_space<vmem>>, vector<1x8x32xf32>
    %1 = vector.shape_cast %0 : vector<1x8x32xf32> to vector<8x32xf32>
    %2 = arith.truncf %1 : vector<8x32xf32> to vector<8x32xbf16>
    %c0_2 = arith.constant 0 : index
    %c0_3 = arith.constant 0 : index
    %3 = vector.load %arg2[%c0_2, %c0_3] : memref<32x96xbf16, #tpu.memory_space<vmem>>, vector<32x96xbf16>
    %cst = arith.constant dense<0.000000e+00> : vector<8x96xf32>
    %4 = tpu.matmul %2, %3, %cst {dimension_numbers = #tpu.dot_dimension_numbers<[1], [0], [0], [1], [0, 0, 1, 1], [], []>} : vector<8x32xbf16>, vector<32x96xbf16>, vector<8x96xf32> -> vector<8x96xf32>
    %c0_4 = arith.constant 0 : index
    %c0_5 = arith.constant 0 : index
    %5 = vector.load %arg3[%c0_4, %c0_5] : memref<1x96xf32, #tpu.memory_space<vmem>>, vector<1x96xf32>
    %6 = vector.broadcast %5 : vector<1x96xf32> to vector<8x96xf32>
    %7 = arith.addf %4, %6 : vector<8x96xf32>
    %8 = vector.extract_strided_slice %7 {offsets = [0, 0], sizes = [8, 8], strides = [1, 1]} : vector<8x96xf32> to vector<8x8xf32>
    %9 = vector.shape_cast %8 : vector<8x8xf32> to vector<1x8x8xf32>
    %10 = vector.extract_strided_slice %7 {offsets = [0, 8], sizes = [8, 8], strides = [1, 1]} : vector<8x96xf32> to vector<8x8xf32>
    %11 = vector.shape_cast %10 : vector<8x8xf32> to vector<1x8x8xf32>
    %12 = vector.extract_strided_slice %7 {offsets = [0, 16], sizes = [8, 8], strides = [1, 1]} : vector<8x96xf32> to vector<8x8xf32>
    %13 = vector.shape_cast %12 : vector<8x8xf32> to vector<1x8x8xf32>
    %14 = vector.extract_strided_slice %7 {offsets = [0, 24], sizes = [8, 8], strides = [1, 1]} : vector<8x96xf32> to vector<8x8xf32>
    %15 = vector.shape_cast %14 : vector<8x8xf32> to vector<1x8x8xf32>
    %16 = tpu.concatenate %9, %11, %13, %15 in 0 : vector<1x8x8xf32>, vector<1x8x8xf32>, vector<1x8x8xf32>, vector<1x8x8xf32> -> vector<4x8x8xf32>
    %17 = vector.extract_strided_slice %7 {offsets = [0, 32], sizes = [8, 8], strides = [1, 1]} : vector<8x96xf32> to vector<8x8xf32>
    %18 = vector.shape_cast %17 : vector<8x8xf32> to vector<1x8x8xf32>
    %19 = vector.extract_strided_slice %7 {offsets = [0, 40], sizes = [8, 8], strides = [1, 1]} : vector<8x96xf32> to vector<8x8xf32>
    %20 = vector.shape_cast %19 : vector<8x8xf32> to vector<1x8x8xf32>
    %21 = vector.extract_strided_slice %7 {offsets = [0, 48], sizes = [8, 8], strides = [1, 1]} : vector<8x96xf32> to vector<8x8xf32>
    %22 = vector.shape_cast %21 : vector<8x8xf32> to vector<1x8x8xf32>
    %23 = vector.extract_strided_slice %7 {offsets = [0, 56], sizes = [8, 8], strides = [1, 1]} : vector<8x96xf32> to vector<8x8xf32>
    %24 = vector.shape_cast %23 : vector<8x8xf32> to vector<1x8x8xf32>
    %25 = tpu.concatenate %18, %20, %22, %24 in 0 : vector<1x8x8xf32>, vector<1x8x8xf32>, vector<1x8x8xf32>, vector<1x8x8xf32> -> vector<4x8x8xf32>
    %26 = vector.extract_strided_slice %7 {offsets = [0, 64], sizes = [8, 8], strides = [1, 1]} : vector<8x96xf32> to vector<8x8xf32>
    %27 = vector.shape_cast %26 : vector<8x8xf32> to vector<1x8x8xf32>
    %28 = vector.extract_strided_slice %7 {offsets = [0, 72], sizes = [8, 8], strides = [1, 1]} : vector<8x96xf32> to vector<8x8xf32>
    %29 = vector.shape_cast %28 : vector<8x8xf32> to vector<1x8x8xf32>
    %30 = vector.extract_strided_slice %7 {offsets = [0, 80], sizes = [8, 8], strides = [1, 1]} : vector<8x96xf32> to vector<8x8xf32>
    %31 = vector.shape_cast %30 : vector<8x8xf32> to vector<1x8x8xf32>
    %32 = vector.extract_strided_slice %7 {offsets = [0, 88], sizes = [8, 8], strides = [1, 1]} : vector<8x96xf32> to vector<8x8xf32>
    %33 = vector.shape_cast %32 : vector<8x8xf32> to vector<1x8x8xf32>
    %34 = tpu.concatenate %27, %29, %31, %33 in 0 : vector<1x8x8xf32>, vector<1x8x8xf32>, vector<1x8x8xf32>, vector<1x8x8xf32> -> vector<4x8x8xf32>
    %35 = arith.mulf %16, %16 : vector<4x8x8xf32>
    %cst_6 = arith.constant dense<0.000000e+00> : vector<4x8xf32>
    %36 = vector.multi_reduction <add>, %35, %cst_6 [2] : vector<4x8x8xf32> to vector<4x8xf32>
    %37 = vector.shape_cast %36 : vector<4x8xf32> to vector<4x8x1xf32>
    %c0_i32 = arith.constant 0 : i32
    %38 = vector.broadcast %c0_i32 : i32 to vector<4x8xi32>
    %39 = vector.shape_cast %36 : vector<4x8xf32> to vector<4x1x8xf32>
    %40 = tpu.iota {dimensions = array<i32: 0>} : vector<8x8xi32>
    %41 = tpu.iota {dimensions = array<i32: 1>} : vector<8x8xi32>
    %c0_i32_7 = arith.constant 0 : i32
    %42 = vector.broadcast %c0_i32_7 : i32 to vector<8x8xi32>
    %43 = arith.addi %41, %42 : vector<8x8xi32>
    %44 = vector.broadcast %39 : vector<4x1x8xf32> to vector<4x8x8xf32>
    %45 = vector.broadcast %37 : vector<4x8x1xf32> to vector<4x8x8xf32>
    %46 = arith.cmpf ogt, %44, %45 : vector<4x8x8xf32>
    %47 = vector.broadcast %39 : vector<4x1x8xf32> to vector<4x8x8xf32>
    %48 = vector.broadcast %37 : vector<4x8x1xf32> to vector<4x8x8xf32>
    %49 = arith.cmpf oeq, %47, %48 : vector<4x8x8xf32>
    %50 = arith.cmpi slt, %43, %40 : vector<8x8xi32>
    %51 = vector.shape_cast %50 : vector<8x8xi1> to vector<1x8x8xi1>
    %52 = vector.broadcast %51 : vector<1x8x8xi1> to vector<4x8x8xi1>
    %53 = arith.andi %49, %52 : vector<4x8x8xi1>
    %54 = arith.ori %46, %53 : vector<4x8x8xi1>
    %55 = arith.extui %54 : vector<4x8x8xi1> to vector<4x8x8xi32>
    %cst_8 = arith.constant dense<0> : vector<4x8xi32>
    %56 = vector.multi_reduction <add>, %55, %cst_8 [2] : vector<4x8x8xi32> to vector<4x8xi32>
    %57 = arith.addi %38, %56 : vector<4x8xi32>
    %c4_i32 = arith.constant 4 : i32
    %58 = vector.broadcast %c4_i32 : i32 to vector<4x8xi32>
    %59 = arith.cmpi slt, %57, %58 : vector<4x8xi32>
    %60 = vector.shape_cast %59 : vector<4x8xi1> to vector<4x1x8xi1>
    %61 = vector.shape_cast %59 : vector<4x8xi1> to vector<4x8x1xi1>
    %62 = arith.extui %61 : vector<4x8x1xi1> to vector<4x8x1xi32>
    %63 = arith.sitofp %62 : vector<4x8x1xi32> to vector<4x8x1xf32>
    %cst_9 = arith.constant 0.353553385 : f32
    %64 = vector.broadcast %cst_9 : f32 to vector<4x8x8xf32>
    %65 = arith.mulf %16, %64 : vector<4x8x8xf32>
    %66 = arith.truncf %65 : vector<4x8x8xf32> to vector<4x8x8xbf16>
    %67 = arith.truncf %25 : vector<4x8x8xf32> to vector<4x8x8xbf16>
    %68 = arith.truncf %34 : vector<4x8x8xf32> to vector<4x8x8xbf16>
    "tpu.trace_start"() <{level = 10 : i32, message = "bqd,bkd->bqk"}> : () -> ()
    %cst_10 = arith.constant dense<0.000000e+00> : vector<4x8x8xf32>
    %69 = tpu.matmul %66, %67, %cst_10 {dimension_numbers = #tpu.dot_dimension_numbers<[2], [2], [1], [1], [0, 0, 0, 1, 1, 1], [0], [0]>} : vector<4x8x8xbf16>, vector<4x8x8xbf16>, vector<4x8x8xf32> -> vector<4x8x8xf32>
    %cst_11 = arith.constant -1.000000e+30 : f32
    "tpu.trace_stop"() : () -> ()
    %70 = vector.shape_cast %60 : vector<4x1x8xi1> to vector<4x1x8xi1>
    %71 = vector.broadcast %70 : vector<4x1x8xi1> to vector<4x8x8xi1>
    %72 = vector.broadcast %cst_11 : f32 to vector<4x8x8xf32>
    %73 = arith.select %71, %69, %72 : vector<4x8x8xi1>, vector<4x8x8xf32>
    %cst_12 = arith.constant dense<0xFF800000> : vector<4x8xf32>
    %74 = vector.multi_reduction <maximumf>, %73, %cst_12 [2] : vector<4x8x8xf32> to vector<4x8xf32>
    %75 = vector.shape_cast %74 : vector<4x8xf32> to vector<4x8x1xf32>
    %76 = vector.broadcast %75 : vector<4x8x1xf32> to vector<4x8x8xf32>
    %77 = arith.subf %73, %76 : vector<4x8x8xf32>
    %78 = math.exp %77 : vector<4x8x8xf32>
    %cst_13 = arith.constant dense<0.000000e+00> : vector<4x8xf32>
    %79 = vector.multi_reduction <add>, %78, %cst_13 [2] : vector<4x8x8xf32> to vector<4x8xf32>
    %80 = vector.shape_cast %79 : vector<4x8xf32> to vector<4x8x1xf32>
    %cst_14 = arith.constant 1.000000e+00 : f32
    %81 = vector.broadcast %cst_14 : f32 to vector<4x8x1xf32>
    %82 = arith.divf %81, %80 : vector<4x8x1xf32>
    %83 = vector.broadcast %82 : vector<4x8x1xf32> to vector<4x8x8xf32>
    %84 = arith.mulf %78, %83 : vector<4x8x8xf32>
    %85 = arith.truncf %84 : vector<4x8x8xf32> to vector<4x8x8xbf16>
    "tpu.trace_start"() <{level = 10 : i32, message = "bqk,bkd->bqd"}> : () -> ()
    %cst_15 = arith.constant dense<0.000000e+00> : vector<4x8x8xf32>
    %86 = tpu.matmul %85, %68, %cst_15 {dimension_numbers = #tpu.dot_dimension_numbers<[2], [1], [1], [2], [0, 0, 0, 1, 1, 2], [0], [0]>} : vector<4x8x8xbf16>, vector<4x8x8xbf16>, vector<4x8x8xf32> -> vector<4x8x8xf32>
    "tpu.trace_stop"() : () -> ()
    %87 = vector.broadcast %63 : vector<4x8x1xf32> to vector<4x8x8xf32>
    %88 = arith.mulf %86, %87 : vector<4x8x8xf32>
    %c0_16 = arith.constant 0 : index
    %c0_17 = arith.constant 0 : index
    %89 = vector.load %arg5[%c0_16, %c0_17] : memref<1x32xf32, #tpu.memory_space<vmem>>, vector<1x32xf32>
    %90 = vector.extract_strided_slice %88 {offsets = [0, 0, 0], sizes = [1, 8, 8], strides = [1, 1, 1]} : vector<4x8x8xf32> to vector<1x8x8xf32>
    %91 = vector.shape_cast %90 : vector<1x8x8xf32> to vector<8x8xf32>
    %92 = arith.truncf %91 : vector<8x8xf32> to vector<8x8xbf16>
    %c0_18 = arith.constant 0 : index
    %c0_19 = arith.constant 0 : index
    %c0_20 = arith.constant 0 : index
    %93 = vector.load %arg4[%c0_18, %c0_19, %c0_20] : memref<4x8x32xbf16, #tpu.memory_space<vmem>>, vector<1x8x32xbf16>
    %94 = vector.shape_cast %93 : vector<1x8x32xbf16> to vector<8x32xbf16>
    %cst_21 = arith.constant dense<0.000000e+00> : vector<8x32xf32>
    %95 = tpu.matmul %92, %94, %cst_21 {dimension_numbers = #tpu.dot_dimension_numbers<[1], [0], [0], [1], [0, 0, 1, 1], [], []>} : vector<8x8xbf16>, vector<8x32xbf16>, vector<8x32xf32> -> vector<8x32xf32>
    %96 = vector.broadcast %89 : vector<1x32xf32> to vector<8x32xf32>
    %97 = arith.addf %96, %95 : vector<8x32xf32>
    %98 = vector.extract_strided_slice %88 {offsets = [1, 0, 0], sizes = [1, 8, 8], strides = [1, 1, 1]} : vector<4x8x8xf32> to vector<1x8x8xf32>
    %99 = vector.shape_cast %98 : vector<1x8x8xf32> to vector<8x8xf32>
    %100 = arith.truncf %99 : vector<8x8xf32> to vector<8x8xbf16>
    %c1 = arith.constant 1 : index
    %c0_22 = arith.constant 0 : index
    %c0_23 = arith.constant 0 : index
    %101 = vector.load %arg4[%c1, %c0_22, %c0_23] : memref<4x8x32xbf16, #tpu.memory_space<vmem>>, vector<1x8x32xbf16>
    %102 = vector.shape_cast %101 : vector<1x8x32xbf16> to vector<8x32xbf16>
    %cst_24 = arith.constant dense<0.000000e+00> : vector<8x32xf32>
    %103 = tpu.matmul %100, %102, %cst_24 {dimension_numbers = #tpu.dot_dimension_numbers<[1], [0], [0], [1], [0, 0, 1, 1], [], []>} : vector<8x8xbf16>, vector<8x32xbf16>, vector<8x32xf32> -> vector<8x32xf32>
    %104 = arith.addf %97, %103 : vector<8x32xf32>
    %105 = vector.extract_strided_slice %88 {offsets = [2, 0, 0], sizes = [1, 8, 8], strides = [1, 1, 1]} : vector<4x8x8xf32> to vector<1x8x8xf32>
    %106 = vector.shape_cast %105 : vector<1x8x8xf32> to vector<8x8xf32>
    %107 = arith.truncf %106 : vector<8x8xf32> to vector<8x8xbf16>
    %c2 = arith.constant 2 : index
    %c0_25 = arith.constant 0 : index
    %c0_26 = arith.constant 0 : index
    %108 = vector.load %arg4[%c2, %c0_25, %c0_26] : memref<4x8x32xbf16, #tpu.memory_space<vmem>>, vector<1x8x32xbf16>
    %109 = vector.shape_cast %108 : vector<1x8x32xbf16> to vector<8x32xbf16>
    %cst_27 = arith.constant dense<0.000000e+00> : vector<8x32xf32>
    %110 = tpu.matmul %107, %109, %cst_27 {dimension_numbers = #tpu.dot_dimension_numbers<[1], [0], [0], [1], [0, 0, 1, 1], [], []>} : vector<8x8xbf16>, vector<8x32xbf16>, vector<8x32xf32> -> vector<8x32xf32>
    %111 = arith.addf %104, %110 : vector<8x32xf32>
    %112 = vector.extract_strided_slice %88 {offsets = [3, 0, 0], sizes = [1, 8, 8], strides = [1, 1, 1]} : vector<4x8x8xf32> to vector<1x8x8xf32>
    %113 = vector.shape_cast %112 : vector<1x8x8xf32> to vector<8x8xf32>
    %114 = arith.truncf %113 : vector<8x8xf32> to vector<8x8xbf16>
    %c3 = arith.constant 3 : index
    %c0_28 = arith.constant 0 : index
    %c0_29 = arith.constant 0 : index
    %115 = vector.load %arg4[%c3, %c0_28, %c0_29] : memref<4x8x32xbf16, #tpu.memory_space<vmem>>, vector<1x8x32xbf16>
    %116 = vector.shape_cast %115 : vector<1x8x32xbf16> to vector<8x32xbf16>
    %cst_30 = arith.constant dense<0.000000e+00> : vector<8x32xf32>
    %117 = tpu.matmul %114, %116, %cst_30 {dimension_numbers = #tpu.dot_dimension_numbers<[1], [0], [0], [1], [0, 0, 1, 1], [], []>} : vector<8x8xbf16>, vector<8x32xbf16>, vector<8x32xf32> -> vector<8x32xf32>
    %118 = arith.addf %111, %117 : vector<8x32xf32>
    %119 = arith.addf %1, %118 : vector<8x32xf32>
    %cst_31 = arith.constant dense<0.000000e+00> : vector<8xf32>
    %120 = vector.multi_reduction <add>, %119, %cst_31 [1] : vector<8x32xf32> to vector<8xf32>
    %121 = vector.shape_cast %120 : vector<8xf32> to vector<8x1xf32>
    %cst_32 = arith.constant 3.200000e+01 : f32
    %122 = vector.broadcast %cst_32 : f32 to vector<8x1xf32>
    %123 = arith.divf %121, %122 : vector<8x1xf32>
    %124 = vector.broadcast %123 : vector<8x1xf32> to vector<8x32xf32>
    %125 = arith.subf %119, %124 : vector<8x32xf32>
    %126 = arith.mulf %125, %125 : vector<8x32xf32>
    %cst_33 = arith.constant dense<0.000000e+00> : vector<8xf32>
    %127 = vector.multi_reduction <add>, %126, %cst_33 [1] : vector<8x32xf32> to vector<8xf32>
    %128 = vector.shape_cast %127 : vector<8xf32> to vector<8x1xf32>
    %cst_34 = arith.constant 3.200000e+01 : f32
    %129 = vector.broadcast %cst_34 : f32 to vector<8x1xf32>
    %130 = arith.divf %128, %129 : vector<8x1xf32>
    %cst_35 = arith.constant 9.99999974E-6 : f32
    %131 = vector.broadcast %cst_35 : f32 to vector<8x1xf32>
    %132 = arith.addf %130, %131 : vector<8x1xf32>
    %133 = math.rsqrt %132 : vector<8x1xf32>
    %134 = vector.broadcast %133 : vector<8x1xf32> to vector<8x32xf32>
    %135 = arith.mulf %125, %134 : vector<8x32xf32>
    %c0_36 = arith.constant 0 : index
    %c0_37 = arith.constant 0 : index
    %136 = vector.load %arg6[%c0_36, %c0_37] : memref<1x32xf32, #tpu.memory_space<vmem>>, vector<1x32xf32>
    %137 = vector.broadcast %136 : vector<1x32xf32> to vector<8x32xf32>
    %138 = arith.mulf %135, %137 : vector<8x32xf32>
    %c0_38 = arith.constant 0 : index
    %c0_39 = arith.constant 0 : index
    %139 = vector.load %arg7[%c0_38, %c0_39] : memref<1x32xf32, #tpu.memory_space<vmem>>, vector<1x32xf32>
    %140 = vector.broadcast %139 : vector<1x32xf32> to vector<8x32xf32>
    %141 = arith.addf %138, %140 : vector<8x32xf32>
    %142 = arith.truncf %141 : vector<8x32xf32> to vector<8x32xbf16>
    %c0_40 = arith.constant 0 : index
    %c0_41 = arith.constant 0 : index
    %143 = vector.load %arg8[%c0_40, %c0_41] : memref<32x64xbf16, #tpu.memory_space<vmem>>, vector<32x64xbf16>
    %cst_42 = arith.constant dense<0.000000e+00> : vector<8x64xf32>
    %144 = tpu.matmul %142, %143, %cst_42 {dimension_numbers = #tpu.dot_dimension_numbers<[1], [0], [0], [1], [0, 0, 1, 1], [], []>} : vector<8x32xbf16>, vector<32x64xbf16>, vector<8x64xf32> -> vector<8x64xf32>
    %c0_43 = arith.constant 0 : index
    %c0_44 = arith.constant 0 : index
    %145 = vector.load %arg9[%c0_43, %c0_44] : memref<1x64xf32, #tpu.memory_space<vmem>>, vector<1x64xf32>
    %146 = vector.broadcast %145 : vector<1x64xf32> to vector<8x64xf32>
    %147 = arith.addf %144, %146 : vector<8x64xf32>
    %cst_45 = arith.constant 0.000000e+00 : f32
    %148 = vector.broadcast %cst_45 : f32 to vector<8x64xf32>
    %149 = arith.maximumf %147, %148 : vector<8x64xf32>
    %150 = arith.truncf %149 : vector<8x64xf32> to vector<8x64xbf16>
    %c0_46 = arith.constant 0 : index
    %c0_47 = arith.constant 0 : index
    %151 = vector.load %arg10[%c0_46, %c0_47] : memref<64x32xbf16, #tpu.memory_space<vmem>>, vector<64x32xbf16>
    %cst_48 = arith.constant dense<0.000000e+00> : vector<8x32xf32>
    %152 = tpu.matmul %150, %151, %cst_48 {dimension_numbers = #tpu.dot_dimension_numbers<[1], [0], [0], [1], [0, 0, 1, 1], [], []>} : vector<8x64xbf16>, vector<64x32xbf16>, vector<8x32xf32> -> vector<8x32xf32>
    %c0_49 = arith.constant 0 : index
    %c0_50 = arith.constant 0 : index
    %153 = vector.load %arg11[%c0_49, %c0_50] : memref<1x32xf32, #tpu.memory_space<vmem>>, vector<1x32xf32>
    %154 = vector.broadcast %153 : vector<1x32xf32> to vector<8x32xf32>
    %155 = arith.addf %152, %154 : vector<8x32xf32>
    %156 = arith.addf %141, %155 : vector<8x32xf32>
    %cst_51 = arith.constant dense<0.000000e+00> : vector<8xf32>
    %157 = vector.multi_reduction <add>, %156, %cst_51 [1] : vector<8x32xf32> to vector<8xf32>
    %158 = vector.shape_cast %157 : vector<8xf32> to vector<8x1xf32>
    %cst_52 = arith.constant 3.200000e+01 : f32
    %159 = vector.broadcast %cst_52 : f32 to vector<8x1xf32>
    %160 = arith.divf %158, %159 : vector<8x1xf32>
    %161 = vector.broadcast %160 : vector<8x1xf32> to vector<8x32xf32>
    %162 = arith.subf %156, %161 : vector<8x32xf32>
    %163 = arith.mulf %162, %162 : vector<8x32xf32>
    %cst_53 = arith.constant dense<0.000000e+00> : vector<8xf32>
    %164 = vector.multi_reduction <add>, %163, %cst_53 [1] : vector<8x32xf32> to vector<8xf32>
    %165 = vector.shape_cast %164 : vector<8xf32> to vector<8x1xf32>
    %cst_54 = arith.constant 3.200000e+01 : f32
    %166 = vector.broadcast %cst_54 : f32 to vector<8x1xf32>
    %167 = arith.divf %165, %166 : vector<8x1xf32>
    %cst_55 = arith.constant 9.99999974E-6 : f32
    %168 = vector.broadcast %cst_55 : f32 to vector<8x1xf32>
    %169 = arith.addf %167, %168 : vector<8x1xf32>
    %170 = math.rsqrt %169 : vector<8x1xf32>
    %171 = vector.broadcast %170 : vector<8x1xf32> to vector<8x32xf32>
    %172 = arith.mulf %162, %171 : vector<8x32xf32>
    %c0_56 = arith.constant 0 : index
    %c0_57 = arith.constant 0 : index
    %173 = vector.load %arg12[%c0_56, %c0_57] : memref<1x32xf32, #tpu.memory_space<vmem>>, vector<1x32xf32>
    %174 = vector.broadcast %173 : vector<1x32xf32> to vector<8x32xf32>
    %175 = arith.mulf %172, %174 : vector<8x32xf32>
    %c0_58 = arith.constant 0 : index
    %c0_59 = arith.constant 0 : index
    %176 = vector.load %arg13[%c0_58, %c0_59] : memref<1x32xf32, #tpu.memory_space<vmem>>, vector<1x32xf32>
    %177 = vector.broadcast %176 : vector<1x32xf32> to vector<8x32xf32>
    %178 = arith.addf %175, %177 : vector<8x32xf32>
    %179 = vector.shape_cast %178 : vector<8x32xf32> to vector<1x8x32xf32>
    %c0_60 = arith.constant 0 : index
    %c0_61 = arith.constant 0 : index
    %c0_62 = arith.constant 0 : index
    %180 = vector.load %arg14[%c0_60, %c0_61, %c0_62] : memref<1x8x32xf32, #tpu.memory_space<vmem>>, vector<1x8x32xf32>
    tpu.vector_store %arg14[%c0_60, %c0_61, %c0_62], %179 {strides = array<i32>} : memref<1x8x32xf32, #tpu.memory_space<vmem>>, vector<1x8x32xf32>,
    return
  }
  func.func @transform_0(%arg0: i32) -> (i32, i32, i32) {
    %c0_i32 = arith.constant 0 : i32
    %c0_i32_0 = arith.constant 0 : i32
    %c0_i32_1 = arith.constant 0 : i32
    return %arg0, %c0_i32, %c0_i32_0 : i32, i32, i32
  }
  func.func @transform_1(%arg0: i32) -> (i32, i32) {
    %c0_i32 = arith.constant 0 : i32
    %c0_i32_0 = arith.constant 0 : i32
    %c0_i32_1 = arith.constant 0 : i32
    return %c0_i32, %c0_i32_0 : i32, i32
  }
  func.func @transform_2(%arg0: i32) -> (i32, i32) {
    %c0_i32 = arith.constant 0 : i32
    %c0_i32_0 = arith.constant 0 : i32
    %c0_i32_1 = arith.constant 0 : i32
    return %c0_i32, %c0_i32_0 : i32, i32
  }
  func.func @transform_3(%arg0: i32) -> (i32, i32, i32) {
    %c0_i32 = arith.constant 0 : i32
    %c0_i32_0 = arith.constant 0 : i32
    %c0_i32_1 = arith.constant 0 : i32
    %c0_i32_2 = arith.constant 0 : i32
    return %c0_i32, %c0_i32_0, %c0_i32_1 : i32, i32, i32
  }
  func.func @transform_4(%arg0: i32) -> (i32, i32) {
    %c0_i32 = arith.constant 0 : i32
    %c0_i32_0 = arith.constant 0 : i32
    %c0_i32_1 = arith.constant 0 : i32
    return %c0_i32, %c0_i32_0 : i32, i32
  }
  func.func @transform_5(%arg0: i32) -> (i32, i32) {
    %c0_i32 = arith.constant 0 : i32
    %c0_i32_0 = arith.constant 0 : i32
    %c0_i32_1 = arith.constant 0 : i32
    return %c0_i32, %c0_i32_0 : i32, i32
  }
  func.func @transform_6(%arg0: i32) -> (i32, i32) {
    %c0_i32 = arith.constant 0 : i32
    %c0_i32_0 = arith.constant 0 : i32
    %c0_i32_1 = arith.constant 0 : i32
    return %c0_i32, %c0_i32_0 : i32, i32
  }
  func.func @transform_7(%arg0: i32) -> (i32, i32) {
    %c0_i32 = arith.constant 0 : i32
    %c0_i32_0 = arith.constant 0 : i32
    %c0_i32_1 = arith.constant 0 : i32
    return %c0_i32, %c0_i32_0 : i32, i32
  }
  func.func @transform_8(%arg0: i32) -> (i32, i32) {
    %c0_i32 = arith.constant 0 : i32
    %c0_i32_0 = arith.constant 0 : i32
    %c0_i32_1 = arith.constant 0 : i32
    return %c0_i32, %c0_i32_0 : i32, i32
  }
  func.func @transform_9(%arg0: i32) -> (i32, i32) {
    %c0_i32 = arith.constant 0 : i32
    %c0_i32_0 = arith.constant 0 : i32
    %c0_i32_1 = arith.constant 0 : i32
    return %c0_i32, %c0_i32_0 : i32, i32
  }
  func.func @transform_10(%arg0: i32) -> (i32, i32) {
    %c0_i32 = arith.constant 0 : i32
    %c0_i32_0 = arith.constant 0 : i32
    %c0_i32_1 = arith.constant 0 : i32
    return %c0_i32, %c0_i32_0 : i32, i32
  }
  func.func @transform_11(%arg0: i32) -> (i32, i32) {
    %c0_i32 = arith.constant 0 : i32
    %c0_i32_0 = arith.constant 0 : i32
    %c0_i32_1 = arith.constant 0 : i32
    return %c0_i32, %c0_i32_0 : i32, i32
  }
  func.func @transform_12(%arg0: i32) -> (i32, i32) {
    %c0_i32 = arith.constant 0 : i32
    %c0_i32_0 = arith.constant 0 : i32
    %c0_i32_1 = arith.constant 0 : i32
    return %c0_i32, %c0_i32_0 : i32, i32
  }
  func.func @transform_13(%arg0: i32) -> (i32, i32, i32) {
    %c0_i32 = arith.constant 0 : i32
    %c0_i32_0 = arith.constant 0 : i32
    %c0_i32_1 = arith.constant 0 : i32
    return %arg0, %c0_i32, %c0_i32_0 : i32, i32, i32
  }
}

</mosaic_0001>

<bundles_post_ra>
// kernel: _lambda_.1
= control target key start
LH: loop header
LB: loop body
LE: loop exit
PB: predicated region body
PF: predicated region fallthrough
CT: control target
= control target key end

     0   :  { %s6253_s0 = inlined_call_operand.hbm [shape: f32[2,8,32], index: 0, kind: input, shape index: {}]   ;;  %s6254_s1 = inlined_call_operand.hbm [shape: bf16[32,96], index: 1, kind: input, shape index: {}]   ;;  %s6255_s2 = inlined_call_operand.vmem [shape: f32[1,96], index: 2, kind: input, shape index: {}]   ;;  %s6256_s3 = inlined_call_operand.hbm [shape: bf16[4,8,32], index: 3, kind: input, shape index: {}]   ;;  %s6257_s4 = inlined_call_operand.hbm [shape: f32[1,32], index: 4, kind: input, shape index: {}]   ;;  %s6258_s5 = inlined_call_operand.hbm [shape: f32[1,32], index: 5, kind: input, shape index: {}]   ;;  %s6259_s6 = inlined_call_operand.hbm [shape: f32[1,32], index: 6, kind: input, shape index: {}]   ;;  %s6260_s7 = inlined_call_operand.vmem [shape: bf16[32,64], index: 7, kind: input, shape index: {}]   ;;  %s6261_s8 = inlined_call_operand.hbm [shape: f32[1,64], index: 8, kind: input, shape index: {}]   ;;  %s6262_s9 = inlined_call_operand.hbm [shape: bf16[64,32], index: 9, kind: input, shape index: {}]   ;;  %s6263_s10 = inlined_call_operand.vmem [shape: f32[1,32], index: 10, kind: input, shape index: {}]   ;;  %s6264_s11 = inlined_call_operand.vmem [shape: f32[1,32], index: 11, kind: input, shape index: {}]   ;;  %s6265_s12 = inlined_call_operand.vmem [shape: f32[1,32], index: 12, kind: input, shape index: {}]   ;;  %s6266_s13 = inlined_call_operand.hbm [shape: f32[2,8,32], index: 13, kind: output, shape index: {}]  }
   0x1   :  { %6290 = sst [smem:[#allocation27_spill]] %s6254_s1 }
   0x2   :  { %6291 = sst [smem:[#allocation28_spill]] %s6256_s3 }
   0x3   :  { %6292 = sst [smem:[#allocation29_spill]] %s6257_s4 }
   0x4   :  { %6293 = sst [smem:[#allocation30_spill]] %s6258_s5 }
   0x5   :  { %6294 = sst [smem:[#allocation31_spill]] %s6259_s6 }
   0x6   :  { %6295 = sst [smem:[#allocation32_spill]] %s6261_s8 }
   0x7   :  { %6296 = sst [smem:[#allocation33_spill]] %s6265_s12 }
   0x8   :  { %6297 = sst [smem:[#allocation34_spill]] %s6266_s13 }
   0x9   :  { %18 = vsyncpa [#allocation3], 0 }
   0xa   :  { %20 = vsyncpa [#allocation3 + $0x1], 0 }
   0xb   :  { %21 = vsyncpa [#allocation6], 0 }
   0xc   :  { %22 = vsyncpa [#allocation9], 0 }
   0xd   :  { %23 = vsyncpa [#allocation12], 0 }
   0xe   :  { %24 = vsyncpa [#allocation15], 0 }
   0xf   :  { %25 = vsyncpa [#allocation4], 0 }
  0x10   :  { %27 = vsyncpa [#allocation4 + $0x1], 0  ;;  %s4845_s25 = smov 0   ;;  %s4847_s26 = smov 0  }
  0x11   :  { %s4849_s27 = smov 0   ;;  %s4851_s28 = smov 0  }
  0x12 LB: > { %s4756_s29 = smov [#allocation5]   ;;  %s4866_s14 = sadd.s32 4294967295, %s4754_s28   ;;  %s4754_s28 = sphi %s4851_s28, %s6381_s28   ;;  %s4750_s27 = sphi %s4849_s27, %s6380_s27   ;;  %s4746_s26 = sphi %s4847_s26, %s6379_s26   ;;  %s4742_s25 = sphi %s4845_s25, %s6378_s25  }
  0x13   : > { %s354_s30 = sshll.u32 %s4756_s29, 4  ;;  %p4055_p0 = scmp.ge.s32.totalorder %s4754_s28, 1  ;;  %s355_s30 = int_to_ptr.vmem [resolvable:$true] %s354_s30 }
  0x14   : > { %p6271_p1 = scmp.eq.s32.totalorder %s4866_s14, 0  ;;  %p342_p2 = scmp.lt.s32.totalorder %s4754_s28, 3 }
  0x15   : > { %s4757_s16 = smov [#allocation8]   ;;  %s4758_s19 = smov [#allocation11]  }
  0x16   : > { %p4871_p3 = pnand %p4055_p0, %p342_p2  ;;  %s384_s17 = sshll.u32 %s4757_s16, 4  ;;  %s385_s17 = int_to_ptr.vmem [resolvable:$true] %s384_s17 }
  0x17   : > { %s406_s20 = sshll.u32 %s4758_s19, 4  ;;  %s4475_s22 = scalar_lea.vmem %s355_s30, 256  ;;  %s4884_s20 = int_to_ptr.vmem [resolvable:$true] %s406_s20 }
  0x18   : > { %s6298_s15 = scalar_select %p4871_p3, 1, 0 }
  0x19   : > { %p4282_p5 = pneg %p4871_p3  ;;  %p4476_p8 = scmp.ne.s32.totalorder %s355_s30, %s4475_s22 }
  0x1a   : > { %p4483_p11 = scmp.lt.s32.totalorder %s355_s30, %s355_s30  ;;  %p4484_p12 = scmp.lt.s32.totalorder %s4475_s22, %s4475_s22 }
  0x1b   : > { %p4880_p6 = pnand %p4282_p5, %p6271_p1 }
  0x1c   : > { %p4485_p13 = por %p4484_p12, %p4483_p11 }
  0x1d   : > { %p4888_p7 = pneg %p4880_p6 }
  0x1f   : > { %p4478_p9 = pnand %p4476_p8, %p4888_p7 }
  0x21   : > { %p4479_p10 = pneg %p4478_p9 }
  0x23   : > { %p4486_p0 = pnand %p4485_p13, %p4479_p10 }
  0x25   : > { %4489 = shalt.err (!%p4486_p0)
}
  0x26   : > { %s6268_s23 = smov 64   ;;  %s6270_s24 = smov 4  }
  0x27   : > { %s6301_s1 = sld [smem:[#allocation27_spill]]  ;;  %s4501_s19 = scalar_lea.vmem %s385_s17, 16 }
  0x28   : > { %p4502_p2 = scmp.ne.s32.totalorder %s385_s17, %s4501_s19  ;;  %s4508_s22 = scalar_lea.vmem %s385_s17, 32 }
  0x29   : > { %p4509_p9 = scmp.lt.s32.totalorder %s385_s17, %s385_s17  ;;  %p4510_p10 = scmp.lt.s32.totalorder %s4508_s22, %s4501_s19 }
  0x2a   : > { %p4504_p5 = pnand %p4502_p2, %p4888_p7 }
  0x2b   : > { %p4511_p11 = por %p4510_p10, %p4509_p9 }
  0x2c   : > { %p4505_p8 = pneg %p4504_p5 }
  0x2d   : > { %4285 = dma.hbm_to_vmem [thread:$0]  (!%p4880_p6), %s6301_s1, 256, %s355_s30, [#allocation6], %s6268_s23, %s6268_s23, %s6270_s24  }
  0x2e   : > { %p4512_p12 = pnand %p4511_p11, %p4505_p8 }
  0x30   : > { %4515 = shalt.err (!%p4512_p12)
}
  0x31   : > { %s6302_s4 = sld [smem:[#allocation29_spill]]  ;;  %s4527_s30 = scalar_lea.vmem %s4884_s20, 16 }
  0x32   : > { %p4528_p13 = scmp.ne.s32.totalorder %s4884_s20, %s4527_s30  ;;  %s4534_s29 = scalar_lea.vmem %s4884_s20, 32 }
  0x33   : > { %p4535_p5 = scmp.lt.s32.totalorder %s4884_s20, %s4884_s20  ;;  %p4536_p8 = scmp.lt.s32.totalorder %s4534_s29, %s4527_s30 }
  0x34   : > { %p4530_p0 = pnand %p4528_p13, %p4888_p7 }
  0x35   : > { %p4537_p9 = por %p4536_p8, %p4535_p5 }
  0x36   : > { %p4531_p2 = pneg %p4530_p0 }
  0x37   : > { %4291 = dma.hbm_to_vmem [thread:$0]  (!%p4880_p6), %s6302_s4, 16, %s385_s17, [#allocation9]  }
  0x38   : > { %p4538_p10 = pnand %p4537_p9, %p4531_p2 }
  0x3a   : > { %4541 = shalt.err (!%p4538_p10)
}
  0x3b   : > { %s6303_s6 = sld [smem:[#allocation31_spill]]  ;;  %s4761_s17 = smov [#allocation7]  }
  0x3c   : > { %s370_s16 = sshll.u32 %s4761_s17, 4  ;;  %s4762_s19 = smov [#allocation10]   ;;  %s371_s16 = int_to_ptr.vmem [resolvable:$true] %s370_s16 }
  0x3d   : > { %s395_s22 = sshll.u32 %s4762_s19, 4  ;;  %s4553_s23 = scalar_lea.vmem %s371_s16, 256  ;;  %s396_s22 = int_to_ptr.vmem [resolvable:$true] %s395_s22 }
  0x3e   : > { %p4554_p11 = scmp.ne.s32.totalorder %s371_s16, %s4553_s23  ;;  %p4561_p0 = scmp.lt.s32.totalorder %s371_s16, %s371_s16 }
  0x3f   : > { %p4562_p2 = scmp.lt.s32.totalorder %s4553_s23, %s4553_s23 }
  0x40   : > { %p4556_p12 = pnand %p4554_p11, %p4888_p7 }
  0x41   : > { %4297 = dma.hbm_to_vmem [thread:$0]  (!%p4880_p6), %s6303_s6, 16, %s4884_s20, [#allocation12]  }
  0x42   : > { %p4557_p13 = pneg %p4556_p12  ;;  %p4563_p5 = por %p4562_p2, %p4561_p0 }
  0x44   : > { %p4564_p8 = pnand %p4563_p5, %p4557_p13 }
  0x46   : > { %4567 = shalt.err (!%p4564_p8)
}
  0x47   : > { %s6304_s30 = smov 64   ;;  %s6305_s3 = sld [smem:[#allocation28_spill]] }
  0x48   : > { %s4579_s12 = scalar_lea.vmem %s396_s22, 16  ;;  %s4586_s23 = scalar_lea.vmem %s396_s22, 32 }
  0x49   : > { %p4580_p9 = scmp.ne.s32.totalorder %s396_s22, %s4579_s12  ;;  %p4587_p12 = scmp.lt.s32.totalorder %s396_s22, %s396_s22 }
  0x4a   : > { %p4588_p13 = scmp.lt.s32.totalorder %s4586_s23, %s4579_s12 }
  0x4b   : > { %p4582_p10 = pnand %p4580_p9, %p4888_p7 }
  0x4c   : > { %p4589_p0 = por %p4588_p13, %p4587_p12 }
  0x4d   : > { %4288 = dma.hbm_to_vmem [thread:$0]  (!%p4880_p6), %s6305_s3, 256, %s371_s16, [#allocation6], %s6304_s30, %s6304_s30, %s6270_s24  }
  0x4e   : > { %p4583_p11 = pneg %p4582_p10 }
  0x50   : > { %p4590_p2 = pnand %p4589_p0, %p4583_p11 }
  0x52   : > { %4593 = shalt.err (!%p4590_p2)
}
  0x53   : > { %s6306_s5 = sld [smem:[#allocation30_spill]]  ;;  %s4763_s16 = smov [#allocation13]  }
  0x54   : > { %s420_s19 = sshll.u32 %s4763_s16, 4  ;;  %s4764_s20 = smov [#allocation14]   ;;  %s421_s19 = int_to_ptr.vmem [resolvable:$true] %s420_s19 }
  0x55   : > { %s430_s29 = sshll.u32 %s4764_s20, 4  ;;  %s4605_s24 = scalar_lea.vmem %s421_s19, 16  ;;  %s431_s29 = int_to_ptr.vmem [resolvable:$true] %s430_s29 }
  0x56   : > { %p4606_p5 = scmp.ne.s32.totalorder %s421_s19, %s4605_s24  ;;  %s4612_s12 = scalar_lea.vmem %s421_s19, 32 }
  0x57   : > { %p4613_p10 = scmp.lt.s32.totalorder %s421_s19, %s421_s19  ;;  %p4614_p11 = scmp.lt.s32.totalorder %s4612_s12, %s4605_s24 }
  0x58   : > { %p4608_p8 = pnand %p4606_p5, %p4888_p7 }
  0x59   : > { %4294 = dma.hbm_to_vmem [thread:$0]  (!%p4880_p6), %s6306_s5, 16, %s396_s22, [#allocation9]  }
  0x5a   : > { %p4609_p9 = pneg %p4608_p8  ;;  %p4615_p12 = por %p4614_p11, %p4613_p10 }
  0x5c   : > { %p4616_p13 = pnand %p4615_p12, %p4609_p9 }
  0x5e   : > { %4619 = shalt.err (!%p4616_p13)
}
  0x5f   : > { %s6307_s8 = sld [smem:[#allocation32_spill]]  ;;  %s4631_s13 = scalar_lea.vmem %s431_s29, 512 }
  0x60   : > { %p4632_p0 = scmp.ne.s32.totalorder %s431_s29, %s4631_s13  ;;  %p4639_p8 = scmp.lt.s32.totalorder %s431_s29, %s431_s29 }
  0x61   : > { %p4640_p4 = scmp.lt.s32.totalorder %s4631_s13, %s4631_s13 }
  0x62   : > { %p4634_p2 = pnand %p4632_p0, %p4888_p7 }
  0x63   : > { %p4641_p1 = por %p4640_p4, %p4639_p8 }
  0x64   : > { %p4635_p5 = pneg %p4634_p2 }
  0x65   : > { %4300 = dma.hbm_to_vmem [thread:$0]  (!%p4880_p6), %s6307_s8, 16, %s421_s19, [#allocation12]  }
  0x66   : > { %p4642_p3 = pnand %p4641_p1, %p4635_p5 }
  0x68   : > { %4645 = shalt.err (!%p4642_p3)
}
  0x69   : > { %s6308_s24 = smov 4   ;;  %s4054_s18 = sadd.s32 4294967294, %s4754_s28  }
  0x6a   : > { %4303 = dma.hbm_to_vmem [thread:$0]  (!%p4880_p6), %s6262_s9, 512, %s431_s29, [#allocation15], %s6304_s30, %s6304_s30, %s6308_s24  }
  0x6b   : > { %s4958_s21 = sadd.s32 1, %s4754_s28   ;;  %s40_s19 = sadd.s32 1, %s4750_s27 }
  0x6c   : > { %s37_s20 = ssub.s32 %s4754_s28, %s4958_s21  ;;  %p47_p1 = scmp.ne.s32.totalorder %s4750_s27, %s4746_s26 }
  0x6d   : > { %p38_p3 = scmp.eq.s32.totalorder %s37_s20, 0  ;;  %p48_p4 = scmp.eq.s32.totalorder %s4754_s28, 0 }
  0x6e   : > { %p53_p7 = scmp.ne.s32.totalorder %s4746_s26, %s4742_s25  ;;  %p329_p9 = scmp.eq.s32.totalorder %s4866_s14, 1 }
  0x6f   : > { %s4970_s12 = scalar_select %p38_p3, %s4750_s27, %s40_s19  }
  0x70   : > { %p49_p10 = por %p48_p4, %p47_p1  ;;  %p6309_p11 = scmp.eq.s32.totalorder %s4866_s14, 0 }
  0x71   : > { %p4978_p6 = por %p329_p9, %p47_p1  ;;  %p335_p13 = scmp.eq.s32.totalorder %s4054_s18, 1 }
  0x72   : > { %p4974_p12 = por %p6309_p11, %p53_p7  ;;  %p4319_p0 = scmp.lt.s32.totalorder %s4754_s28, 2 }
  0x73   : > { %s6311_s30 = scalar_select %p4978_p6, 1, 0 }
  0x74   : > { %s6310_s23 = scalar_select %p4974_p12, 1, 0 }
  0x75   : > { %s453_s29 = sand.u32 1, %s4750_s27   ;;  %p4984_p2 = por %p335_p13, %p53_p7 }
  0x76   : > { %s4064_s13 = sshll.u32 %s453_s29, 3  ;;  %s4065_s24 = sshll.u32 %s4754_s28, 7 }
  0x77   : > { %s6312_s22 = scalar_select %p4984_p2, 1, 0 }
  0x78   : > { %s4992_s19 = scalar_lea.hbm %s6253_s0, %s4065_s24  ;;  %s457_s20 = scalar_lea.vmem [#allocation2], %s4064_s13 }
  0x79   : > { %s464_s1 = sshll.u32 %s457_s20, 4  ;;  %p4994_p5 = pnand %p4319_p0, %p49_p10  ;;  %s465_s1 = int_to_ptr.vmem [resolvable:$true] %s464_s1 }
  0x7a   : > { %s454_s3 = scalar_lea.sflag [#allocation3], %s453_s29  ;;  %s4646_s4 = scalar_lea.hbm %s4992_s19, 128 }
  0x7b   : > { %p4647_p8 = scmp.ne.s32.totalorder %s4992_s19, %s4646_s4  ;;  %p4648_p1 = pneg %p4994_p5 }
  0x7c   : > { %s4651_s16 = scalar_lea.hbm %s6253_s0, 256  ;;  %p4652_p7 = scmp.lt.s32.totalorder %s4992_s19, %s6253_s0 }
  0x7d   : > { %p4649_p3 = pnand %p4648_p1, %p4647_p8  ;;  %p4653_p9 = scmp.lt.s32.totalorder %s4651_s16, %s4646_s4 }
  0x7f   : > { %p4650_p4 = pneg %p4649_p3  ;;  %p4654_p10 = por %p4653_p9, %p4652_p7 }
  0x81   : > { %p4655_p11 = pnand %p4654_p10, %p4650_p4 }
  0x83   : > { %4658 = shalt.err (!%p4655_p11)
}
  0x84   : > { %s4659_s20 = scalar_lea.vmem %s465_s1, 128  ;;  %s4765_s29 = smov [#allocation2]  }
  0x85   : > { %p4660_p13 = scmp.ne.s32.totalorder %s465_s1, %s4659_s20  ;;  %s4664_s6 = sshll.u32 %s4765_s29, 4  ;;  %s4665_s6 = int_to_ptr.vmem [resolvable:$false] %s4664_s6 }
  0x86   : > { %s4666_s8 = scalar_lea.vmem %s4665_s6, 256  ;;  %p4667_p8 = scmp.lt.s32.totalorder %s465_s1, %s4665_s6 }
  0x87   : > { %p4662_p0 = pnand %p4660_p13, %p4648_p1  ;;  %p4668_p3 = scmp.lt.s32.totalorder %s4666_s8, %s4659_s20 }
  0x89   : > { %p4663_p2 = pneg %p4662_p0  ;;  %p4669_p6 = por %p4668_p3, %p4667_p8 }
  0x8b   : > { %p4670_p12 = pnand %p4669_p6, %p4663_p2 }
  0x8d   : > { %4673 = shalt.err (!%p4670_p12)
}
  0x8e   : > { %4307 = dma.hbm_to_vmem [thread:$0]  (!%p4994_p5), %s4992_s19, 128, %s465_s1, %s454_s3  }
  0x8f   : > { %p6314_p4 = scmp.ne.s32.totalorder %s6298_s15, 0 }
  0x91   : > { %473 = sbr.rel (%p6314_p4) target bundleno = 3223 (0xc97), region = 72 }
  0x96   : > { %s5015_s4 = sand.u32 1, %s4746_s26   ;;  %p6315_p12 = scmp.ne.s32.totalorder %s6310_s23, 0 }
  0x97   : > { %s4067_s5 = sshll.u32 %s5015_s4, 3  ;;  %s476_s6 = scalar_lea.sflag [#allocation3], %s5015_s4 }
  0x98   : > { %s5021_s8 = scalar_lea.vmem [#allocation2], %s4067_s5 }
  0x99   : > { %4717 = dma.done.wait (%p6315_p12), %s476_s6, 128  }
  0x9a   : > { %4719 = vsyncadd (%p6315_p12), %s476_s6, 4294967168  ;;  %p6316_p6 = scmp.eq.s32.totalorder %s4866_s14, 0 }
  0x9c   : > { %4721 = dma.done.wait (%p6316_p6), [#allocation6], 512   ;;  %p6317_p2 = pmov %p6316_p6 }
  0x9e   : > { %4723 = vsyncadd (%p6317_p2), [#allocation6], 4294966784  ;;  %p6318_p5 = pmov %p6317_p2 }
  0x9f   : > { %p6319_p1 = pmov %p6317_p2 }
  0xa0   : > { %4725 = dma.done.wait (%p6318_p5), [#allocation9], 32  }
  0xa1   : > { %4727 = vsyncadd (%p6319_p1), [#allocation9], 4294967264  ;;  %p6320_p7 = pmov %p6319_p1 }
  0xa2   : > { %p6321_p9 = pmov %p6319_p1 }
  0xa3   : > { %4729 = dma.done.wait (%p6320_p7), [#allocation12], 32  }
  0xa4   : > { %4731 = vsyncadd (%p6321_p9), [#allocation12], 4294967264  ;;  %p6322_p10 = pmov %p6319_p1 }
  0xa5   : > { %p6323_p11 = pmov %p6319_p1 }
  0xa6   : > { %4733 = dma.done.wait (%p6322_p10), [#allocation15], 512  }
  0xa7   : > { %4735 = vsyncadd (%p6323_p11), [#allocation15], 4294966784  ;;  %v647_v0 = vlaneseq  ;;  %v6284_v1 = vmov 0.0   ;;  %vm6281_vm0 = vmmov 0   ;;  %v4768_v4 = vmov 0   ;;  %v4379_v9 = vld [vmem:[#allocation5 + $0x8] sm:$0xff]  }
  0xa8   : > { %4150 = vmatprep.subr.bf16.mxu1 %v6284_v1  ;;  %4154 = vmatprep.mubr.msk.bf16.mxu1 %vm6281_vm0, %v6284_v1  ;;  %vm6275_vm2 = vcmask 261120   ;;  %v4380_v11 = vld [vmem:[#allocation5] sm:$0xff]   ;;  %v551_v12 = vld [vmem:[%s5021_s8] sm:$0xff]  ;;  %s4769_s15 = smov 104   ;;  %s4770_s23 = smov 120   ;;  %vm6283_vm3 = vcmask 64512  }
  0xa9   : > { %v648_v2 = vshrl.u32 %v647_v0, 7  ;;  %v650_v3 = vand.u32 127, %v647_v0  ;;  %4378 = vset.pattern.permute.xlu0 %v4768_v4  ;;  %4377 = vset.pattern.permute.xlu1 %v4768_v4  ;;  %v552_v15 = vpack.c.bf16 %v551_v12, %v551_v12  ;;  %v4076_v19 = vld [vmem:[%s6255_s2] ss:$0 sm:$0xff]  ;;  %s4771_s19 = smov 112   ;;  %s4772_s18 = smov 96  }
  0xaa   : > { %4164 = vmatprep.subr.bf16.mxu0 %v6284_v1  ;;  %4166 = vmatprep.mubr.msk.bf16.mxu0 %vm6281_vm0, %v6284_v1  ;;  %s4773_s24 = smov 64   ;;  %s6373_s13 = sld [smem:[#allocation34_spill]] }
  0xab   : > { %v5051_v5 = vsub.s32 1, %v648_v2  ;;  %v5053_v6 = vsub.s32 2, %v648_v2  ;;  %vm879_vm1 = vcmp.lt.s32.totalorder %v650_v3, %v648_v2  ;;  %v5056_v8 = vsub.s32 %v650_v3, %v648_v2  ;;  %4151 = vmatpush3.bf16.msra.mxu1 %v4379_v9  ;;  %s3904_s29 = scalar_lea.sflag [#allocation4], %s5015_s4  ;;  %p6375_p0 = scmp.ne.s32.totalorder %s6311_s30, 0 }
  0xac   : > { %v882_v7 = vsel %vm879_vm1, 1, %v4768_v4  ;;  %v5060_v13 = vsub.s32 4, %v648_v2  ;;  %4152 = vmatprep.subr.bf16.mxu1 %v6284_v1  ;;  %v5064_v16 = vsub.s32 6, %v648_v2  ;;  %v5075_v23 = vsub.s32 0, %v648_v2 }
  0xad   : > { %v893_v10 = vrot.slane %v882_v7, %v5051_v5  ;;  %v900_v14 = vrot.slane %v882_v7, %v5053_v6  ;;  %v5079_v27 = vsub.s32 3, %v648_v2  ;;  %v5084_v29 = vsub.s32 5, %v648_v2 }
  0xae   : > { %v914_v17 = vrot.slane %v882_v7, %v5060_v13  ;;  %v928_v18 = vrot.slane %v882_v7, %v5064_v16  ;;  %v886_v28 = vrot.slane %v882_v7, %v5075_v23  ;;  %v5087_v31 = vsub.s32 7, %v648_v2 }
  0xaf   : > { %895 = vbcast.lane.b32.xlu1 %v893_v10, 256  ;;  %4153 = vmatpush3.bf16.msra.mxu1 %v4380_v11  ;;  %v907_v30 = vrot.slane %v882_v7, %v5079_v27  ;;  %v921_v32 = vrot.slane %v882_v7, %v5084_v29 }
  0xb0   : > { %4158 = vmatprep.subr.bf16.mxu1 %v6284_v1  ;;  %v935_v33 = vrot.slane %v882_v7, %v5087_v31 }
  0xb2   : > { %4155 = vmatmul.mubr.msk.bf16.vlgmr.msra.gmra.mxu1 %vm6275_vm2, %v552_v15 }
  0xb3   : > { %902 = vbcast.lane.b32.xlu1 %v900_v14, 256  ;;  %4160 = vmatprep.mubr.msk.bf16.mxu1 %vm6281_vm0, %v6284_v1 }
  0xb7   : > { %916 = vbcast.lane.b32.xlu1 %v914_v17, 256 }
  0xbb   : > { %930 = vbcast.lane.b32.xlu1 %v928_v18, 256 }
 0x121   : > { %v5092_v36 = vpop.permute.xlu1 %895 }
 0x122   : > { %vm6277_vm4 = vcmp.ne.s32.totalorder %v5092_v36, 0 }
 0x125   : > { %v5094_v37 = vpop.permute.xlu1 %902 }
 0x129   : > { %v5096_v38 = vpop.permute.xlu1 %916 }
 0x12a   : > { %vm6276_vm15 = vcmp.ne.s32.totalorder %v5096_v38, 0 }
 0x12d   : > { %v5098_v39 = vpop.permute.xlu1 %930 }
 0x172   : > { %v614_v20 = vpop.f32.mrf.mxu1 }
 0x173   : > { %v615_v21 = vadd.f32 %v4076_v19, %v614_v20 }
 0x174   : > { %v4156_v22 = vpop.f32.mrf.mxu1 }
 0x175   : > { %627 = vrot.lane.b32.xlu1 %v615_v21, %s4769_s15  ;;  %621 = vrot.lane.b32.xlu0 %v615_v21, %s4770_s23  ;;  %v5077_v25 = vpack.c.bf16 %v615_v21, %v615_v21  ;;  %v630_v34 = vmul.f32 %v615_v21, %v615_v21  ;;  %v1366_v48 = vmul.f32 0.35355338, %v615_v21  ;;  %s6372_s23 = sld [smem:[#allocation33_spill]] }
 0x176   : > { %v617_v24 = vpop.f32.mrf.mxu1 }
 0x177   : > { %v635_v35 = vsel %vm6283_vm3, %v630_v34, 0.0  ;;  %v1370_v49 = vpack.c.bf16 %v1366_v48, %v1366_v48 }
 0x178   : > { %v4157_v26 = vpop.f32.mrf.mxu1 }
 0x179   : > { %624 = vrot.lane.b32.xlu0 %v615_v21, %s4771_s19  ;;  %1379 = vrot.lane.b32.xlu1 %v5077_v25, %s4772_s18  ;;  %s4112_s19 = sshll.u32 %s4866_s14, 7 }
 0x17a   : > { %s3915_s20 = scalar_lea.hbm %s6373_s13, %s4112_s19 }
 0x17d   : > { %888 = vbcast.lane.b32.xlu0 %v886_v28, 256 }
 0x181   : > { %909 = vbcast.lane.b32.xlu0 %v907_v30, 256 }
 0x185   : > { %923 = vbcast.lane.b32.xlu0 %v921_v32, 256 }
 0x189   : > { %937 = vbcast.lane.b32.xlu0 %v935_v33, 256 }
 0x19d   : > { %636 = vadd.xlane.f32.xlu1 %v635_v35 }
 0x1e7   : > { %v5100_v40 = vpop.permute.xlu1 %627  ;;  %v5102_v41 = vpop.permute.xlu0 %621 }
 0x1e8   : > { %v5106_v42 = vpack.c.bf16 %v5102_v41, %v5102_v41  ;;  %v5115_v46 = vpack.c.bf16 %v5100_v40, %v5100_v40  ;;  %v631_v50 = vmul.f32 %v5102_v41, %v5102_v41  ;;  %v633_v53 = vmul.f32 %v5100_v40, %v5100_v40 }
 0x1e9   : > { %v1367_v22 = vmul.f32 0.35355338, %v5102_v41  ;;  %v1369_v34 = vmul.f32 0.35355338, %v5100_v40 }
 0x1ea   : > { %1428 = vrot.lane.b32.xlu0 %v5106_v42, %s4772_s18  ;;  %v638_v51 = vsel %vm6283_vm3, %v631_v50, 0.0  ;;  %v644_v55 = vsel %vm6283_vm3, %v633_v53, 0.0 }
 0x1eb   : > { %v5110_v43 = vpop.permute.xlu0 %624  ;;  %v1380_v44 = vpop.permute.xlu1 %1379  ;;  %v1371_v30 = vpack.c.bf16 %v1367_v22, %v1367_v22  ;;  %v1373_v41 = vpack.c.bf16 %v1369_v34, %v1369_v34 }
 0x1ec   : > { %v1385_v45 = vsel %vm6283_vm3, %v1380_v44, 0  ;;  %v5119_v47 = vpack.c.bf16 %v5110_v43, %v5110_v43  ;;  %v632_v52 = vmul.f32 %v5110_v43, %v5110_v43  ;;  %v1368_v32 = vmul.f32 0.35355338, %v5110_v43 }
 0x1ed   : > { %4159 = vmatpush3.bf16.xpose.msra.mxu1 %v1385_v45 }
 0x1ee   : > { %1526 = vrot.lane.b32.xlu0 %v5115_v46, %s4772_s18  ;;  %1477 = vrot.lane.b32.xlu1 %v5119_v47, %s4772_s18  ;;  %v641_v54 = vsel %vm6283_vm3, %v632_v52, 0.0  ;;  %v1372_v35 = vpack.c.bf16 %v1368_v32, %v1368_v32  ;;  %s549_s18 = scalar_lea.vmem [#allocation16], %s4067_s5 }
 0x1ef   : > { %4170 = vmatprep.subr.bf16.mxu1 %v6284_v1  ;;  %v5138_v56 = vpop.permute.xlu0 %888 }
 0x1f0   : > { %vm6279_vm5 = vcmp.ne.s32.totalorder %v5138_v56, 0 }
 0x1f3   : > { %v5140_v57 = vpop.permute.xlu0 %909 }
 0x1f4   : > { %4161 = vmatmul.mubr.msk.bf16.vlgmr.msra.gmra.mxu1 %vm6283_vm3, %v1370_v49 }
 0x1f5   : > { %4172 = vmatprep.mubr.msk.bf16.mxu1 %vm6281_vm0, %v6284_v1 }
 0x1f7   : > { %v5163_v0 = vpop.permute.xlu0 %923 }
 0x1fb   : > { %v5190_v12 = vpop.permute.xlu0 %937 }
 0x20d   : > { %639 = vadd.xlane.f32.xlu0 %v638_v51 }
 0x211   : > { %642 = vadd.xlane.f32.xlu0 %v641_v54 }
 0x212   : > { %645 = vadd.xlane.f32.xlu1 %v644_v55 }
 0x226   : > { %v5142_v58 = vpop.xlane.xlu1 %636 }
 0x227   : > { %v662_v59 = vrot.slane %v5142_v58, %v5051_v5  ;;  %v658_v60 = vrot.slane %v5142_v58, %v5075_v23  ;;  %v674_v61 = vrot.slane %v5142_v58, %v5060_v13  ;;  %v666_v62 = vrot.slane %v5142_v58, %v5053_v6 }
 0x228   : > { %v678_v63 = vrot.slane %v5142_v58, %v5084_v29  ;;  %v670_v3 = vrot.slane %v5142_v58, %v5079_v27  ;;  %v682_v9 = vrot.slane %v5142_v58, %v5064_v16  ;;  %v686_v11 = vrot.slane %v5142_v58, %v5087_v31 }
 0x229   : > { %vm816_vm6 = vcmp.gt.f32.partialorder %v5142_v58, %v662_v59  ;;  %vm848_vm7 = vcmp.eq.f32.partialorder %v5142_v58, %v662_v59  ;;  %vm847_vm8 = vcmp.eq.f32.partialorder %v5142_v58, %v658_v60  ;;  %vm815_vm10 = vcmp.gt.f32.partialorder %v5142_v58, %v658_v60 }
 0x22a   : > { %vm948_vm9 = vmand %vm848_vm7, %vm6277_vm4  ;;  %vm851_vm12 = vcmp.eq.f32.partialorder %v5142_v58, %v674_v61  ;;  %vm819_vm14 = vcmp.gt.f32.partialorder %v5142_v58, %v674_v61  ;;  %vm850_vm4 = vcmp.eq.f32.partialorder %v5142_v58, %v670_v3 }
 0x22b   : > { %vm980_vm11 = vmor %vm816_vm6, %vm948_vm9  ;;  %vm849_vm6 = vcmp.eq.f32.partialorder %v5142_v58, %v666_v62  ;;  %vm817_vm9 = vcmp.gt.f32.partialorder %v5142_v58, %v666_v62 }
 0x22c   : > { %v1012_v2 = vsel %vm980_vm11, 1, %v4768_v4  ;;  %vm947_vm13 = vmand %vm847_vm8, %vm6279_vm5  ;;  %vm6278_vm8 = vcmp.ne.s32.totalorder %v5094_v37, 0  ;;  %vm6280_vm11 = vcmp.ne.s32.totalorder %v5163_v0, 0 }
 0x22d   : > { %1047 = vperm.xlu0 %4378, %v1012_v2   ;;  %vm979_vm1 = vmor %vm815_vm10, %vm947_vm13  ;;  %vm852_vm10 = vcmp.eq.f32.partialorder %v5142_v58, %v678_v63 }
 0x22e   : > { %v1011_v7 = vsel %vm979_vm1, 1, %v4768_v4  ;;  %vm951_vm7 = vmand %vm851_vm12, %vm6276_vm15  ;;  %vm820_vm12 = vcmp.gt.f32.partialorder %v5142_v58, %v678_v63  ;;  %vm942_vm1 = vcmp.ne.s32.totalorder %v5140_v57, 0 }
 0x22f   : > { %1044 = vperm.xlu1 %4377, %v1011_v7   ;;  %vm983_vm2 = vmor %vm819_vm14, %vm951_vm7  ;;  %vm818_vm14 = vcmp.gt.f32.partialorder %v5142_v58, %v670_v3  ;;  %vm853_vm7 = vcmp.eq.f32.partialorder %v5142_v58, %v682_v9 }
 0x230   : > { %v1015_v10 = vsel %vm983_vm2, 1, %v4768_v4  ;;  %vm949_vm13 = vmand %vm849_vm6, %vm6278_vm8  ;;  %vm945_vm8 = vcmp.ne.s32.totalorder %v5098_v39, 0 }
 0x231   : > { %1056 = vperm.xlu0 %4378, %v1015_v10   ;;  %vm981_vm15 = vmor %vm817_vm9, %vm949_vm13  ;;  %vm821_vm13 = vcmp.gt.f32.partialorder %v5142_v58, %v682_v9 }
 0x232   : > { %v1013_v14 = vsel %vm981_vm15, 1, %v4768_v4  ;;  %vm952_vm2 = vmand %vm852_vm10, %vm6280_vm11  ;;  %vm946_vm15 = vcmp.ne.s32.totalorder %v5190_v12, 0  ;;  %vm854_vm10 = vcmp.eq.f32.partialorder %v5142_v58, %v686_v11 }
 0x233   : > { %1050 = vperm.xlu1 %4377, %v1013_v14   ;;  %vm984_vm6 = vmor %vm820_vm12, %vm952_vm2  ;;  %vm822_vm2 = vcmp.gt.f32.partialorder %v5142_v58, %v686_v11 }
 0x234   : > { %v1016_v15 = vsel %vm984_vm6, 1, %v4768_v4  ;;  %vm950_vm9 = vmand %vm850_vm4, %vm942_vm1 }
 0x235   : > { %1059 = vperm.xlu0 %4378, %v1016_v15   ;;  %vm982_vm5 = vmor %vm818_vm14, %vm950_vm9 }
 0x236   : > { %v1014_v17 = vsel %vm982_vm5, 1, %v4768_v4  ;;  %vm953_vm12 = vmand %vm853_vm7, %vm945_vm8  ;;  %vm6324_vm7 = vcmp.ne.s32.totalorder %v5138_v56, 0 }
 0x237   : > { %1053 = vperm.xlu1 %4377, %v1014_v17   ;;  %vm985_vm6 = vmor %vm821_vm13, %vm953_vm12 }
 0x238   : > { %v1017_v18 = vsel %vm985_vm6, 1, %v4768_v4  ;;  %vm954_vm4 = vmand %vm854_vm10, %vm946_vm15 }
 0x239   : > { %1062 = vperm.xlu0 %4378, %v1017_v18   ;;  %vm986_vm11 = vmor %vm822_vm2, %vm954_vm4  ;;  %vm6325_vm2 = vcmp.ne.s32.totalorder %v5092_v36, 0 }
 0x23a   : > { %v1018_v19 = vsel %vm986_vm11, 1, %v4768_v4 }
 0x23d   : > { %1065 = vperm.xlu0 %4378, %v1018_v19  }
 0x25c   : > { %v1429_v20 = vpop.permute.xlu0 %1428 }
 0x25d   : > { %v1434_v21 = vsel %vm6283_vm3, %v1429_v20, 0 }
 0x25e   : > { %4165 = vmatpush3.bf16.xpose.msra.mxu0 %v1434_v21 }
 0x25f   : > { %4176 = vmatprep.subr.bf16.mxu0 %v6284_v1 }
 0x260   : > { %v1478_v24 = vpop.permute.xlu1 %1477  ;;  %v1527_v28 = vpop.permute.xlu0 %1526 }
 0x261   : > { %v1483_v26 = vsel %vm6283_vm3, %v1478_v24, 0  ;;  %v1532_v33 = vsel %vm6283_vm3, %v1527_v28, 0 }
 0x262   : > { %4171 = vmatpush3.bf16.xpose.msra.mxu1 %v1483_v26 }
 0x263   : > { %4182 = vmatprep.subr.bf16.mxu1 %v6284_v1 }
 0x265   : > { %4167 = vmatmul.mubr.msk.bf16.vlgmr.msra.gmra.mxu0 %vm6283_vm3, %v1371_v30 }
 0x266   : > { %4177 = vmatpush3.bf16.xpose.msra.mxu0 %v1532_v33  ;;  %4178 = vmatprep.mubr.msk.bf16.mxu0 %vm6281_vm0, %v6284_v1 }
 0x267   : > { %4188 = vmatprep.subr.bf16.mxu0 %v6284_v1 }
 0x269   : > { %4173 = vmatmul.mubr.msk.bf16.vlgmr.msra.gmra.mxu1 %vm6283_vm3, %v1372_v35 }
 0x26a   : > { %4184 = vmatprep.mubr.msk.bf16.mxu1 %vm6281_vm0, %v6284_v1 }
 0x26d   : > { %4179 = vmatmul.mubr.msk.bf16.vlgmr.msra.gmra.mxu0 %vm6283_vm3, %v1373_v41 }
 0x26e   : > { %4190 = vmatprep.mubr.msk.bf16.mxu0 %vm6281_vm0, %v6284_v1 }
 0x296   : > { %v5230_v43 = vpop.xlane.xlu0 %639 }
 0x297   : > { %v690_v44 = vrot.slane %v5230_v43, %v5075_v23  ;;  %v694_v40 = vrot.slane %v5230_v43, %v5051_v5  ;;  %v714_v45 = vrot.slane %v5230_v43, %v5064_v16  ;;  %v698_v48 = vrot.slane %v5230_v43, %v5053_v6 }
 0x298   : > { %v702_v52 = vrot.slane %v5230_v43, %v5079_v27  ;;  %v706_v58 = vrot.slane %v5230_v43, %v5060_v13  ;;  %v710_v61 = vrot.slane %v5230_v43, %v5084_v29  ;;  %v718_v3 = vrot.slane %v5230_v43, %v5087_v31 }
 0x299   : > { %vm823_vm5 = vcmp.gt.f32.partialorder %v5230_v43, %v690_v44  ;;  %vm855_vm11 = vcmp.eq.f32.partialorder %v5230_v43, %v690_v44  ;;  %vm856_vm14 = vcmp.eq.f32.partialorder %v5230_v43, %v694_v40  ;;  %vm824_vm13 = vcmp.gt.f32.partialorder %v5230_v43, %v694_v40 }
 0x29a   : > { %v5243_v49 = vpop.xlane.xlu0 %642  ;;  %vm955_vm9 = vmand %vm855_vm11, %vm6324_vm7  ;;  %vm861_vm12 = vcmp.eq.f32.partialorder %v5230_v43, %v714_v45  ;;  %vm829_vm4 = vcmp.gt.f32.partialorder %v5230_v43, %v714_v45  ;;  %vm857_vm3 = vcmp.eq.f32.partialorder %v5230_v43, %v698_v48  ;;  %vm825_vm11 = vcmp.gt.f32.partialorder %v5230_v43, %v698_v48 }
 0x29b   : > { %vm987_vm10 = vmor %vm823_vm5, %vm955_vm9  ;;  %v722_v50 = vrot.slane %v5243_v49, %v5075_v23  ;;  %v730_v54 = vrot.slane %v5243_v49, %v5053_v6  ;;  %vm6326_vm9 = vcmp.ne.s32.totalorder %v5094_v37, 0  ;;  %v5272_v59 = vpop.xlane.xlu1 %645  ;;  %v738_v9 = vrot.slane %v5243_v49, %v5060_v13 }
 0x29c   : > { %v1019_v51 = vsel %vm987_vm10, 1, %v4768_v4  ;;  %vm956_vm6 = vmand %vm856_vm14, %vm6325_vm2  ;;  %vm6327_vm2 = vcmp.ne.s32.totalorder %v5138_v56, 0  ;;  %v754_v63 = vrot.slane %v5272_v59, %v5075_v23  ;;  %v726_v11 = vrot.slane %v5243_v49, %v5051_v5 }
 0x29d   : > { %1068 = vperm.xlu0 %4378, %v1019_v51   ;;  %vm988_vm0 = vmor %vm824_vm13, %vm956_vm6  ;;  %vm863_vm14 = vcmp.eq.f32.partialorder %v5243_v49, %v722_v50  ;;  %vm831_vm10 = vcmp.gt.f32.partialorder %v5243_v49, %v722_v50  ;;  %v742_v14 = vrot.slane %v5243_v49, %v5084_v29  ;;  %v746_v18 = vrot.slane %v5243_v49, %v5064_v16 }
 0x29e   : > { %v1020_v53 = vsel %vm988_vm0, 1, %v4768_v4  ;;  %vm961_vm5 = vmand %vm861_vm12, %vm945_vm8  ;;  %vm858_vm12 = vcmp.eq.f32.partialorder %v5230_v43, %v702_v52  ;;  %v758_v21 = vrot.slane %v5272_v59, %v5051_v5  ;;  %v750_v24 = vrot.slane %v5243_v49, %v5087_v31 }
 0x29f   : > { %1071 = vperm.xlu1 %4377, %v1020_v53   ;;  %vm993_vm7 = vmor %vm829_vm4, %vm961_vm5  ;;  %vm826_vm4 = vcmp.gt.f32.partialorder %v5230_v43, %v702_v52  ;;  %vm865_vm5 = vcmp.eq.f32.partialorder %v5243_v49, %v730_v54  ;;  %v762_v33 = vrot.slane %v5272_v59, %v5053_v6  ;;  %v778_v41 = vrot.slane %v5272_v59, %v5064_v16 }
 0x2a0   : > { %v1025_v55 = vsel %vm993_vm7, 1, %v4768_v4  ;;  %vm957_vm13 = vmand %vm857_vm3, %vm6326_vm9  ;;  %vm833_vm7 = vcmp.gt.f32.partialorder %v5243_v49, %v730_v54  ;;  %v766_v45 = vrot.slane %v5272_v59, %v5079_v27 }
 0x2a1   : > { %1086 = vperm.xlu0 %4378, %v1025_v55   ;;  %vm989_vm0 = vmor %vm825_vm11, %vm957_vm13  ;;  %vm6328_vm13 = vcmp.ne.s32.totalorder %v5094_v37, 0  ;;  %v782_v55 = vrot.slane %v5272_v59, %v5087_v31 }
 0x2a2   : > { %v1021_v60 = vsel %vm989_vm0, 1, %v4768_v4  ;;  %vm963_vm6 = vmand %vm863_vm14, %vm6327_vm2  ;;  %vm859_vm14 = vcmp.eq.f32.partialorder %v5230_v43, %v706_v58  ;;  %vm827_vm0 = vcmp.gt.f32.partialorder %v5230_v43, %v706_v58 }
 0x2a3   : > { %1074 = vperm.xlu1 %4377, %v1021_v60   ;;  %vm995_vm3 = vmor %vm831_vm10, %vm963_vm6  ;;  %vm6329_vm6 = vcmp.ne.s32.totalorder %v5096_v38, 0 }
 0x2a4   : > { %v1027_v62 = vsel %vm995_vm3, 1, %v4768_v4  ;;  %vm958_vm11 = vmand %vm858_vm12, %vm942_vm1  ;;  %vm860_vm12 = vcmp.eq.f32.partialorder %v5230_v43, %v710_v61  ;;  %vm828_vm3 = vcmp.gt.f32.partialorder %v5230_v43, %v710_v61 }
 0x2a5   : > { %1092 = vperm.xlu0 %4378, %v1027_v62   ;;  %vm990_vm9 = vmor %vm826_vm4, %vm958_vm11 }
 0x2a6   : > { %v1022_v2 = vsel %vm990_vm9, 1, %v4768_v4  ;;  %vm965_vm10 = vmand %vm865_vm5, %vm6328_vm13  ;;  %vm871_vm5 = vcmp.eq.f32.partialorder %v5272_v59, %v754_v63  ;;  %vm839_vm13 = vcmp.gt.f32.partialorder %v5272_v59, %v754_v63 }
 0x2a7   : > { %1077 = vperm.xlu1 %4377, %v1022_v2   ;;  %vm997_vm2 = vmor %vm833_vm7, %vm965_vm10  ;;  %vm6330_vm7 = vcmp.ne.s32.totalorder %v5163_v0, 0 }
 0x2a8   : > { %v1029_v7 = vsel %vm997_vm2, 1, %v4768_v4  ;;  %vm959_vm4 = vmand %vm859_vm14, %vm6329_vm6  ;;  %vm862_vm14 = vcmp.eq.f32.partialorder %v5230_v43, %v718_v3  ;;  %vm830_vm6 = vcmp.gt.f32.partialorder %v5230_v43, %v718_v3  ;;  %v5350_v32 = vpop.permute.xlu0 %1047 }
 0x2a9   : > { %1098 = vperm.xlu0 %4378, %v1029_v7   ;;  %vm991_vm11 = vmor %vm827_vm0, %vm959_vm4  ;;  %vm6331_vm0 = vcmp.ne.s32.totalorder %v5138_v56, 0  ;;  %v734_v56 = vrot.slane %v5243_v49, %v5079_v27  ;;  %v1146_v58 = vrot.slane %v5350_v32, %v5056_v8 }
 0x2aa   : > { %v1023_v10 = vsel %vm991_vm11, 1, %v4768_v4  ;;  %vm960_vm9 = vmand %vm860_vm12, %vm6330_vm7  ;;  %vm867_vm11 = vcmp.eq.f32.partialorder %v5243_v49, %v738_v9  ;;  %vm864_vm7 = vcmp.eq.f32.partialorder %v5243_v49, %v726_v11  ;;  %v1045_v35 = vpop.permute.xlu1 %1044 }
 0x2ab   : > { %1080 = vperm.xlu1 %4377, %v1023_v10   ;;  %vm992_vm10 = vmor %vm828_vm3, %vm960_vm9  ;;  %vm835_vm3 = vcmp.gt.f32.partialorder %v5243_v49, %v738_v9  ;;  %vm6332_vm9 = vcmp.ne.s32.totalorder %v5096_v38, 0  ;;  %v1142_v57 = vrot.slane %v1045_v35, %v5056_v8 }
 0x2ac   : > { %vm971_vm2 = vmand %vm871_vm5, %vm6331_vm0  ;;  %v1024_v15 = vsel %vm992_vm10, 1, %v4768_v4  ;;  %vm832_vm10 = vcmp.gt.f32.partialorder %v5243_v49, %v726_v11  ;;  %v1057_v48 = vpop.permute.xlu0 %1056 }
 0x2ad   : > { %vm1003_vm4 = vmor %vm839_vm13, %vm971_vm2  ;;  %vm868_vm2 = vcmp.eq.f32.partialorder %v5243_v49, %v742_v14 }
 0x2ae   : > { %v1035_v17 = vsel %vm1003_vm4, 1, %v4768_v4  ;;  %vm962_vm12 = vmand %vm862_vm14, %vm946_vm15  ;;  %vm6333_vm14 = vcmp.ne.s32.totalorder %v5092_v36, 0  ;;  %vm836_vm4 = vcmp.gt.f32.partialorder %v5243_v49, %v742_v14  ;;  %v1051_v51 = vpop.permute.xlu1 %1050 }
 0x2af   : > { %1083 = vperm.xlu1 %4377, %v1024_v15   ;;  %1116 = vperm.xlu0 %4378, %v1035_v17   ;;  %vm994_vm5 = vmor %vm830_vm6, %vm962_vm12  ;;  %vm866_vm12 = vcmp.eq.f32.partialorder %v5243_v49, %v734_v56  ;;  %v1150_v61 = vrot.slane %v1051_v51, %v5056_v8 }
 0x2b0   : > { %vm967_vm13 = vmand %vm867_vm11, %vm6332_vm9  ;;  %v1026_v19 = vsel %vm994_vm5, 1, %v4768_v4  ;;  %vm834_vm9 = vcmp.gt.f32.partialorder %v5243_v49, %v734_v56  ;;  %v1060_v54 = vpop.permute.xlu0 %1059 }
 0x2b1   : > { %vm999_vm0 = vmor %vm835_vm3, %vm967_vm13  ;;  %vm6334_vm3 = vcmp.ne.s32.totalorder %v5163_v0, 0  ;;  %v1162_v14 = vrot.slane %v1060_v54, %v5056_v8 }
 0x2b2   : > { %v1031_v20 = vsel %vm999_vm0, 1, %v4768_v4  ;;  %vm964_vm6 = vmand %vm864_vm7, %vm6333_vm14  ;;  %vm869_vm7 = vcmp.eq.f32.partialorder %v5243_v49, %v746_v18  ;;  %vm837_vm0 = vcmp.gt.f32.partialorder %v5243_v49, %v746_v18  ;;  %vm872_vm14 = vcmp.eq.f32.partialorder %v5272_v59, %v758_v21  ;;  %v1054_v39 = vpop.permute.xlu1 %1053 }
 0x2b3   : > { %1089 = vperm.xlu1 %4377, %v1026_v19   ;;  %1104 = vperm.xlu0 %4378, %v1031_v20   ;;  %vm996_vm11 = vmor %vm832_vm10, %vm964_vm6 }
 0x2b4   : > { %v5337_v22 = vpop.f32.mrf.mxu1  ;;  %vm968_vm5 = vmand %vm868_vm2, %vm6334_vm3  ;;  %v1028_v26 = vsel %vm996_vm11, 1, %v4768_v4  ;;  %vm6335_vm3 = vcmp.ne.s32.totalorder %v5092_v36, 0  ;;  %v770_v36 = vrot.slane %v5272_v59, %v5060_v13  ;;  %v1063_v62 = vpop.permute.xlu0 %1062 }
 0x2b5   : > { %vm1000_vm13 = vmor %vm836_vm4, %vm968_vm5  ;;  %vm840_vm4 = vcmp.gt.f32.partialorder %v5272_v59, %v758_v21  ;;  %v1166_v15 = vrot.slane %v1063_v62, %v5056_v8  ;;  %v1627_v32 = vrot.slane %v5337_v22, %v5064_v16  ;;  %v1599_v35 = vrot.slane %v5337_v22, %v5053_v6 }
 0x2b6   : > { %v1032_v28 = vsel %vm1000_vm13, 1, %v4768_v4  ;;  %v4162_v30 = vpop.f32.mrf.mxu1  ;;  %vm966_vm10 = vmand %vm866_vm12, %vm942_vm1  ;;  %vm870_vm12 = vcmp.eq.f32.partialorder %v5243_v49, %v750_v24 }
 0x2b7   : > { %1095 = vperm.xlu1 %4377, %v1028_v26   ;;  %1107 = vperm.xlu0 %4378, %v1032_v28   ;;  %vm998_vm2 = vmor %vm834_vm9, %vm966_vm10  ;;  %vm838_vm9 = vcmp.gt.f32.partialorder %v5243_v49, %v750_v24  ;;  %v1592_v28 = vrot.slane %v5337_v22, %v5051_v5  ;;  %v1620_v30 = vrot.slane %v5337_v22, %v5084_v29 }
 0x2b8   : > { %v1424_v34 = vpop.f32.mrf.mxu1  ;;  %vm969_vm6 = vmand %vm869_vm7, %vm945_vm8  ;;  %v1030_v43 = vsel %vm998_vm2, 1, %v4768_v4  ;;  %vm873_vm7 = vcmp.eq.f32.partialorder %v5272_v59, %v762_v33  ;;  %v1066_v11 = vpop.permute.xlu0 %1065 }
 0x2b9   : > { %vm1001_vm11 = vmor %vm837_vm0, %vm969_vm6  ;;  %vm841_vm0 = vcmp.gt.f32.partialorder %v5272_v59, %v762_v33  ;;  %vm877_vm6 = vcmp.eq.f32.partialorder %v5272_v59, %v778_v41  ;;  %v1170_v17 = vrot.slane %v1066_v11, %v5056_v8  ;;  %v1634_v33 = vrot.slane %v5337_v22, %v5087_v31 }
 0x2ba   : > { %v1033_v44 = vsel %vm1001_vm11, 1, %v4768_v4  ;;  %v4163_v40 = vpop.f32.mrf.mxu1  ;;  %vm972_vm5 = vmand %vm872_vm14, %vm6335_vm3  ;;  %vm6336_vm14 = vcmp.ne.s32.totalorder %v5094_v37, 0  ;;  %vm845_vm11 = vcmp.gt.f32.partialorder %v5272_v59, %v778_v41  ;;  %vm874_vm3 = vcmp.eq.f32.partialorder %v5272_v59, %v766_v45 }
 0x2bb   : > { %1101 = vperm.xlu1 %4377, %v1030_v43   ;;  %1110 = vperm.xlu0 %4378, %v1033_v44   ;;  %vm1004_vm13 = vmor %vm840_vm4, %vm972_vm5  ;;  %v774_v37 = vrot.slane %v5272_v59, %v5084_v29  ;;  %v1585_v34 = vrot.slane %v5337_v22, %v5075_v23  ;;  %v1606_v41 = vrot.slane %v5337_v22, %v5079_v27 }
 0x2bc   : > { %vm970_vm10 = vmand %vm870_vm12, %vm946_vm15  ;;  %v1036_v49 = vsel %vm1004_vm13, 1, %v4768_v4  ;;  %vm875_vm13 = vcmp.eq.f32.partialorder %v5272_v59, %v770_v36 }
 0x2bd   : > { %vm1002_vm2 = vmor %vm838_vm9, %vm970_vm10  ;;  %vm842_vm9 = vcmp.gt.f32.partialorder %v5272_v59, %v766_v45 }
 0x2be   : > { %v1034_v50 = vsel %vm1002_vm2, 1, %v4768_v4  ;;  %vm973_vm4 = vmand %vm873_vm7, %vm6336_vm14  ;;  %vm6337_vm2 = vcmp.ne.s32.totalorder %v5096_v38, 0  ;;  %vm876_vm14 = vcmp.eq.f32.partialorder %v5272_v59, %v774_v37  ;;  %v1154_v38 = vrot.slane %v1054_v39, %v5056_v8 }
 0x2bf   : > { %1119 = vperm.xlu1 %4377, %v1036_v49   ;;  %1113 = vperm.xlu0 %4378, %v1034_v50   ;;  %vm1005_vm12 = vmor %vm841_vm0, %vm973_vm4 }
 0x2c0   : > { %vm977_vm5 = vmand %vm877_vm6, %vm945_vm8  ;;  %v1037_v52 = vsel %vm1005_vm12, 1, %v4768_v4  ;;  %vm843_vm8 = vcmp.gt.f32.partialorder %v5272_v59, %v770_v36  ;;  %vm844_vm12 = vcmp.gt.f32.partialorder %v5272_v59, %v774_v37 }
 0x2c1   : > { %vm1009_vm10 = vmor %vm845_vm11, %vm977_vm5  ;;  %vm1269_vm11 = vcmask 1042434  }
 0x2c2   : > { %v1041_v53 = vsel %vm1009_vm10, 1, %v4768_v4  ;;  %vm974_vm7 = vmand %vm874_vm3, %vm942_vm1  ;;  %vm1267_vm1 = vcmask 1041409   ;;  %vm6338_vm3 = vcmp.ne.s32.totalorder %v5163_v0, 0  ;;  %vm878_vm10 = vcmp.eq.f32.partialorder %v5272_v59, %v782_v55 }
 0x2c3   : > { %1122 = vperm.xlu1 %4377, %v1037_v52   ;;  %1134 = vperm.xlu0 %4378, %v1041_v53   ;;  %vm1006_vm0 = vmor %vm842_vm9, %vm974_vm7  ;;  %vm1271_vm9 = vcmask 1043459   ;;  %v1268_v63 = vsel %vm1267_vm1, %v1146_v58, %v1142_v57  ;;  %vm1273_vm7 = vcmask 1044484   ;;  %v1158_v0 = vrot.slane %v1057_v48, %v5056_v8 }
 0x2c4   : > { %vm975_vm6 = vmand %vm875_vm13, %vm6337_vm2  ;;  %v1038_v60 = vsel %vm1006_vm0, 1, %v4768_v4  ;;  %v1270_v3 = vsel %vm1269_vm11, %v1150_v61, %v1268_v63  ;;  %vm846_vm0 = vcmp.gt.f32.partialorder %v5272_v59, %v782_v55 }
 0x2c5   : > { %vm1007_vm4 = vmor %vm843_vm8, %vm975_vm6  ;;  %v1272_v7 = vsel %vm1271_vm9, %v1154_v38, %v1270_v3  ;;  %vm1275_vm6 = vcmask 1045509  }
 0x2c6   : > { %vm976_vm5 = vmand %vm876_vm14, %vm6338_vm3  ;;  %v1039_v2 = vsel %vm1007_vm4, 1, %v4768_v4  ;;  %v1274_v10 = vsel %vm1273_vm7, %v1158_v0, %v1272_v7  ;;  %vm1279_vm14 = vcmask 1047559   ;;  %vm6339_vm4 = vcmask 64512  }
 0x2c7   : > { %1125 = vperm.xlu1 %4377, %v1038_v60   ;;  %vm1008_vm13 = vmor %vm844_vm12, %vm976_vm5  ;;  %v1276_v12 = vsel %vm1275_vm6, %v1162_v14, %v1274_v10 }
 0x2c8   : > { %vm978_vm8 = vmand %vm878_vm10, %vm946_vm15  ;;  %v1040_v9 = vsel %vm1008_vm13, 1, %v4768_v4  ;;  %vm1277_vm15 = vcmask 1046534  }
 0x2c9   : > { %vm1010_vm2 = vmor %vm846_vm0, %vm978_vm8  ;;  %v1278_v56 = vsel %vm1277_vm15, %v1166_v15, %v1276_v12 }
 0x2ca   : > { %v1042_v59 = vsel %vm1010_vm2, 1, %v4768_v4  ;;  %v1280_v18 = vsel %vm1279_vm14, %v1170_v17, %v1278_v56  ;;  %v1613_v4 = vrot.slane %v5337_v22, %v5060_v13  ;;  %vm6340_vm12 = vmmov %vm6339_vm4 }
 0x2cb   : > { %1128 = vperm.xlu1 %4377, %v1039_v2   ;;  %v1302_v19 = vsel %vm6339_vm4, %v1280_v18, 0  ;;  %vm6341_vm3 = vmmov %vm6339_vm4 }
 0x2cc   : > { %v1304_v20 = vshrl.u32 %v1302_v19, 16  ;;  %v1303_v24 = vand.u32 65535, %v1302_v19  ;;  %vm6342_vm5 = vmmov %vm6341_vm3 }
 0x2cd   : > { %vm6347_vm2 = vmmov %vm6341_vm3 }
 0x2ce   : > { %v1306_v21 = vcvt.s32.f32 %v1304_v20  ;;  %v1305_v26 = vcvt.s32.f32 %v1303_v24  ;;  %vm6348_vm4 = vmmov %vm6347_vm2 }
 0x2cf   : > { %1131 = vperm.xlu1 %4377, %v1040_v9  }
 0x2d3   : > { %1137 = vperm.xlu1 %4377, %v1042_v59  }
 0x2e2   : > { %1309 = vadd.xlane.f32.xlu0 %v1306_v21 }
 0x2f7   : > { %1307 = vadd.xlane.f32.xlu1 %v1305_v26 }
 0x2f8   : > { %1594 = vbcast.lane.b32.xlu0 %v1592_v28, 256 }
 0x2fc   : > { %1615 = vbcast.lane.b32.xlu0 %v1613_v4, 256 }
 0x300   : > { %1622 = vbcast.lane.b32.xlu0 %v1620_v30, 256 }
 0x304   : > { %1629 = vbcast.lane.b32.xlu0 %v1627_v32, 256 }
 0x308   : > { %1636 = vbcast.lane.b32.xlu0 %v1634_v33, 256  ;;  %1587 = vbcast.lane.b32.xlu1 %v1585_v34, 256 }
 0x30c   : > { %1601 = vbcast.lane.b32.xlu1 %v1599_v35, 256 }
 0x310   : > { %1608 = vbcast.lane.b32.xlu1 %v1606_v41, 256 }
 0x318   : > { %v1069_v43 = vpop.permute.xlu0 %1068 }
 0x319   : > { %v1174_v50 = vrot.slane %v1069_v43, %v5056_v8 }
 0x31a   : > { %v1072_v44 = vpop.permute.xlu1 %1071 }
 0x31b   : > { %v1178_v51 = vrot.slane %v1072_v44, %v5056_v8 }
 0x31c   : > { %v1087_v40 = vpop.permute.xlu0 %1086 }
 0x31d   : > { %v1281_v55 = vsel %vm1267_vm1, %v1178_v51, %v1174_v50  ;;  %v1198_v11 = vrot.slane %v1087_v40, %v5056_v8 }
 0x31e   : > { %v1075_v45 = vpop.permute.xlu1 %1074 }
 0x31f   : > { %v1182_v52 = vrot.slane %v1075_v45, %v5056_v8 }
 0x320   : > { %v1093_v48 = vpop.permute.xlu0 %1092 }
 0x321   : > { %v1282_v60 = vsel %vm1269_vm11, %v1182_v52, %v1281_v55  ;;  %v1206_v26 = vrot.slane %v1093_v48, %v5056_v8 }
 0x322   : > { %v1078_v36 = vpop.permute.xlu1 %1077 }
 0x323   : > { %v1186_v54 = vrot.slane %v1078_v36, %v5056_v8 }
 0x324   : > { %v1099_v49 = vpop.permute.xlu0 %1098 }
 0x325   : > { %v5443_v37 = vpop.f32.mrf.mxu0  ;;  %v1283_v62 = vsel %vm1271_vm9, %v1186_v54, %v1282_v60  ;;  %v1214_v35 = vrot.slane %v1099_v49, %v5056_v8 }
 0x326   : > { %v1081_v53 = vpop.permute.xlu1 %1080 }
 0x327   : > { %v4168_v22 = vpop.f32.mrf.mxu0  ;;  %v1190_v39 = vrot.slane %v1081_v53, %v5056_v8 }
 0x329   : > { %v1473_v58 = vpop.f32.mrf.mxu0  ;;  %v5449_v57 = vpop.f32.mrf.mxu1  ;;  %v1284_v7 = vsel %vm1273_vm7, %v1190_v39, %v1283_v62 }
 0x32a   : > { %v5452_v61 = vpop.permute.xlu0 %1116  ;;  %v1084_v38 = vpop.permute.xlu1 %1083 }
 0x32b   : > { %v1194_v63 = vrot.slane %v1084_v38, %v5056_v8  ;;  %v4169_v2 = vpop.f32.mrf.mxu0  ;;  %v4174_v3 = vpop.f32.mrf.mxu1 }
 0x32d   : > { %v1285_v0 = vsel %vm1275_vm6, %v1194_v63, %v1284_v7  ;;  %v1522_v9 = vpop.f32.mrf.mxu1  ;;  %v5458_v10 = vpop.f32.mrf.mxu0 }
 0x32e   : > { %v1105_v14 = vpop.permute.xlu0 %1104  ;;  %v1090_v15 = vpop.permute.xlu1 %1089  ;;  %v1286_v56 = vsel %vm1277_vm15, %v1198_v11, %v1285_v0  ;;  %v1238_v11 = vrot.slane %v5452_v61, %v5056_v8 }
 0x32f   : > { %v1202_v17 = vrot.slane %v1090_v15, %v5056_v8  ;;  %v4175_v59 = vpop.f32.mrf.mxu1  ;;  %v4180_v12 = vpop.f32.mrf.mxu0  ;;  %v1222_v40 = vrot.slane %v1105_v14, %v5056_v8 }
 0x331   : > { %v1571_v18 = vpop.f32.mrf.mxu0  ;;  %v1287_v19 = vsel %vm1279_vm14, %v1202_v17, %v1286_v56 }
 0x332   : > { %v1108_v20 = vpop.permute.xlu0 %1107  ;;  %v1096_v21 = vpop.permute.xlu1 %1095  ;;  %v1315_v24 = vsel %vm6340_vm12, %v1287_v19, 0  ;;  %vm6349_vm12 = vmmov %vm6347_vm2 }
 0x333   : > { %v1210_v28 = vrot.slane %v1096_v21, %v5056_v8  ;;  %v4181_v4 = vpop.f32.mrf.mxu0  ;;  %v1317_v30 = vshrl.u32 %v1315_v24, 16  ;;  %v1316_v34 = vand.u32 65535, %v1315_v24  ;;  %v1226_v48 = vrot.slane %v1108_v20, %v5056_v8 }
 0x335   : > { %v1288_v32 = vsel %vm1267_vm1, %v1210_v28, %v1206_v26  ;;  %v1319_v33 = vcvt.s32.f32 %v1317_v30  ;;  %v1318_v50 = vcvt.s32.f32 %v1316_v34 }
 0x336   : > { %v1111_v41 = vpop.permute.xlu0 %1110  ;;  %v1102_v43 = vpop.permute.xlu1 %1101  ;;  %v1289_v45 = vsel %vm1269_vm11, %v1214_v35, %v1288_v32 }
 0x337   : > { %v1218_v44 = vrot.slane %v1102_v43, %v5056_v8  ;;  %1322 = vadd.xlane.f32.xlu0 %v1319_v33  ;;  %v1230_v51 = vrot.slane %v1111_v41, %v5056_v8  ;;  %v1648_v41 = vrot.slane %v5443_v37, %v5051_v5  ;;  %v1655_v43 = vrot.slane %v5443_v37, %v5053_v6 }
 0x339   : > { %v1290_v36 = vsel %vm1271_vm9, %v1218_v44, %v1289_v45  ;;  %v1641_v44 = vrot.slane %v5443_v37, %v5075_v23  ;;  %v1683_v45 = vrot.slane %v5443_v37, %v5064_v16 }
 0x33a   : > { %v1291_v52 = vsel %vm1273_vm7, %v1222_v40, %v1290_v36  ;;  %v1114_v53 = vpop.permute.xlu0 %1113  ;;  %v1120_v49 = vpop.permute.xlu1 %1119  ;;  %v1662_v40 = vrot.slane %v5443_v37, %v5079_v27  ;;  %v1697_v36 = vrot.slane %v5449_v57, %v5075_v23 }
 0x33b   : > { %v1234_v54 = vrot.slane %v1114_v53, %v5056_v8  ;;  %1320 = vadd.xlane.f32.xlu0 %v1318_v50  ;;  %v1292_v22 = vsel %vm1275_vm6, %v1226_v48, %v1291_v52  ;;  %v1242_v7 = vrot.slane %v1120_v49, %v5056_v8  ;;  %v1669_v48 = vrot.slane %v5443_v37, %v5060_v13 }
 0x33c   : > { %v1293_v39 = vsel %vm1277_vm15, %v1230_v51, %v1292_v22  ;;  %v1676_v50 = vrot.slane %v5443_v37, %v5084_v29  ;;  %v1711_v51 = vrot.slane %v5449_v57, %v5053_v6  ;;  %v1690_v53 = vrot.slane %v5443_v37, %v5087_v31 }
 0x33d   : > { %v1294_v55 = vsel %vm1279_vm14, %v1234_v54, %v1293_v39  ;;  %v1295_v17 = vsel %vm1267_vm1, %v1242_v7, %v1238_v11  ;;  %v1725_v49 = vrot.slane %v5449_v57, %v5060_v13  ;;  %v1704_v22 = vrot.slane %v5449_v57, %v5051_v5 }
 0x33e   : > { %v1123_v58 = vpop.permute.xlu1 %1122  ;;  %v1328_v60 = vsel %vm6341_vm3, %v1294_v55, 0  ;;  %v1135_v56 = vpop.permute.xlu0 %1134  ;;  %v1732_v39 = vrot.slane %v5449_v57, %v5084_v29  ;;  %v1718_v37 = vrot.slane %v5449_v57, %v5079_v27  ;;  %v1767_v11 = vrot.slane %v5458_v10, %v5053_v6  ;;  %vm6350_vm3 = vmmov %vm6347_vm2 }
 0x33f   : > { %v1329_v38 = vand.u32 65535, %v1328_v60  ;;  %v1330_v62 = vshrl.u32 %v1328_v60, 16  ;;  %v1246_v0 = vrot.slane %v1123_v58, %v5056_v8  ;;  %v1262_v61 = vrot.slane %v1135_v56, %v5056_v8 }
 0x341   : > { %v1331_v63 = vcvt.s32.f32 %v1329_v38  ;;  %v1332_v2 = vcvt.s32.f32 %v1330_v62  ;;  %v1296_v59 = vsel %vm1269_vm11, %v1246_v0, %v1295_v17  ;;  %v1739_v62 = vrot.slane %v5449_v57, %v5064_v16 }
 0x342   : > { %v1126_v3 = vpop.permute.xlu1 %1125  ;;  %v1760_v0 = vrot.slane %v5458_v10, %v5051_v5 }
 0x343   : > { %1333 = vadd.xlane.f32.xlu0 %v1331_v63  ;;  %1335 = vadd.xlane.f32.xlu1 %v1332_v2  ;;  %v1250_v14 = vrot.slane %v1126_v3, %v5056_v8  ;;  %v1746_v3 = vrot.slane %v5449_v57, %v5087_v31  ;;  %v1753_v57 = vrot.slane %v5458_v10, %v5075_v23 }
 0x345   : > { %v1297_v18 = vsel %vm1271_vm9, %v1250_v14, %v1296_v59  ;;  %v1774_v14 = vrot.slane %v5458_v10, %v5079_v27 }
 0x346   : > { %v1129_v9 = vpop.permute.xlu1 %1128 }
 0x347   : > { %v1254_v15 = vrot.slane %v1129_v9, %v5056_v8 }
 0x349   : > { %v1298_v20 = vsel %vm1273_vm7, %v1254_v15, %v1297_v18  ;;  %v1795_v15 = vrot.slane %v5458_v10, %v5064_v16  ;;  %v1788_v18 = vrot.slane %v5458_v10, %v5084_v29 }
 0x34a   : > { %v1132_v12 = vpop.permute.xlu1 %1131 }
 0x34b   : > { %v1258_v19 = vrot.slane %v1132_v12, %v5056_v8  ;;  %v1781_v12 = vrot.slane %v5458_v10, %v5060_v13 }
 0x34d   : > { %v1299_v21 = vsel %vm1275_vm6, %v1258_v19, %v1298_v20 }
 0x34e   : > { %v1138_v24 = vpop.permute.xlu1 %1137  ;;  %v1300_v28 = vsel %vm1277_vm15, %v1262_v61, %v1299_v21  ;;  %v1802_v21 = vrot.slane %v5458_v10, %v5087_v31 }
 0x34f   : > { %v1266_v26 = vrot.slane %v1138_v24, %v5056_v8 }
 0x351   : > { %v1301_v4 = vsel %vm1279_vm14, %v1266_v26, %v1300_v28 }
 0x352   : > { %v1341_v30 = vsel %vm6342_vm5, %v1301_v4, 0  ;;  %vm6351_vm5 = vmmov %vm6347_vm2 }
 0x353   : > { %v1342_v32 = vand.u32 65535, %v1341_v30  ;;  %v1343_v33 = vshrl.u32 %v1341_v30, 16 }
 0x355   : > { %v1344_v34 = vcvt.s32.f32 %v1342_v32  ;;  %v1345_v35 = vcvt.s32.f32 %v1343_v33 }
 0x357   : > { %1346 = vadd.xlane.f32.xlu0 %v1344_v34  ;;  %1348 = vadd.xlane.f32.xlu1 %v1345_v35 }
 0x368   : > { %1650 = vbcast.lane.b32.xlu1 %v1648_v41, 256 }
 0x36b   : > { %v1310_v52 = vpop.xlane.xlu0 %1309 }
 0x36c   : > { %1657 = vbcast.lane.b32.xlu1 %v1655_v43, 256  ;;  %v1312_v54 = vcvt.f32.s32 %v1310_v52 }
 0x36d   : > { %1643 = vbcast.lane.b32.xlu0 %v1641_v44, 256 }
 0x36e   : > { %v1313_v58 = vshll.u32 %v1312_v54, 16 }
 0x36f   : > { %v1595_v63 = vpop.permute.xlu0 %1594 }
 0x370   : > { %1664 = vbcast.lane.b32.xlu1 %v1662_v40, 256 }
 0x371   : > { %1685 = vbcast.lane.b32.xlu0 %v1683_v45, 256 }
 0x373   : > { %v1616_v17 = vpop.permute.xlu0 %1615 }
 0x374   : > { %1671 = vbcast.lane.b32.xlu1 %v1669_v48, 256 }
 0x375   : > { %1699 = vbcast.lane.b32.xlu0 %v1697_v36, 256 }
 0x377   : > { %v1623_v19 = vpop.permute.xlu0 %1622 }
 0x378   : > { %1678 = vbcast.lane.b32.xlu1 %v1676_v50, 256 }
 0x379   : > { %1713 = vbcast.lane.b32.xlu0 %v1711_v51, 256 }
 0x37b   : > { %v1630_v26 = vpop.permute.xlu0 %1629 }
 0x37c   : > { %1692 = vbcast.lane.b32.xlu1 %v1690_v53, 256 }
 0x37d   : > { %1727 = vbcast.lane.b32.xlu0 %v1725_v49, 256 }
 0x37f   : > { %v1637_v10 = vpop.permute.xlu0 %1636 }
 0x380   : > { %v1308_v55 = vpop.xlane.xlu1 %1307  ;;  %1706 = vbcast.lane.b32.xlu1 %v1704_v22, 256 }
 0x381   : > { %v1311_v60 = vcvt.f32.s32 %v1308_v55  ;;  %1734 = vbcast.lane.b32.xlu0 %v1732_v39, 256 }
 0x383   : > { %v5526_v38 = vadd.s32 %v1313_v58, %v1311_v60 }
 0x384   : > { %1720 = vbcast.lane.b32.xlu1 %v1718_v37, 256  ;;  %v1588_v7 = vpop.permute.xlu1 %1587 }
 0x385   : > { %6343 = vst [vmem:[#allocation23_spill] sm:$0xff] %v5526_v38  ;;  %vm1354_vm10 = vcmp.lt.s32.totalorder %v5526_v38, 4  ;;  %1741 = vbcast.lane.b32.xlu0 %v1739_v62, 256 }
 0x386   : > { %v5533_v2 = vsel %vm1354_vm10, %v1595_v63, -1e+30  ;;  %v5542_v9 = vsel %vm1354_vm10, %v1588_v7, -1e+30  ;;  %v5564_v20 = vsel %vm1354_vm10, %v1616_v17, -1e+30 }
 0x387   : > { %v5571_v24 = vsel %vm1354_vm10, %v1623_v19, -1e+30  ;;  %v5581_v4 = vsel %vm1354_vm10, %v1630_v26, -1e+30  ;;  %v5586_v30 = vsel %vm1354_vm10, %v1637_v10, -1e+30 }
 0x388   : > { %1906 = vperm.xlu1 %4377, %v5533_v2   ;;  %v1602_v59 = vpop.permute.xlu1 %1601 }
 0x389   : > { %1748 = vbcast.lane.b32.xlu0 %v1746_v3, 256  ;;  %v5557_v56 = vsel %vm1354_vm10, %v1602_v59, -1e+30 }
 0x38c   : > { %1762 = vbcast.lane.b32.xlu1 %v1760_v0, 256  ;;  %v1609_v61 = vpop.permute.xlu1 %1608 }
 0x38d   : > { %1903 = vperm.xlu0 %4378, %v5542_v9   ;;  %v5576_v28 = vsel %vm1354_vm10, %v1609_v61, -1e+30 }
 0x390   : > { %1769 = vbcast.lane.b32.xlu1 %v1767_v11, 256 }
 0x391   : > { %1755 = vbcast.lane.b32.xlu0 %v1753_v57, 256 }
 0x394   : > { %1776 = vbcast.lane.b32.xlu1 %v1774_v14, 256 }
 0x395   : > { %1797 = vbcast.lane.b32.xlu0 %v1795_v15, 256 }
 0x398   : > { %1783 = vbcast.lane.b32.xlu1 %v1781_v12, 256 }
 0x399   : > { %1909 = vperm.xlu0 %4378, %v5557_v56  }
 0x39c   : > { %1790 = vbcast.lane.b32.xlu1 %v1788_v18, 256 }
 0x39d   : > { %1915 = vperm.xlu0 %4378, %v5564_v20  }
 0x3a0   : > { %1804 = vbcast.lane.b32.xlu1 %v1802_v21, 256 }
 0x3a1   : > { %1918 = vperm.xlu0 %4378, %v5571_v24  }
 0x3a4   : > { %1912 = vperm.xlu1 %4377, %v5576_v28  }
 0x3a5   : > { %1921 = vperm.xlu0 %4378, %v5581_v4  }
 0x3a9   : > { %1924 = vperm.xlu0 %4378, %v5586_v30  }
 0x3c0   : > { %v1323_v32 = vpop.xlane.xlu0 %1322 }
 0x3c1   : > { %v1325_v34 = vcvt.f32.s32 %v1323_v32 }
 0x3c3   : > { %v1326_v44 = vshll.u32 %v1325_v34, 16 }
 0x3c4   : > { %v1321_v33 = vpop.xlane.xlu0 %1320 }
 0x3c5   : > { %v1324_v35 = vcvt.f32.s32 %v1321_v33 }
 0x3c7   : > { %v5589_v40 = vadd.s32 %v1326_v44, %v1324_v35 }
 0x3c9   : > { %6344 = vst [vmem:[#allocation24_spill] sm:$0xff] %v5589_v40  ;;  %vm1355_vm13 = vcmp.lt.s32.totalorder %v5589_v40, 4 }
 0x3cc   : > { %v1334_v41 = vpop.xlane.xlu0 %1333  ;;  %v1336_v43 = vpop.xlane.xlu1 %1335 }
 0x3cd   : > { %v1338_v45 = vcvt.f32.s32 %v1336_v43  ;;  %v1337_v54 = vcvt.f32.s32 %v1334_v41 }
 0x3cf   : > { %v1339_v50 = vshll.u32 %v1338_v45, 16 }
 0x3d1   : > { %v5602_v22 = vadd.s32 %v1339_v50, %v1337_v54 }
 0x3d3   : > { %6345 = vst [vmem:[#allocation25_spill] sm:$0xff] %v5602_v22  ;;  %vm1356_vm0 = vcmp.lt.s32.totalorder %v5602_v22, 4 }
 0x3e0   : > { %v1347_v48 = vpop.xlane.xlu0 %1346  ;;  %v1349_v36 = vpop.xlane.xlu1 %1348 }
 0x3e1   : > { %v1351_v61 = vcvt.f32.s32 %v1349_v36  ;;  %v1350_v43 = vcvt.f32.s32 %v1347_v48 }
 0x3e3   : > { %v1352_v34 = vshll.u32 %v1351_v61, 16 }
 0x3e4   : > { %v1644_v51 = vpop.permute.xlu0 %1643  ;;  %v1651_v52 = vpop.permute.xlu1 %1650 }
 0x3e5   : > { %v5594_v53 = vsel %vm1355_vm13, %v1644_v51, -1e+30  ;;  %v5598_v49 = vsel %vm1355_vm13, %v1651_v52, -1e+30  ;;  %v5670_v44 = vadd.s32 %v1352_v34, %v1350_v43 }
 0x3e6   : > { %1930 = vperm.xlu1 %4377, %v5598_v49   ;;  %1927 = vperm.xlu0 %4378, %v5594_v53  }
 0x3e7   : > { %6346 = vst [vmem:[#allocation26_spill] sm:$0xff] %v5670_v44  ;;  %vm1357_vm8 = vcmp.lt.s32.totalorder %v5670_v44, 4 }
 0x3e8   : > { %v1686_v39 = vpop.permute.xlu0 %1685  ;;  %v1658_v55 = vpop.permute.xlu1 %1657 }
 0x3e9   : > { %v5606_v58 = vsel %vm1355_vm13, %v1686_v39, -1e+30  ;;  %v5610_v60 = vsel %vm1355_vm13, %v1658_v55, -1e+30 }
 0x3ea   : > { %1933 = vperm.xlu1 %4377, %v5610_v60   ;;  %1945 = vperm.xlu0 %4378, %v5606_v58  }
 0x3ec   : > { %v1665_v37 = vpop.permute.xlu1 %1664  ;;  %v1700_v62 = vpop.permute.xlu0 %1699 }
 0x3ed   : > { %v5617_v63 = vsel %vm1355_vm13, %v1665_v37, -1e+30  ;;  %v5621_v3 = vsel %vm1356_vm0, %v1700_v62, -1e+30 }
 0x3ee   : > { %1936 = vperm.xlu1 %4377, %v5617_v63   ;;  %1951 = vperm.xlu0 %4378, %v5621_v3  }
 0x3f0   : > { %v1672_v7 = vpop.permute.xlu1 %1671  ;;  %v1714_v0 = vpop.permute.xlu0 %1713 }
 0x3f1   : > { %v5627_v11 = vsel %vm1355_vm13, %v1672_v7, -1e+30  ;;  %v5631_v57 = vsel %vm1356_vm0, %v1714_v0, -1e+30 }
 0x3f2   : > { %1939 = vperm.xlu1 %4377, %v5627_v11   ;;  %1957 = vperm.xlu0 %4378, %v5631_v57  }
 0x3f4   : > { %v1679_v14 = vpop.permute.xlu1 %1678  ;;  %v1728_v15 = vpop.permute.xlu0 %1727 }
 0x3f5   : > { %v5637_v17 = vsel %vm1355_vm13, %v1679_v14, -1e+30  ;;  %v5641_v59 = vsel %vm1356_vm0, %v1728_v15, -1e+30 }
 0x3f6   : > { %1942 = vperm.xlu1 %4377, %v5637_v17   ;;  %1963 = vperm.xlu0 %4378, %v5641_v59  }
 0x3f8   : > { %v1693_v12 = vpop.permute.xlu1 %1692  ;;  %v1735_v18 = vpop.permute.xlu0 %1734 }
 0x3f9   : > { %v5647_v19 = vsel %vm1355_vm13, %v1693_v12, -1e+30  ;;  %v5651_v21 = vsel %vm1356_vm0, %v1735_v18, -1e+30 }
 0x3fa   : > { %1948 = vperm.xlu1 %4377, %v5647_v19   ;;  %1966 = vperm.xlu0 %4378, %v5651_v21  }
 0x3fc   : > { %v1707_v26 = vpop.permute.xlu1 %1706  ;;  %v1742_v10 = vpop.permute.xlu0 %1741 }
 0x3fd   : > { %v5657_v32 = vsel %vm1356_vm0, %v1707_v26, -1e+30  ;;  %v5661_v33 = vsel %vm1356_vm0, %v1742_v10, -1e+30 }
 0x3fe   : > { %1954 = vperm.xlu1 %4377, %v5657_v32   ;;  %1969 = vperm.xlu0 %4378, %v5661_v33  }
 0x400   : > { %v1721_v35 = vpop.permute.xlu1 %1720  ;;  %v1749_v45 = vpop.permute.xlu0 %1748 }
 0x401   : > { %v5667_v41 = vsel %vm1356_vm0, %v1721_v35, -1e+30  ;;  %v5690_v7 = vsel %vm1356_vm0, %v1749_v45, -1e+30 }
 0x402   : > { %1960 = vperm.xlu1 %4377, %v5667_v41  }
 0x404   : > { %v1907_v36 = vpop.permute.xlu1 %1906 }
 0x408   : > { %v1763_v50 = vpop.permute.xlu1 %1762  ;;  %v1904_v51 = vpop.permute.xlu0 %1903 }
 0x409   : > { %v5675_v52 = vsel %vm1357_vm8, %v1763_v50, -1e+30  ;;  %v2001_v45 = vrot.slane %v1904_v51, %v5056_v8 }
 0x40a   : > { %1978 = vperm.xlu1 %4377, %v5675_v52  }
 0x40c   : > { %v1770_v54 = vpop.permute.xlu1 %1769  ;;  %v1756_v39 = vpop.permute.xlu0 %1755 }
 0x40d   : > { %v5680_v48 = vsel %vm1357_vm8, %v1770_v54, -1e+30  ;;  %v5684_v55 = vsel %vm1357_vm8, %v1756_v39, -1e+30  ;;  %v2005_v39 = vrot.slane %v1907_v36, %v5056_v8 }
 0x40e   : > { %1981 = vperm.xlu1 %4377, %v5680_v48   ;;  %1975 = vperm.xlu0 %4378, %v5684_v55  }
 0x410   : > { %v1777_v37 = vpop.permute.xlu1 %1776  ;;  %v1798_v62 = vpop.permute.xlu0 %1797 }
 0x411   : > { %v5694_v0 = vsel %vm1357_vm8, %v1777_v37, -1e+30  ;;  %v5700_v12 = vsel %vm1357_vm8, %v1798_v62, -1e+30  ;;  %v2126_v62 = vsel %vm1267_vm1, %v2005_v39, %v2001_v45 }
 0x412   : > { %1984 = vperm.xlu1 %4377, %v5694_v0   ;;  %1972 = vperm.xlu0 %4378, %v5690_v7  }
 0x414   : > { %v1784_v14 = vpop.permute.xlu1 %1783  ;;  %v1910_v15 = vpop.permute.xlu0 %1909 }
 0x415   : > { %v5704_v18 = vsel %vm1357_vm8, %v1784_v14, -1e+30  ;;  %v2009_v50 = vrot.slane %v1910_v15, %v5056_v8 }
 0x416   : > { %1987 = vperm.xlu1 %4377, %v5704_v18   ;;  %1993 = vperm.xlu0 %4378, %v5700_v12  }
 0x417   : > { %v2127_v14 = vsel %vm1269_vm11, %v2009_v50, %v2126_v62 }
 0x418   : > { %v1791_v61 = vpop.permute.xlu1 %1790  ;;  %v1916_v26 = vpop.permute.xlu0 %1915 }
 0x419   : > { %v5710_v10 = vsel %vm1357_vm8, %v1791_v61, -1e+30  ;;  %v2017_v1 = vrot.slane %v1916_v26, %v5056_v8 }
 0x41a   : > { %1990 = vperm.xlu1 %4377, %v5710_v10  }
 0x41c   : > { %v1805_v34 = vpop.permute.xlu1 %1804  ;;  %v1919_v43 = vpop.permute.xlu0 %1918 }
 0x41d   : > { %v5715_v35 = vsel %vm1357_vm8, %v1805_v34, -1e+30  ;;  %v2021_v51 = vrot.slane %v1919_v43, %v5056_v8 }
 0x41e   : > { %1996 = vperm.xlu1 %4377, %v5715_v35  }
 0x420   : > { %v1913_v54 = vpop.permute.xlu1 %1912  ;;  %v1922_v61 = vpop.permute.xlu0 %1921 }
 0x421   : > { %v2013_v37 = vrot.slane %v1913_v54, %v5056_v8  ;;  %v2025_v36 = vrot.slane %v1922_v61, %v5056_v8 }
 0x423   : > { %v2128_v34 = vsel %vm1271_vm9, %v2013_v37, %v2127_v14 }
 0x424   : > { %v2129_v44 = vsel %vm1273_vm7, %v2017_v1, %v2128_v34  ;;  %v1925_v22 = vpop.permute.xlu0 %1924 }
 0x425   : > { %v2130_v15 = vsel %vm1275_vm6, %v2021_v51, %v2129_v44  ;;  %v2029_v54 = vrot.slane %v1925_v22, %v5056_v8 }
 0x426   : > { %v2131_v45 = vsel %vm1277_vm15, %v2025_v36, %v2130_v15 }
 0x427   : > { %v2132_v50 = vsel %vm1279_vm14, %v2029_v54, %v2131_v45 }
 0x428   : > { %v2158_v39 = vsel %vm6347_vm2, %v2132_v50, -inf }
 0x435   : > { %2159 = vmax.xlane.f32.xlu0 %v2158_v39 }
 0x461   : > { %v1931_v37 = vpop.permute.xlu1 %1930  ;;  %v1928_v26 = vpop.permute.xlu0 %1927 }
 0x462   : > { %v2037_v43 = vrot.slane %v1931_v37, %v5056_v8  ;;  %v2033_v44 = vrot.slane %v1928_v26, %v5056_v8 }
 0x464   : > { %v2133_v36 = vsel %vm1267_vm1, %v2037_v43, %v2033_v44 }
 0x465   : > { %v1934_v62 = vpop.permute.xlu1 %1933  ;;  %v1946_v1 = vpop.permute.xlu0 %1945 }
 0x466   : > { %v2041_v61 = vrot.slane %v1934_v62, %v5056_v8  ;;  %v2057_v40 = vrot.slane %v1946_v1, %v5056_v8 }
 0x468   : > { %v2134_v54 = vsel %vm1269_vm11, %v2041_v61, %v2133_v36 }
 0x469   : > { %v1937_v14 = vpop.permute.xlu1 %1936  ;;  %v1952_v34 = vpop.permute.xlu0 %1951 }
 0x46a   : > { %v2045_v51 = vrot.slane %v1937_v14, %v5056_v8 }
 0x46c   : > { %v2135_v50 = vsel %vm1271_vm9, %v2045_v51, %v2134_v54 }
 0x46d   : > { %v1940_v22 = vpop.permute.xlu1 %1939  ;;  %v1958_v26 = vpop.permute.xlu0 %1957 }
 0x46e   : > { %v2049_v15 = vrot.slane %v1940_v22, %v5056_v8 }
 0x470   : > { %v2136_v37 = vsel %vm1273_vm7, %v2049_v15, %v2135_v50 }
 0x471   : > { %v1943_v45 = vpop.permute.xlu1 %1942  ;;  %v1964_v44 = vpop.permute.xlu0 %1963 }
 0x472   : > { %v2053_v39 = vrot.slane %v1943_v45, %v5056_v8  ;;  %v2065_v45 = vrot.slane %v1952_v34, %v5056_v8 }
 0x474   : > { %v2137_v62 = vsel %vm1275_vm6, %v2053_v39, %v2136_v37 }
 0x475   : > { %v1949_v38 = vpop.permute.xlu1 %1948  ;;  %v2138_v22 = vsel %vm1277_vm15, %v2057_v40, %v2137_v62  ;;  %v1967_v15 = vpop.permute.xlu0 %1966 }
 0x476   : > { %v2061_v14 = vrot.slane %v1949_v38, %v5056_v8  ;;  %v2073_v38 = vrot.slane %v1958_v26, %v5056_v8  ;;  %v2085_v34 = vrot.slane %v1967_v15, %v5056_v8 }
 0x478   : > { %v2139_v43 = vsel %vm1279_vm14, %v2061_v14, %v2138_v22  ;;  %v2081_v14 = vrot.slane %v1964_v44, %v5056_v8 }
 0x479   : > { %v1955_v61 = vpop.permute.xlu1 %1954  ;;  %v2161_v51 = vsel %vm6348_vm4, %v2139_v43, -inf  ;;  %v1970_v40 = vpop.permute.xlu0 %1969  ;;  %vm6352_vm4 = vmmov %vm6347_vm2 }
 0x47a   : > { %2162 = vmax.xlane.f32.xlu1 %v2161_v51  ;;  %v2069_v36 = vrot.slane %v1955_v61, %v5056_v8 }
 0x47c   : > { %v2140_v1 = vsel %vm1267_vm1, %v2069_v36, %v2065_v45  ;;  %v2089_v36 = vrot.slane %v1970_v40, %v5056_v8 }
 0x47d   : > { %v1961_v54 = vpop.permute.xlu1 %1960  ;;  %v2141_v39 = vsel %vm1269_vm11, %v2073_v38, %v2140_v1 }
 0x47e   : > { %v2077_v50 = vrot.slane %v1961_v54, %v5056_v8 }
 0x480   : > { %v2142_v62 = vsel %vm1271_vm9, %v2077_v50, %v2141_v39 }
 0x481   : > { %v2143_v22 = vsel %vm1273_vm7, %v2081_v14, %v2142_v62 }
 0x482   : > { %v2144_v51 = vsel %vm1275_vm6, %v2085_v34, %v2143_v22 }
 0x483   : > { %v2145_v50 = vsel %vm1277_vm15, %v2089_v36, %v2144_v51 }
 0x485   : > { %v1979_v37 = vpop.permute.xlu1 %1978 }
 0x486   : > { %v2101_v44 = vrot.slane %v1979_v37, %v5056_v8 }
 0x489   : > { %v1982_v43 = vpop.permute.xlu1 %1981  ;;  %v1976_v61 = vpop.permute.xlu0 %1975 }
 0x48a   : > { %v2097_v45 = vrot.slane %v1976_v61, %v5056_v8  ;;  %v2105_v39 = vrot.slane %v1982_v43, %v5056_v8 }
 0x48c   : > { %v2147_v14 = vsel %vm1267_vm1, %v2101_v44, %v2097_v45 }
 0x48d   : > { %v1985_v54 = vpop.permute.xlu1 %1984  ;;  %v1973_v26 = vpop.permute.xlu0 %1972  ;;  %v2148_v61 = vsel %vm1269_vm11, %v2105_v39, %v2147_v14 }
 0x48e   : > { %v2093_v1 = vrot.slane %v1973_v26, %v5056_v8  ;;  %v2109_v40 = vrot.slane %v1985_v54, %v5056_v8 }
 0x490   : > { %v2146_v38 = vsel %vm1279_vm14, %v2093_v1, %v2145_v50  ;;  %v2149_v51 = vsel %vm1271_vm9, %v2109_v40, %v2148_v61 }
 0x491   : > { %v1988_v62 = vpop.permute.xlu1 %1987  ;;  %v2164_v15 = vsel %vm6349_vm12, %v2146_v38, -inf  ;;  %v1994_v37 = vpop.permute.xlu0 %1993  ;;  %vm6353_vm12 = vmmov %vm6347_vm2 }
 0x492   : > { %2165 = vmax.xlane.f32.xlu0 %v2164_v15  ;;  %v2113_v22 = vrot.slane %v1988_v62, %v5056_v8  ;;  %v2121_v1 = vrot.slane %v1994_v37, %v5056_v8 }
 0x494   : > { %v2150_v43 = vsel %vm1273_vm7, %v2113_v22, %v2149_v51 }
 0x495   : > { %v1991_v34 = vpop.permute.xlu1 %1990 }
 0x496   : > { %v2117_v36 = vrot.slane %v1991_v34, %v5056_v8 }
 0x498   : > { %v2151_v26 = vsel %vm1275_vm6, %v2117_v36, %v2150_v43 }
 0x499   : > { %v1997_v45 = vpop.permute.xlu1 %1996  ;;  %v2152_v50 = vsel %vm1277_vm15, %v2121_v1, %v2151_v26 }
 0x49a   : > { %v2125_v54 = vrot.slane %v1997_v45, %v5056_v8 }
 0x49c   : > { %v2153_v44 = vsel %vm1279_vm14, %v2125_v54, %v2152_v50 }
 0x49d   : > { %v2167_v38 = vsel %vm6350_vm3, %v2153_v44, -inf  ;;  %vm3051_vm3 = vcmask 1043456  }
 0x49e   : > { %2168 = vmax.xlane.f32.xlu0 %v2167_v38 }
 0x4be   : > { %v2160_v39 = vpop.xlane.xlu0 %2159 }
 0x4bf   : > { %v2177_v62 = vrot.slane %v2160_v39, %v5075_v23  ;;  %v2181_v15 = vrot.slane %v2160_v39, %v5051_v5  ;;  %v2185_v14 = vrot.slane %v2160_v39, %v5053_v6  ;;  %v2193_v40 = vrot.slane %v2160_v39, %v5060_v13 }
 0x4c0   : > { %v2189_v22 = vrot.slane %v2160_v39, %v5079_v27  ;;  %v2197_v37 = vrot.slane %v2160_v39, %v5084_v29  ;;  %v2201_v54 = vrot.slane %v2160_v39, %v5064_v16 }
 0x4c1   : > { %v2334_v61 = vsub.f32 %v5542_v9, %v2177_v62  ;;  %v2335_v34 = vsub.f32 %v5533_v2, %v2181_v15  ;;  %v2336_v51 = vsub.f32 %v5557_v56, %v2185_v14  ;;  %v2338_v36 = vsub.f32 %v5564_v20, %v2193_v40 }
 0x4c2   : > { %v2337_v1 = vsub.f32 %v5576_v28, %v2189_v22  ;;  %v2339_v50 = vsub.f32 %v5571_v24, %v2197_v37  ;;  %v2205_v56 = vrot.slane %v2160_v39, %v5087_v31  ;;  %v2340_v44 = vsub.f32 %v5581_v4, %v2201_v54 }
 0x4c3   : > { %v2366_v43 = vmul.f32 1.442695, %v2334_v61  ;;  %v2368_v26 = vmul.f32 1.442695, %v2335_v34  ;;  %v2370_v45 = vmul.f32 1.442695, %v2336_v51 }
 0x4c4   : > { %v2374_v9 = vmul.f32 1.442695, %v2338_v36  ;;  %v2372_v2 = vmul.f32 1.442695, %v2337_v1  ;;  %v2376_v20 = vmul.f32 1.442695, %v2339_v50  ;;  %v2341_v38 = vsub.f32 %v5586_v30, %v2205_v56 }
 0x4c5   : > { %4387 = vpow2.f32 %v2366_v43  ;;  %v2378_v28 = vmul.f32 1.442695, %v2340_v44 }
 0x4c6   : > { %4389 = vpow2.f32 %v2368_v26  ;;  %v2380_v15 = vmul.f32 1.442695, %v2341_v38 }
 0x4c7   : > { %4391 = vpow2.f32 %v2370_v45 }
 0x4c8   : > { %4393 = vpow2.f32 %v2374_v9 }
 0x4c9   : > { %4395 = vpow2.f32 %v2372_v2 }
 0x4ca   : > { %4397 = vpow2.f32 %v2376_v20 }
 0x4cb   : > { %4399 = vpow2.f32 %v2378_v28 }
 0x4cc   : > { %4401 = vpow2.f32 %v2380_v15 }
 0x4d2   : > { %v5798_v62 = vpop.eup %4387 }
 0x4d3   : > { %v5800_v24 = vpop.eup %4389  ;;  %2463 = vperm.xlu1 %4377, %v5798_v62  }
 0x4d4   : > { %2466 = vperm.xlu0 %4378, %v5800_v24   ;;  %v5804_v39 = vpop.eup %4391 }
 0x4d5   : > { %v5806_v4 = vpop.eup %4393 }
 0x4d6   : > { %v5810_v30 = vpop.eup %4395 }
 0x4d7   : > { %2469 = vperm.xlu1 %4377, %v5804_v39   ;;  %v5812_v14 = vpop.eup %4397 }
 0x4d8   : > { %2475 = vperm.xlu0 %4378, %v5806_v4   ;;  %v5816_v40 = vpop.eup %4399 }
 0x4d9   : > { %v5819_v22 = vpop.eup %4401 }
 0x4db   : > { %2472 = vperm.xlu1 %4377, %v5810_v30  }
 0x4dc   : > { %2478 = vperm.xlu0 %4378, %v5812_v14  }
 0x4e0   : > { %2481 = vperm.xlu0 %4378, %v5816_v40  }
 0x4e4   : > { %2484 = vperm.xlu0 %4378, %v5819_v22  }
 0x503   : > { %v2163_v61 = vpop.xlane.xlu1 %2162 }
 0x504   : > { %v2209_v34 = vrot.slane %v2163_v61, %v5075_v23  ;;  %v2213_v51 = vrot.slane %v2163_v61, %v5051_v5  ;;  %v2217_v37 = vrot.slane %v2163_v61, %v5053_v6  ;;  %v2233_v36 = vrot.slane %v2163_v61, %v5064_v16 }
 0x505   : > { %v2221_v1 = vrot.slane %v2163_v61, %v5079_v27  ;;  %v2225_v2 = vrot.slane %v2163_v61, %v5060_v13 }
 0x506   : > { %v2342_v43 = vsub.f32 %v5594_v53, %v2209_v34  ;;  %v2343_v26 = vsub.f32 %v5598_v49, %v2213_v51  ;;  %v2344_v45 = vsub.f32 %v5610_v60, %v2217_v37  ;;  %v2348_v54 = vsub.f32 %v5606_v58, %v2233_v36 }
 0x507   : > { %v2345_v56 = vsub.f32 %v5617_v63, %v2221_v1  ;;  %v2229_v53 = vrot.slane %v2163_v61, %v5084_v29  ;;  %v2346_v49 = vsub.f32 %v5627_v11, %v2225_v2  ;;  %v2237_v60 = vrot.slane %v2163_v61, %v5087_v31 }
 0x508   : > { %v2382_v50 = vmul.f32 1.442695, %v2342_v43  ;;  %v2384_v9 = vmul.f32 1.442695, %v2343_v26  ;;  %v2386_v44 = vmul.f32 1.442695, %v2344_v45 }
 0x509   : > { %v2394_v20 = vmul.f32 1.442695, %v2348_v54  ;;  %v2388_v38 = vmul.f32 1.442695, %v2345_v56  ;;  %v2347_v58 = vsub.f32 %v5637_v17, %v2229_v53  ;;  %v2390_v28 = vmul.f32 1.442695, %v2346_v49 }
 0x50a   : > { %4403 = vpow2.f32 %v2382_v50  ;;  %v2349_v63 = vsub.f32 %v5647_v19, %v2237_v60 }
 0x50b   : > { %4405 = vpow2.f32 %v2384_v9  ;;  %v2392_v34 = vmul.f32 1.442695, %v2347_v58 }
 0x50c   : > { %4407 = vpow2.f32 %v2386_v44  ;;  %v2396_v11 = vmul.f32 1.442695, %v2349_v63 }
 0x50d   : > { %4409 = vpow2.f32 %v2394_v20 }
 0x50e   : > { %4411 = vpow2.f32 %v2388_v38 }
 0x50f   : > { %4413 = vpow2.f32 %v2390_v28 }
 0x510   : > { %4415 = vpow2.f32 %v2392_v34 }
 0x511   : > { %4417 = vpow2.f32 %v2396_v11 }
 0x517   : > { %v5837_v15 = vpop.eup %4403 }
 0x518   : > { %v5840_v51 = vpop.eup %4405  ;;  %2487 = vperm.xlu0 %4378, %v5837_v15  }
 0x519   : > { %2490 = vperm.xlu1 %4377, %v5840_v51   ;;  %v5844_v61 = vpop.eup %4407 }
 0x51a   : > { %v5850_v26 = vpop.eup %4409 }
 0x51b   : > { %v2166_v37 = vpop.xlane.xlu0 %2165  ;;  %v5859_v2 = vpop.eup %4411 }
 0x51c   : > { %v2241_v17 = vrot.slane %v2166_v37, %v5075_v23  ;;  %v2245_v36 = vrot.slane %v2166_v37, %v5051_v5  ;;  %v2249_v43 = vrot.slane %v2166_v37, %v5053_v6  ;;  %v2253_v19 = vrot.slane %v2166_v37, %v5079_v27  ;;  %2505 = vperm.xlu0 %4378, %v5850_v26  }
 0x51d   : > { %2493 = vperm.xlu1 %4377, %v5844_v61   ;;  %v2257_v1 = vrot.slane %v2166_v37, %v5060_v13  ;;  %v2261_v20 = vrot.slane %v2166_v37, %v5084_v29  ;;  %v2265_v49 = vrot.slane %v2166_v37, %v5064_v16 }
 0x51e   : > { %v2350_v45 = vsub.f32 %v5621_v3, %v2241_v17  ;;  %v2351_v54 = vsub.f32 %v5657_v32, %v2245_v36  ;;  %v2352_v50 = vsub.f32 %v5631_v57, %v2249_v43  ;;  %v2353_v9 = vsub.f32 %v5667_v41, %v2253_v19  ;;  %v5864_v57 = vpop.eup %4413 }
 0x51f   : > { %v2354_v53 = vsub.f32 %v5641_v59, %v2257_v1  ;;  %v2355_v41 = vsub.f32 %v5651_v21, %v2261_v20  ;;  %v5869_v58 = vpop.eup %4415  ;;  %v2356_v63 = vsub.f32 %v5661_v33, %v2265_v49  ;;  %v2269_v1 = vrot.slane %v2166_v37, %v5087_v31 }
 0x520   : > { %v2398_v56 = vmul.f32 1.442695, %v2350_v45  ;;  %v2400_v44 = vmul.f32 1.442695, %v2351_v54  ;;  %v2402_v3 = vmul.f32 1.442695, %v2352_v50  ;;  %v5879_v43 = vpop.eup %4417 }
 0x521   : > { %2496 = vperm.xlu1 %4377, %v5859_v2   ;;  %v2404_v32 = vmul.f32 1.442695, %v2353_v9  ;;  %v2406_v38 = vmul.f32 1.442695, %v2354_v53  ;;  %v2408_v34 = vmul.f32 1.442695, %v2355_v41  ;;  %v2357_v37 = vsub.f32 %v5690_v7, %v2269_v1 }
 0x522   : > { %4419 = vpow2.f32 %v2398_v56  ;;  %v2410_v33 = vmul.f32 1.442695, %v2356_v63 }
 0x523   : > { %4421 = vpow2.f32 %v2400_v44 }
 0x524   : > { %4423 = vpow2.f32 %v2402_v3 }
 0x525   : > { %2499 = vperm.xlu1 %4377, %v5864_v57   ;;  %4425 = vpow2.f32 %v2404_v32  ;;  %v2412_v32 = vmul.f32 1.442695, %v2357_v37 }
 0x526   : > { %4427 = vpow2.f32 %v2406_v38 }
 0x527   : > { %v2169_v60 = vpop.xlane.xlu0 %2168  ;;  %4429 = vpow2.f32 %v2408_v34 }
 0x528   : > { %v2277_v59 = vrot.slane %v2169_v60, %v5051_v5  ;;  %v2281_v28 = vrot.slane %v2169_v60, %v5053_v6  ;;  %v2273_v11 = vrot.slane %v2169_v60, %v5075_v23  ;;  %v2285_v17 = vrot.slane %v2169_v60, %v5079_v27 }
 0x529   : > { %2502 = vperm.xlu1 %4377, %v5869_v58   ;;  %v2289_v50 = vrot.slane %v2169_v60, %v5060_v13  ;;  %v2297_v56 = vrot.slane %v2169_v60, %v5064_v16  ;;  %v2293_v20 = vrot.slane %v2169_v60, %v5084_v29  ;;  %v2301_v41 = vrot.slane %v2169_v60, %v5087_v31 }
 0x52a   : > { %v2359_v21 = vsub.f32 %v5675_v52, %v2277_v59  ;;  %v2360_v36 = vsub.f32 %v5680_v48, %v2281_v28  ;;  %v2358_v45 = vsub.f32 %v5684_v55, %v2273_v11  ;;  %v2361_v52 = vsub.f32 %v5694_v0, %v2285_v17 }
 0x52b   : > { %v2362_v0 = vsub.f32 %v5704_v18, %v2289_v50  ;;  %v2364_v7 = vsub.f32 %v5700_v12, %v2297_v56  ;;  %v2363_v38 = vsub.f32 %v5710_v10, %v2293_v20  ;;  %v2365_v63 = vsub.f32 %v5715_v35, %v2301_v41 }
 0x52c   : > { %v2416_v19 = vmul.f32 1.442695, %v2359_v21  ;;  %v2418_v9 = vmul.f32 1.442695, %v2360_v36  ;;  %v2414_v55 = vmul.f32 1.442695, %v2358_v45 }
 0x52d   : > { %2508 = vperm.xlu1 %4377, %v5879_v43   ;;  %v2420_v53 = vmul.f32 1.442695, %v2361_v52  ;;  %v2422_v18 = vmul.f32 1.442695, %v2362_v0  ;;  %v2426_v59 = vmul.f32 1.442695, %v2364_v7 }
 0x52e   : > { %4431 = vpow2.f32 %v2416_v19  ;;  %v2424_v34 = vmul.f32 1.442695, %v2363_v38  ;;  %v2428_v60 = vmul.f32 1.442695, %v2365_v63 }
 0x52f   : > { %v5884_v54 = vpop.eup %4419  ;;  %4433 = vpow2.f32 %v2410_v33 }
 0x530   : > { %v5888_v48 = vpop.eup %4421  ;;  %2511 = vperm.xlu0 %4378, %v5884_v54   ;;  %4435 = vpow2.f32 %v2418_v9 }
 0x531   : > { %2514 = vperm.xlu1 %4377, %v5888_v48   ;;  %v5894_v44 = vpop.eup %4423  ;;  %4437 = vpow2.f32 %v2414_v55 }
 0x532   : > { %v5898_v3 = vpop.eup %4425  ;;  %4439 = vpow2.f32 %v2420_v53 }
 0x533   : > { %v5903_v49 = vpop.eup %4427  ;;  %4441 = vpow2.f32 %v2412_v32 }
 0x534   : > { %2517 = vperm.xlu0 %4378, %v5894_v44   ;;  %v5908_v28 = vpop.eup %4429  ;;  %4443 = vpow2.f32 %v2422_v18 }
 0x535   : > { %2520 = vperm.xlu1 %4377, %v5898_v3   ;;  %4445 = vpow2.f32 %v2426_v59 }
 0x536   : > { %4447 = vpow2.f32 %v2424_v34 }
 0x537   : > { %4449 = vpow2.f32 %v2428_v60 }
 0x538   : > { %2523 = vperm.xlu0 %4378, %v5903_v49  }
 0x53b   : > { %v5911_v12 = vpop.eup %4431 }
 0x53c   : > { %2526 = vperm.xlu0 %4378, %v5908_v28   ;;  %2538 = vperm.xlu1 %4377, %v5911_v12   ;;  %v5915_v10 = vpop.eup %4433 }
 0x53d   : > { %v5917_v11 = vpop.eup %4435 }
 0x53e   : > { %v5921_v35 = vpop.eup %4437 }
 0x53f   : > { %v5923_v21 = vpop.eup %4439 }
 0x540   : > { %2529 = vperm.xlu0 %4378, %v5915_v10   ;;  %2541 = vperm.xlu1 %4377, %v5917_v11   ;;  %v5927_v17 = vpop.eup %4441 }
 0x541   : > { %v5929_v36 = vpop.eup %4443 }
 0x542   : > { %v5933_v19 = vpop.eup %4445 }
 0x543   : > { %v5935_v1 = vpop.eup %4447 }
 0x544   : > { %2535 = vperm.xlu0 %4378, %v5921_v35   ;;  %2544 = vperm.xlu1 %4377, %v5923_v21   ;;  %v5939_v50 = vpop.eup %4449 }
 0x548   : > { %2532 = vperm.xlu0 %4378, %v5927_v17   ;;  %2547 = vperm.xlu1 %4377, %v5929_v36  }
 0x54c   : > { %2553 = vperm.xlu0 %4378, %v5933_v19   ;;  %2550 = vperm.xlu1 %4377, %v5935_v1  }
 0x54e   : > { %v2464_v33 = vpop.permute.xlu1 %2463 }
 0x54f   : > { %v2467_v45 = vpop.permute.xlu0 %2466  ;;  %v2561_v56 = vrot.slane %v2464_v33, %v5056_v8 }
 0x550   : > { %2556 = vperm.xlu1 %4377, %v5939_v50   ;;  %v2565_v55 = vrot.slane %v2467_v45, %v5056_v8 }
 0x552   : > { %v2470_v52 = vpop.permute.xlu1 %2469  ;;  %v2686_v32 = vsel %vm1267_vm1, %v2565_v55, %v2561_v56 }
 0x553   : > { %v2476_v9 = vpop.permute.xlu0 %2475  ;;  %v2569_v0 = vrot.slane %v2470_v52, %v5056_v8 }
 0x554   : > { %v2577_v18 = vrot.slane %v2476_v9, %v5056_v8 }
 0x555   : > { %v2687_v41 = vsel %vm1269_vm11, %v2569_v0, %v2686_v32 }
 0x556   : > { %v2473_v37 = vpop.permute.xlu1 %2472 }
 0x557   : > { %v2479_v20 = vpop.permute.xlu0 %2478  ;;  %v2573_v53 = vrot.slane %v2473_v37, %v5056_v8 }
 0x558   : > { %v2581_v34 = vrot.slane %v2479_v20, %v5056_v8 }
 0x559   : > { %v2688_v38 = vsel %vm1271_vm9, %v2573_v53, %v2687_v41 }
 0x55a   : > { %v2689_v59 = vsel %vm1273_vm7, %v2577_v18, %v2688_v38 }
 0x55b   : > { %v2482_v7 = vpop.permute.xlu0 %2481  ;;  %v2690_v33 = vsel %vm1275_vm6, %v2581_v34, %v2689_v59 }
 0x55c   : > { %v2585_v60 = vrot.slane %v2482_v7, %v5056_v8 }
 0x55e   : > { %v2691_v52 = vsel %vm1277_vm15, %v2585_v60, %v2690_v33 }
 0x55f   : > { %v2485_v63 = vpop.permute.xlu0 %2484 }
 0x560   : > { %v2589_v45 = vrot.slane %v2485_v63, %v5056_v8 }
 0x562   : > { %v2692_v37 = vsel %vm1279_vm14, %v2589_v45, %v2691_v52 }
 0x563   : > { %v2718_v56 = vsel %vm6351_vm5, %v2692_v37, 0.0  ;;  %vm6355_vm5 = vmmov %vm6347_vm2 }
 0x56b   : > { %2719 = vadd.xlane.f32.xlu0 %v2718_v56 }
 0x593   : > { %v2488_v0 = vpop.permute.xlu0 %2487 }
 0x594   : > { %v2491_v55 = vpop.permute.xlu1 %2490  ;;  %v2593_v20 = vrot.slane %v2488_v0, %v5056_v8 }
 0x595   : > { %v2597_v32 = vrot.slane %v2491_v55, %v5056_v8 }
 0x597   : > { %v2693_v59 = vsel %vm1267_vm1, %v2597_v32, %v2593_v20  ;;  %v2506_v60 = vpop.permute.xlu0 %2505 }
 0x598   : > { %v2494_v9 = vpop.permute.xlu1 %2493  ;;  %v2617_v56 = vrot.slane %v2506_v60, %v5056_v8 }
 0x599   : > { %v2601_v7 = vrot.slane %v2494_v9, %v5056_v8 }
 0x59b   : > { %v2694_v63 = vsel %vm1269_vm11, %v2601_v7, %v2693_v59 }
 0x59c   : > { %v2497_v53 = vpop.permute.xlu1 %2496 }
 0x59d   : > { %v2605_v38 = vrot.slane %v2497_v53, %v5056_v8 }
 0x59f   : > { %v2695_v33 = vsel %vm1271_vm9, %v2605_v38, %v2694_v63 }
 0x5a0   : > { %v2500_v41 = vpop.permute.xlu1 %2499 }
 0x5a1   : > { %v2609_v18 = vrot.slane %v2500_v41, %v5056_v8 }
 0x5a3   : > { %v2696_v52 = vsel %vm1273_vm7, %v2609_v18, %v2695_v33 }
 0x5a4   : > { %v2503_v34 = vpop.permute.xlu1 %2502 }
 0x5a5   : > { %v2613_v45 = vrot.slane %v2503_v34, %v5056_v8 }
 0x5a7   : > { %v2697_v37 = vsel %vm1275_vm6, %v2613_v45, %v2696_v52 }
 0x5a8   : > { %v2509_v55 = vpop.permute.xlu1 %2508  ;;  %v2698_v0 = vsel %vm1277_vm15, %v2617_v56, %v2697_v37 }
 0x5a9   : > { %v2621_v9 = vrot.slane %v2509_v55, %v5056_v8 }
 0x5ab   : > { %v2512_v53 = vpop.permute.xlu0 %2511  ;;  %v2699_v32 = vsel %vm1279_vm14, %v2621_v9, %v2698_v0 }
 0x5ac   : > { %v2721_v20 = vsel %vm6347_vm2, %v2699_v32, 0.0  ;;  %v2515_v7 = vpop.permute.xlu1 %2514  ;;  %v2625_v60 = vrot.slane %v2512_v53, %v5056_v8  ;;  %vm6356_vm2 = vmmov 0  }
 0x5ad   : > { %2722 = vadd.xlane.f32.xlu1 %v2721_v20  ;;  %v2629_v34 = vrot.slane %v2515_v7, %v5056_v8 }
 0x5af   : > { %v2518_v41 = vpop.permute.xlu0 %2517  ;;  %v2700_v37 = vsel %vm1267_vm1, %v2629_v34, %v2625_v60 }
 0x5b0   : > { %v2521_v59 = vpop.permute.xlu1 %2520  ;;  %v2633_v33 = vrot.slane %v2518_v41, %v5056_v8 }
 0x5b1   : > { %v2637_v56 = vrot.slane %v2521_v59, %v5056_v8 }
 0x5b2   : > { %v2701_v55 = vsel %vm1269_vm11, %v2633_v33, %v2700_v37 }
 0x5b3   : > { %v2524_v38 = vpop.permute.xlu0 %2523  ;;  %v2702_v59 = vsel %vm1271_vm9, %v2637_v56, %v2701_v55 }
 0x5b4   : > { %v2641_v9 = vrot.slane %v2524_v38, %v5056_v8 }
 0x5b6   : > { %v2703_v60 = vsel %vm1273_vm7, %v2641_v9, %v2702_v59 }
 0x5b7   : > { %v2527_v18 = vpop.permute.xlu0 %2526  ;;  %v2539_v63 = vpop.permute.xlu1 %2538 }
 0x5b8   : > { %v2661_v32 = vrot.slane %v2539_v63, %v5056_v8  ;;  %v2645_v53 = vrot.slane %v2527_v18, %v5056_v8 }
 0x5ba   : > { %v2704_v38 = vsel %vm1275_vm6, %v2645_v53, %v2703_v60 }
 0x5bb   : > { %v2530_v45 = vpop.permute.xlu0 %2529  ;;  %v2542_v52 = vpop.permute.xlu1 %2541 }
 0x5bc   : > { %v2649_v41 = vrot.slane %v2530_v45, %v5056_v8  ;;  %v2665_v34 = vrot.slane %v2542_v52, %v5056_v8 }
 0x5be   : > { %3175 = vrot.lane.b32.xlu1 %v5106_v42, %s4773_s24  ;;  %v2705_v45 = vsel %vm1277_vm15, %v2649_v41, %v2704_v38 }
 0x5bf   : > { %v2536_v0 = vpop.permute.xlu0 %2535  ;;  %v2545_v20 = vpop.permute.xlu1 %2544 }
 0x5c0   : > { %v2657_v7 = vrot.slane %v2536_v0, %v5056_v8  ;;  %v2669_v0 = vrot.slane %v2545_v20, %v5056_v8 }
 0x5c2   : > { %v2707_v42 = vsel %vm1267_vm1, %v2661_v32, %v2657_v7 }
 0x5c3   : > { %v2533_v33 = vpop.permute.xlu0 %2532  ;;  %v2708_v63 = vsel %vm1269_vm11, %v2665_v34, %v2707_v42  ;;  %v2548_v37 = vpop.permute.xlu1 %2547 }
 0x5c4   : > { %v2653_v18 = vrot.slane %v2533_v33, %v5056_v8  ;;  %v2673_v56 = vrot.slane %v2548_v37, %v5056_v8  ;;  %v2709_v55 = vsel %vm1271_vm9, %v2669_v0, %v2708_v63 }
 0x5c6   : > { %v2706_v52 = vsel %vm1279_vm14, %v2653_v18, %v2705_v45  ;;  %v2710_v59 = vsel %vm1273_vm7, %v2673_v56, %v2709_v55 }
 0x5c7   : > { %v2554_v32 = vpop.permute.xlu0 %2553  ;;  %v2724_v9 = vsel %vm6352_vm4, %v2706_v52, 0.0  ;;  %v2551_v7 = vpop.permute.xlu1 %2550 }
 0x5c8   : > { %2725 = vadd.xlane.f32.xlu0 %v2724_v9  ;;  %v2677_v53 = vrot.slane %v2551_v7, %v5056_v8  ;;  %v2681_v34 = vrot.slane %v2554_v32, %v5056_v8 }
 0x5ca   : > { %v2711_v20 = vsel %vm1275_vm6, %v2677_v53, %v2710_v59 }
 0x5cb   : > { %v2557_v41 = vpop.permute.xlu1 %2556  ;;  %v2712_v60 = vsel %vm1277_vm15, %v2681_v34, %v2711_v20 }
 0x5cc   : > { %v2685_v42 = vrot.slane %v2557_v41, %v5056_v8 }
 0x5ce   : > { %v2713_v33 = vsel %vm1279_vm14, %v2685_v42, %v2712_v60 }
 0x5cf   : > { %v2727_v38 = vsel %vm6353_vm12, %v2713_v33, 0.0 }
 0x5d0   : > { %2728 = vadd.xlane.f32.xlu0 %v2727_v38 }
 0x5e6   : > { %3046 = vrot.lane.b32.xlu0 %v5077_v25, %s4773_s24 }
 0x5f4   : > { %v2720_v63 = vpop.xlane.xlu0 %2719 }
 0x5f5   : > { %4451 = vrcp.f32 %v2720_v63 }
 0x602   : > { %v4452_v37 = vpop.eup %4451 }
 0x603   : > { %v2749_v18 = vrot.slane %v4452_v37, %v5051_v5  ;;  %v2745_v0 = vrot.slane %v4452_v37, %v5075_v23  ;;  %v2761_v45 = vrot.slane %v4452_v37, %v5060_v13  ;;  %v2753_v56 = vrot.slane %v4452_v37, %v5053_v6 }
 0x604   : > { %v2765_v52 = vrot.slane %v4452_v37, %v5084_v29  ;;  %v2757_v55 = vrot.slane %v4452_v37, %v5079_v27  ;;  %v2769_v41 = vrot.slane %v4452_v37, %v5064_v16 }
 0x605   : > { %v2903_v32 = vmul.f32 %v5800_v24, %v2749_v18  ;;  %v2902_v9 = vmul.f32 %v5798_v62, %v2745_v0  ;;  %v2906_v25 = vmul.f32 %v5806_v4, %v2761_v45  ;;  %v2904_v7 = vmul.f32 %v5804_v39, %v2753_v56 }
 0x606   : > { %v2907_v34 = vmul.f32 %v5812_v14, %v2765_v52  ;;  %v2905_v20 = vmul.f32 %v5810_v30, %v2757_v55  ;;  %v2908_v62 = vmul.f32 %v5816_v40, %v2769_v41  ;;  %v2773_v24 = vrot.slane %v4452_v37, %v5087_v31 }
 0x607   : > { %v2935_v53 = vpack.c.bf16 %v2903_v32, %v2903_v32  ;;  %v2934_v59 = vpack.c.bf16 %v2902_v9, %v2902_v9  ;;  %v2938_v33 = vpack.c.bf16 %v2906_v25, %v2906_v25  ;;  %v2936_v38 = vpack.c.bf16 %v2904_v7, %v2904_v7 }
 0x608   : > { %v2939_v63 = vpack.c.bf16 %v2907_v34, %v2907_v34  ;;  %v2937_v18 = vpack.c.bf16 %v2905_v20, %v2905_v20  ;;  %v2940_v0 = vpack.c.bf16 %v2908_v62, %v2908_v62  ;;  %v2909_v45 = vmul.f32 %v5819_v22, %v2773_v24 }
 0x609   : > { %v2975_v42 = vunpack.c.l.b16 %v2935_v53  ;;  %v2974_v60 = vunpack.c.l.b16 %v2934_v59  ;;  %v2978_v4 = vunpack.c.l.b16 %v2938_v33  ;;  %v2976_v39 = vunpack.c.l.b16 %v2936_v38 }
 0x60a   : > { %v2979_v14 = vunpack.c.l.b16 %v2939_v63  ;;  %v2977_v30 = vunpack.c.l.b16 %v2937_v18  ;;  %v2980_v56 = vunpack.c.l.b16 %v2940_v0  ;;  %v2941_v52 = vpack.c.bf16 %v2909_v45, %v2909_v45 }
 0x60b   : > { %2986 = vperm.xlu0 %4378, %v2975_v42   ;;  %2983 = vperm.xlu1 %4377, %v2974_v60   ;;  %v6354_v9 = vmov 0.0  }
 0x60c   : > { %v2981_v55 = vunpack.c.l.b16 %v2941_v52 }
 0x60f   : > { %2995 = vperm.xlu0 %4378, %v2978_v4   ;;  %2989 = vperm.xlu1 %4377, %v2976_v39  }
 0x613   : > { %2998 = vperm.xlu0 %4378, %v2979_v14   ;;  %2992 = vperm.xlu1 %4377, %v2977_v30  }
 0x617   : > { %3001 = vperm.xlu0 %4378, %v2980_v56  }
 0x61b   : > { %3004 = vperm.xlu0 %4378, %v2981_v55  }
 0x636   : > { %v2723_v40 = vpop.xlane.xlu1 %2722 }
 0x637   : > { %4453 = vrcp.f32 %v2723_v40 }
 0x63a   : > { %v3176_v37 = vpop.permute.xlu1 %3175 }
 0x63b   : > { %v3181_v32 = vsel %vm3051_vm3, %v3176_v37, 0 }
 0x63c   : > { %4189 = vmatpush3.bf16.msra.mxu0 %v3181_v32 }
 0x63d   : > { %4200 = vmatprep.subr.bf16.mxu0 %v6354_v9 }
 0x644   : > { %v4454_v25 = vpop.eup %4453 }
 0x645   : > { %v2777_v7 = vrot.slane %v4454_v25, %v5075_v23  ;;  %v2781_v22 = vrot.slane %v4454_v25, %v5051_v5  ;;  %v2801_v53 = vrot.slane %v4454_v25, %v5064_v16  ;;  %v2785_v59 = vrot.slane %v4454_v25, %v5053_v6 }
 0x646   : > { %v2789_v34 = vrot.slane %v4454_v25, %v5079_v27  ;;  %v2793_v24 = vrot.slane %v4454_v25, %v5060_v13  ;;  %v2805_v56 = vrot.slane %v4454_v25, %v5087_v31 }
 0x647   : > { %v2910_v20 = vmul.f32 %v5837_v15, %v2777_v7  ;;  %v2911_v41 = vmul.f32 %v5840_v51, %v2781_v22  ;;  %v2916_v42 = vmul.f32 %v5850_v26, %v2801_v53  ;;  %v2912_v60 = vmul.f32 %v5844_v61, %v2785_v59 }
 0x648   : > { %v2913_v62 = vmul.f32 %v5859_v2, %v2789_v34  ;;  %v2797_v15 = vrot.slane %v4454_v25, %v5084_v29  ;;  %v2914_v26 = vmul.f32 %v5864_v57, %v2793_v24  ;;  %v2917_v40 = vmul.f32 %v5879_v43, %v2805_v56 }
 0x649   : > { %v2942_v33 = vpack.c.bf16 %v2910_v20, %v2910_v20  ;;  %v2943_v38 = vpack.c.bf16 %v2911_v41, %v2911_v41  ;;  %v2948_v63 = vpack.c.bf16 %v2916_v42, %v2916_v42  ;;  %v2944_v18 = vpack.c.bf16 %v2912_v60, %v2912_v60 }
 0x64a   : > { %v2945_v30 = vpack.c.bf16 %v2913_v62, %v2913_v62  ;;  %v2946_v0 = vpack.c.bf16 %v2914_v26, %v2914_v26  ;;  %v2915_v45 = vmul.f32 %v5869_v58, %v2797_v15  ;;  %v2949_v57 = vpack.c.bf16 %v2917_v40, %v2917_v40 }
 0x64b   : > { %v3103_v4 = vunpack.c.l.b16 %v2942_v33  ;;  %v3104_v39 = vunpack.c.l.b16 %v2943_v38  ;;  %v3109_v14 = vunpack.c.l.b16 %v2948_v63  ;;  %v3105_v51 = vunpack.c.l.b16 %v2944_v18 }
 0x64c   : > { %v3106_v2 = vunpack.c.l.b16 %v2945_v30  ;;  %v3107_v52 = vunpack.c.l.b16 %v2946_v0  ;;  %v2947_v55 = vpack.c.bf16 %v2915_v45, %v2915_v45  ;;  %v3110_v59 = vunpack.c.l.b16 %v2949_v57 }
 0x64d   : > { %3112 = vperm.xlu0 %4378, %v3103_v4   ;;  %3115 = vperm.xlu1 %4377, %v3104_v39  }
 0x64e   : > { %v3108_v32 = vunpack.c.l.b16 %v2947_v55 }
 0x651   : > { %3130 = vperm.xlu0 %4378, %v3109_v14   ;;  %3118 = vperm.xlu1 %4377, %v3105_v51   ;;  %v2726_v61 = vpop.xlane.xlu0 %2725 }
 0x652   : > { %4455 = vrcp.f32 %v2726_v61 }
 0x655   : > { %3121 = vperm.xlu1 %4377, %v3106_v2  }
 0x659   : > { %3124 = vperm.xlu1 %4377, %v3107_v52   ;;  %v2729_v37 = vpop.xlane.xlu0 %2728 }
 0x65a   : > { %4457 = vrcp.f32 %v2729_v37 }
 0x65d   : > { %3127 = vperm.xlu1 %4377, %v3108_v32   ;;  %v3047_v7 = vpop.permute.xlu0 %3046 }
 0x65e   : > { %v3053_v53 = vsel %vm3051_vm3, %v3047_v7, 0 }
 0x65f   : > { %v4456_v22 = vpop.eup %4455  ;;  %4183 = vmatpush3.bf16.msra.mxu1 %v3053_v53 }
 0x660   : > { %v2813_v58 = vrot.slane %v4456_v22, %v5051_v5  ;;  %v2809_v25 = vrot.slane %v4456_v22, %v5075_v23  ;;  %v2821_v34 = vrot.slane %v4456_v22, %v5079_v27  ;;  %v2817_v43 = vrot.slane %v4456_v22, %v5053_v6  ;;  %4194 = vmatprep.subr.bf16.mxu1 %v6354_v9 }
 0x661   : > { %3133 = vperm.xlu1 %4377, %v3110_v59   ;;  %v2829_v20 = vrot.slane %v4456_v22, %v5084_v29  ;;  %v2825_v41 = vrot.slane %v4456_v22, %v5060_v13  ;;  %v2833_v63 = vrot.slane %v4456_v22, %v5064_v16  ;;  %v2837_v18 = vrot.slane %v4456_v22, %v5087_v31 }
 0x662   : > { %v2919_v42 = vmul.f32 %v5888_v48, %v2813_v58  ;;  %v2918_v60 = vmul.f32 %v5884_v54, %v2809_v25  ;;  %v2921_v33 = vmul.f32 %v5898_v3, %v2821_v34  ;;  %v2920_v38 = vmul.f32 %v5894_v44, %v2817_v43 }
 0x663   : > { %v2923_v4 = vmul.f32 %v5908_v28, %v2829_v20  ;;  %v2922_v39 = vmul.f32 %v5903_v49, %v2825_v41  ;;  %v2924_v30 = vmul.f32 %v5915_v10, %v2833_v63  ;;  %v2925_v26 = vmul.f32 %v5927_v17, %v2837_v18 }
 0x664   : > { %v2951_v62 = vpack.c.bf16 %v2919_v42, %v2919_v42  ;;  %v2950_v24 = vpack.c.bf16 %v2918_v60, %v2918_v60  ;;  %v2953_v14 = vpack.c.bf16 %v2921_v33, %v2921_v33  ;;  %v2952_v54 = vpack.c.bf16 %v2920_v38, %v2920_v38 }
 0x665   : > { %v2955_v44 = vpack.c.bf16 %v2923_v4, %v2923_v4  ;;  %v2954_v3 = vpack.c.bf16 %v2922_v39, %v2922_v39  ;;  %v2956_v56 = vpack.c.bf16 %v2924_v30, %v2924_v30  ;;  %v2957_v52 = vpack.c.bf16 %v2925_v26, %v2925_v26 }
 0x666   : > { %v3232_v15 = vunpack.c.l.b16 %v2951_v62  ;;  %v3231_v48 = vunpack.c.l.b16 %v2950_v24  ;;  %v3234_v28 = vunpack.c.l.b16 %v2953_v14  ;;  %v3233_v61 = vunpack.c.l.b16 %v2952_v54 }
 0x667   : > { %v4458_v51 = vpop.eup %4457  ;;  %v3236_v0 = vunpack.c.l.b16 %v2955_v44  ;;  %v3235_v45 = vunpack.c.l.b16 %v2954_v3  ;;  %v3237_v37 = vunpack.c.l.b16 %v2956_v56 }
 0x668   : > { %3243 = vperm.xlu1 %4377, %v3232_v15   ;;  %3240 = vperm.xlu0 %4378, %v3231_v48   ;;  %v2845_v49 = vrot.slane %v4458_v51, %v5051_v5  ;;  %v2841_v2 = vrot.slane %v4458_v51, %v5075_v23  ;;  %v2849_v10 = vrot.slane %v4458_v51, %v5053_v6  ;;  %v3238_v5 = vunpack.c.l.b16 %v2957_v52 }
 0x669   : > { %v2853_v17 = vrot.slane %v4458_v51, %v5079_v27  ;;  %v2861_v23 = vrot.slane %v4458_v51, %v5084_v29  ;;  %v2857_v32 = vrot.slane %v4458_v51, %v5060_v13  ;;  %v2865_v53 = vrot.slane %v4458_v51, %v5064_v16 }
 0x66a   : > { %v2927_v55 = vmul.f32 %v5911_v12, %v2845_v49  ;;  %v2926_v40 = vmul.f32 %v5921_v35, %v2841_v2  ;;  %v2928_v22 = vmul.f32 %v5917_v11, %v2849_v10  ;;  %v2869_v35 = vrot.slane %v4458_v51, %v5087_v31 }
 0x66b   : > { %v2929_v12 = vmul.f32 %v5923_v21, %v2853_v17  ;;  %v2931_v6 = vmul.f32 %v5935_v1, %v2861_v23  ;;  %v2930_v27 = vmul.f32 %v5929_v36, %v2857_v32  ;;  %v2932_v1 = vmul.f32 %v5933_v19, %v2865_v53 }
 0x66c   : > { %3249 = vperm.xlu1 %4377, %v3234_v28   ;;  %3246 = vperm.xlu0 %4378, %v3233_v61   ;;  %v2959_v57 = vpack.c.bf16 %v2927_v55, %v2927_v55  ;;  %v2958_v7 = vpack.c.bf16 %v2926_v40, %v2926_v40  ;;  %v2960_v58 = vpack.c.bf16 %v2928_v22, %v2928_v22 }
 0x66d   : > { %v2961_v13 = vpack.c.bf16 %v2929_v12, %v2929_v12  ;;  %v2963_v25 = vpack.c.bf16 %v2931_v6, %v2931_v6  ;;  %v2933_v11 = vmul.f32 %v5939_v50, %v2869_v35  ;;  %v2962_v43 = vpack.c.bf16 %v2930_v27, %v2930_v27 }
 0x66e   : > { %v3360_v59 = vunpack.c.l.b16 %v2959_v57  ;;  %v3359_v29 = vunpack.c.l.b16 %v2958_v7  ;;  %v3361_v21 = vunpack.c.l.b16 %v2960_v58  ;;  %v2964_v16 = vpack.c.bf16 %v2932_v1, %v2932_v1 }
 0x66f   : > { %v3362_v34 = vunpack.c.l.b16 %v2961_v13  ;;  %v3364_v36 = vunpack.c.l.b16 %v2963_v25  ;;  %v3363_v31 = vunpack.c.l.b16 %v2962_v43  ;;  %v2965_v20 = vpack.c.bf16 %v2933_v11, %v2933_v11 }
 0x670   : > { %3255 = vperm.xlu1 %4377, %v3236_v0   ;;  %3252 = vperm.xlu0 %4378, %v3235_v45   ;;  %v3365_v42 = vunpack.c.l.b16 %v2964_v16 }
 0x671   : > { %v3366_v41 = vunpack.c.l.b16 %v2965_v20 }
 0x674   : > { %3258 = vperm.xlu1 %4377, %v3237_v37   ;;  %3261 = vperm.xlu0 %4378, %v3238_v5  }
 0x678   : > { %3371 = vperm.xlu1 %4377, %v3360_v59   ;;  %3368 = vperm.xlu0 %4378, %v3359_v29  }
 0x67c   : > { %3374 = vperm.xlu1 %4377, %v3361_v21   ;;  %3377 = vperm.xlu0 %4378, %v3362_v34  }
 0x680   : > { %3383 = vperm.xlu1 %4377, %v3364_v36   ;;  %3380 = vperm.xlu0 %4378, %v3363_v31  }
 0x684   : > { %3389 = vperm.xlu1 %4377, %v3366_v41   ;;  %3386 = vperm.xlu0 %4378, %v3365_v42  }
 0x686   : > { %v2984_v60 = vpop.permute.xlu1 %2983  ;;  %v2987_v33 = vpop.permute.xlu0 %2986 }
 0x687   : > { %v3009_v38 = vrot.slane %v2984_v60, %v5056_v8  ;;  %v3013_v62 = vrot.slane %v2987_v33, %v5056_v8 }
 0x688   : > { %3431 = vrot.lane.b32.xlu1 %v5115_v46, %s4773_s24  ;;  %3303 = vrot.lane.b32.xlu0 %v5119_v47, %s4773_s24  ;;  %s3917_s24 = sshll.u32 %s549_s18, 4  ;;  %s3918_s24 = int_to_ptr.vmem [resolvable:$true] %s3917_s24 }
 0x689   : > { %v3038_v63 = vsel %vm1267_vm1, %v3013_v62, %v3009_v38  ;;  %s4674_s6 = scalar_lea.vmem %s3918_s24, 128 }
 0x68a   : > { %v2990_v19 = vpop.permute.xlu1 %2989  ;;  %v2996_v50 = vpop.permute.xlu0 %2995  ;;  %p4675_p13 = scmp.ne.s32.totalorder %s3918_s24, %s4674_s6 }
 0x68b   : > { %v3017_v24 = vrot.slane %v2990_v19, %v5056_v8  ;;  %v3025_v46 = vrot.slane %v2996_v50, %v5056_v8 }
 0x68c   : > { %p4676_p8 = pnand %p4675_p13, %p6375_p0 }
 0x68d   : > { %v3039_v15 = vsel %vm1269_vm11, %v3017_v24, %v3038_v63 }
 0x68e   : > { %v2993_v4 = vpop.permute.xlu1 %2992  ;;  %v2999_v39 = vpop.permute.xlu0 %2998  ;;  %p4677_p3 = pneg %p4676_p8 }
 0x68f   : > { %v3021_v18 = vrot.slane %v2993_v4, %v5056_v8  ;;  %v3029_v54 = vrot.slane %v2999_v39, %v5056_v8 }
 0x691   : > { %v3040_v47 = vsel %vm1271_vm9, %v3021_v18, %v3039_v15 }
 0x692   : > { %v3041_v48 = vsel %vm1273_vm7, %v3025_v46, %v3040_v47  ;;  %v3002_v14 = vpop.permute.xlu0 %3001 }
 0x693   : > { %v3033_v51 = vrot.slane %v3002_v14, %v5056_v8  ;;  %v3042_v44 = vsel %vm1275_vm6, %v3029_v54, %v3041_v48 }
 0x695   : > { %v3043_v26 = vsel %vm1277_vm15, %v3033_v51, %v3042_v44 }
 0x696   : > { %v3005_v3 = vpop.permute.xlu0 %3004 }
 0x697   : > { %v3037_v30 = vrot.slane %v3005_v3, %v5056_v8 }
 0x699   : > { %v3044_v28 = vsel %vm1279_vm14, %v3037_v30, %v3043_v26 }
 0x69a   : > { %v3045_v61 = vpack.c.b16 %v3044_v28, %v3044_v28 }
 0x69c   : > { %4185 = vmatmul.mubr.msk.bf16.vlgmr.msra.gmra.mxu1 %vm6355_vm5, %v3045_v61 }
 0x69d   : > { %4196 = vmatprep.mubr.msk.bf16.mxu1 %vm6356_vm2, %v6354_v9 }
 0x6c8   : > { %v3116_v49 = vpop.permute.xlu1 %3115  ;;  %v3113_v0 = vpop.permute.xlu0 %3112 }
 0x6c9   : > { %v3142_v56 = vrot.slane %v3116_v49, %v5056_v8  ;;  %v3138_v52 = vrot.slane %v3113_v0, %v5056_v8 }
 0x6cb   : > { %v3167_v37 = vsel %vm1267_vm1, %v3142_v56, %v3138_v52 }
 0x6cc   : > { %v3119_v2 = vpop.permute.xlu1 %3118  ;;  %v3131_v32 = vpop.permute.xlu0 %3130 }
 0x6cd   : > { %v3146_v55 = vrot.slane %v3119_v2, %v5056_v8  ;;  %v3162_v6 = vrot.slane %v3131_v32, %v5056_v8 }
 0x6cf   : > { %v3168_v5 = vsel %vm1269_vm11, %v3146_v55, %v3167_v37  ;;  %v3485_v37 = vld [vmem:[#allocation7] sm:$0xf] }
 0x6d0   : > { %v3122_v45 = vpop.permute.xlu1 %3121 }
 0x6d1   : > { %v3150_v10 = vrot.slane %v3122_v45, %v5056_v8 }
 0x6d3   : > { %v3169_v57 = vsel %vm1271_vm9, %v3150_v10, %v3168_v5 }
 0x6d4   : > { %v3125_v40 = vpop.permute.xlu1 %3124 }
 0x6d5   : > { %v3154_v17 = vrot.slane %v3125_v40, %v5056_v8 }
 0x6d7   : > { %v3170_v22 = vsel %vm1273_vm7, %v3154_v17, %v3169_v57 }
 0x6d8   : > { %v3128_v23 = vpop.permute.xlu1 %3127 }
 0x6d9   : > { %v3158_v7 = vrot.slane %v3128_v23, %v5056_v8 }
 0x6db   : > { %v3171_v12 = vsel %vm1275_vm6, %v3158_v7, %v3170_v22  ;;  %v3541_v7 = vld [vmem:[#allocation7 + $0x4] sm:$0xf] }
 0x6dc   : > { %v3134_v27 = vpop.permute.xlu1 %3133  ;;  %v3172_v53 = vsel %vm1277_vm15, %v3162_v6, %v3171_v12  ;;  %v3546_v22 = vsel %vm3051_vm3, %v3541_v7, 0  ;;  %v4080_v6 = vsel %vm1354_vm10, 1.0, %v6354_v9 }
 0x6dd   : > { %v3166_v35 = vrot.slane %v3134_v27, %v5056_v8 }
 0x6df   : > { %v3173_v59 = vsel %vm1279_vm14, %v3166_v35, %v3172_v53  ;;  %v3591_v35 = vld [vmem:[#allocation7 + $0x8] sm:$0xf] }
 0x6e0   : > { %v3174_v29 = vpack.c.b16 %v3173_v59, %v3173_v59 }
 0x6e2   : > { %4191 = vmatmul.mubr.msk.bf16.vlgmr.msra.gmra.mxu0 %vm6352_vm4, %v3174_v29 }
 0x6e3   : > { %v3244_v58 = vpop.permute.xlu1 %3243  ;;  %v3241_v13 = vpop.permute.xlu0 %3240  ;;  %4202 = vmatprep.mubr.msk.bf16.mxu0 %vm6356_vm2, %v6354_v9 }
 0x6e4   : > { %v3270_v36 = vrot.slane %v3244_v58, %v5056_v8  ;;  %v3266_v31 = vrot.slane %v3241_v13, %v5056_v8  ;;  %v3596_v58 = vsel %vm3051_vm3, %v3591_v35, 0  ;;  %v4382_v35 = vld [vmem:[%s6260_s7] sm:$0xff]  }
 0x6e6   : > { %v3295_v33 = vsel %vm1267_vm1, %v3270_v36, %v3266_v31 }
 0x6e7   : > { %v3250_v25 = vpop.permute.xlu1 %3249  ;;  %v3247_v11 = vpop.permute.xlu0 %3246 }
 0x6e8   : > { %v3274_v41 = vrot.slane %v3247_v11, %v5056_v8  ;;  %v3278_v19 = vrot.slane %v3250_v25, %v5056_v8  ;;  %v4097_v11 = vld [vmem:[#allocation10] ss:$0 sm:$0xff] }
 0x6ea   : > { %v3296_v62 = vsel %vm1269_vm11, %v3274_v41, %v3295_v33 }
 0x6eb   : > { %v3256_v21 = vpop.permute.xlu1 %3255  ;;  %v3253_v34 = vpop.permute.xlu0 %3252  ;;  %v3297_v46 = vsel %vm1271_vm9, %v3278_v19, %v3296_v62 }
 0x6ec   : > { %v3282_v24 = vrot.slane %v3253_v34, %v5056_v8  ;;  %v3286_v15 = vrot.slane %v3256_v21, %v5056_v8  ;;  %v4081_v21 = vsel %vm1355_vm13, 1.0, %v6354_v9 }
 0x6ee   : > { %v3298_v14 = vsel %vm1273_vm7, %v3282_v24, %v3297_v46 }
 0x6ef   : > { %v3259_v43 = vpop.permute.xlu1 %3258  ;;  %v3262_v1 = vpop.permute.xlu0 %3261  ;;  %v3299_v26 = vsel %vm1275_vm6, %v3286_v15, %v3298_v14 }
 0x6f0   : > { %v3290_v54 = vrot.slane %v3259_v43, %v5056_v8  ;;  %v3294_v28 = vrot.slane %v3262_v1, %v5056_v8  ;;  %v3641_v43 = vld [vmem:[#allocation7 + $0xc] sm:$0xf] }
 0x6f2   : > { %v3300_v2 = vsel %vm1277_vm15, %v3290_v54, %v3299_v26 }
 0x6f3   : > { %v3372_v20 = vpop.permute.xlu1 %3371  ;;  %v3369_v16 = vpop.permute.xlu0 %3368  ;;  %v3301_v55 = vsel %vm1279_vm14, %v3294_v28, %v3300_v2 }
 0x6f4   : > { %v3398_v42 = vrot.slane %v3372_v20, %v5056_v8  ;;  %v3394_v60 = vrot.slane %v3369_v16, %v5056_v8  ;;  %v3302_v32 = vpack.c.b16 %v3301_v55, %v3301_v55  ;;  %v3646_v20 = vsel %vm3051_vm3, %v3641_v43, 0 }
 0x6f6   : > { %v3423_v39 = vsel %vm1267_vm1, %v3398_v42, %v3394_v60  ;;  %vm6357_vm1 = vmmov %vm6352_vm4  ;;  %v4082_v60 = vsel %vm1356_vm0, 1.0, %v6354_v9  ;;  %vm3828_vm0 = vcmask 523264  }
 0x6f7   : > { %v3375_v50 = vpop.permute.xlu1 %3374  ;;  %v3378_v38 = vpop.permute.xlu0 %3377 }
 0x6f8   : > { %v3402_v4 = vrot.slane %v3375_v50, %v5056_v8  ;;  %v3406_v63 = vrot.slane %v3378_v38, %v5056_v8  ;;  %v4083_v50 = vsel %vm1357_vm8, 1.0, %v6354_v9 }
 0x6fa   : > { %v3424_v18 = vsel %vm1269_vm11, %v3402_v4, %v3423_v39  ;;  %vm6358_vm11 = vmmov %vm6357_vm1 }
 0x6fb   : > { %v3384_v47 = vpop.permute.xlu1 %3383  ;;  %v3381_v48 = vpop.permute.xlu0 %3380  ;;  %v3425_v44 = vsel %vm1271_vm9, %v3406_v63, %v3424_v18  ;;  %vm6360_vm9 = vmmov %vm6357_vm1 }
 0x6fc   : > { %v3410_v51 = vrot.slane %v3381_v48, %v5056_v8  ;;  %v3414_v3 = vrot.slane %v3384_v47, %v5056_v8 }
 0x6fe   : > { %v3426_v30 = vsel %vm1273_vm7, %v3410_v51, %v3425_v44  ;;  %vm6362_vm7 = vmmov %vm6357_vm1 }
 0x6ff   : > { %v3390_v61 = vpop.permute.xlu1 %3389  ;;  %v3387_v49 = vpop.permute.xlu0 %3386  ;;  %v3427_v56 = vsel %vm1275_vm6, %v3414_v3, %v3426_v30  ;;  %vm6365_vm6 = vmmov %vm6357_vm1 }
 0x700   : > { %v3422_v0 = vrot.slane %v3390_v61, %v5056_v8  ;;  %v3418_v45 = vrot.slane %v3387_v49, %v5056_v8  ;;  %v3490_v8 = vsel %vm3051_vm3, %v3485_v37, 0  ;;  %v4093_v61 = vld [vmem:[#allocation8] ss:$0 sm:$0xff]  ;;  %v4463_v37 = vld [vmem:[%s5021_s8] sm:$0xff]  ;;  %s4774_s8 = smov [#allocation16]  }
 0x701   : > { %s4678_s14 = sshll.u32 %s4774_s8, 4  ;;  %s4679_s14 = int_to_ptr.vmem [resolvable:$false] %s4678_s14 }
 0x702   : > { %v3428_v52 = vsel %vm1277_vm15, %v3418_v45, %v3427_v56  ;;  %vm6366_vm15 = vmmov %vm6357_vm1  ;;  %s4680_s5 = scalar_lea.vmem %s4679_s14, 256  ;;  %p4681_p4 = scmp.lt.s32.totalorder %s3918_s24, %s4679_s14 }
 0x703   : > { %v3429_v40 = vsel %vm1279_vm14, %v3422_v0, %v3428_v52  ;;  %v3432_v10 = vpop.permute.xlu1 %3431  ;;  %v3304_v17 = vpop.permute.xlu0 %3303  ;;  %vm6367_vm14 = vcmask 261120   ;;  %p4682_p12 = scmp.lt.s32.totalorder %s4680_s5, %s4674_s6 }
 0x704   : > { %v3437_v5 = vsel %vm3051_vm3, %v3432_v10, 0  ;;  %v3309_v23 = vsel %vm3051_vm3, %v3304_v17, 0  ;;  %v3430_v57 = vpack.c.b16 %v3429_v40, %v3429_v40  ;;  %vm6368_vm10 = vmmov %vm6367_vm14 }
 0x705   : > { %4195 = vmatpush3.bf16.msra.mxu1 %v3309_v23  ;;  %4201 = vmatpush3.bf16.msra.mxu0 %v3437_v5  ;;  %vm6369_vm13 = vmmov %vm6368_vm10  ;;  %p4683_p6 = por %p4682_p12, %p4681_p4 }
 0x706   : > { %4206 = vmatprep.subr.bf16.mxu1 %v6354_v9  ;;  %4212 = vmatprep.subr.bf16.mxu0 %v6354_v9  ;;  %vm6370_vm8 = vmmov %vm6368_vm10 }
 0x707   : > { %vm6371_vm12 = vmmov %vm6370_vm8  ;;  %p4684_p2 = pnand %p4683_p6, %p4677_p3 }
 0x708   : > { %4197 = vmatmul.mubr.msk.bf16.vlgmr.msra.gmra.mxu1 %vm6357_vm1, %v3302_v32  ;;  %4203 = vmatmul.mubr.msk.bf16.vlgmr.msra.gmra.mxu0 %vm6358_vm11, %v3430_v57  ;;  %vm6374_vm3 = vmmov %vm6370_vm8 }
 0x709   : > { %4207 = vmatpush3.bf16.msra.mxu1 %v3490_v8  ;;  %4208 = vmatprep.mubr.msk.bf16.mxu1 %vm6356_vm2, %v6354_v9 }
 0x70a   : > { %4214 = vmatprep.mubr.msk.bf16.mxu0 %vm6356_vm2, %v6354_v9  ;;  %4218 = vmatprep.subr.bf16.mxu1 %v6354_v9 }
 0x70b   : > { %4213 = vmatpush3.bf16.msra.mxu0 %v3546_v22 }
 0x70c   : > { %4224 = vmatprep.subr.bf16.mxu0 %v6354_v9 }
 0x75c   : > { %v3089_v27 = vpop.f32.mrf.mxu1 }
 0x75d   : > { %v3479_v53 = vmul.f32 %v4080_v6, %v3089_v27  ;;  %v4381_v27 = vld [vmem:[%s6260_s7 + $0x8] sm:$0xff]  }
 0x75e   : > { %v4186_v59 = vpop.f32.mrf.mxu1 }
 0x75f   : > { %v3484_v29 = vpack.c.bf16 %v3479_v53, %v3479_v53  ;;  %v4383_v53 = vld [vmem:[#allocation14 + $0x18] sm:$0xff]   ;;  %v4384_v59 = vld [vmem:[#allocation14 + $0x10] sm:$0xff]  }
 0x760   : > { %v3092_v13 = vpop.f32.mrf.mxu1 }
 0x761   : > { %4209 = vmatmul.mubr.msk.bf16.vlgmr.msra.gmra.mxu1 %vm6360_vm9, %v3484_v29 }
 0x762   : > { %v4187_v25 = vpop.f32.mrf.mxu1  ;;  %4219 = vmatpush3.bf16.msra.mxu1 %v3596_v58  ;;  %4220 = vmatprep.mubr.msk.bf16.mxu1 %vm6356_vm2, %v6354_v9 }
 0x763   : > { %4230 = vmatprep.subr.bf16.mxu1 %v6354_v9 }
 0x7a2   : > { %v3217_v34 = vpop.f32.mrf.mxu0 }
 0x7a3   : > { %v3480_v1 = vmul.f32 %v4081_v21, %v3217_v34  ;;  %v4098_v34 = vld [vmem:[#allocation11] ss:$0 sm:$0xff] }
 0x7a4   : > { %v4192_v36 = vpop.f32.mrf.mxu0 }
 0x7a5   : > { %v3539_v31 = vpack.c.bf16 %v3480_v1, %v3480_v1 }
 0x7a6   : > { %v3220_v16 = vpop.f32.mrf.mxu0 }
 0x7a7   : > { %4215 = vmatmul.mubr.msk.bf16.vlgmr.msra.gmra.mxu0 %vm6362_vm7, %v3539_v31  ;;  %v4385_v31 = vld [vmem:[#allocation14 + $0x8] sm:$0xff]   ;;  %v4099_v16 = vld [vmem:[#allocation13] ss:$0 sm:$0xff] }
 0x7a8   : > { %v4193_v41 = vpop.f32.mrf.mxu0  ;;  %4225 = vmatpush3.bf16.msra.mxu0 %v3646_v20  ;;  %4226 = vmatprep.mubr.msk.bf16.mxu0 %vm6356_vm2, %v6354_v9  ;;  %v4386_v20 = vld [vmem:[#allocation14] sm:$0xff]  }
 0x7a9   : > { %4238 = vmatprep.subr.bf16.mxu0 %v6354_v9 }
 0x7c8   : > { %v3345_v33 = vpop.f32.mrf.mxu1  ;;  %v3473_v38 = vpop.f32.mrf.mxu0 }
 0x7c9   : > { %v3481_v62 = vmul.f32 %v4082_v60, %v3345_v33  ;;  %v3482_v24 = vmul.f32 %v4083_v50, %v3473_v38 }
 0x7ca   : > { %v4198_v4 = vpop.f32.mrf.mxu1  ;;  %v4204_v39 = vpop.f32.mrf.mxu0 }
 0x7cb   : > { %v3589_v63 = vpack.c.bf16 %v3481_v62, %v3481_v62  ;;  %v3639_v18 = vpack.c.bf16 %v3482_v24, %v3482_v24  ;;  %v4103_v62 = vld [vmem:[%s6263_s10] ss:$0 sm:$0xff] }
 0x7cc   : > { %v3348_v15 = vpop.f32.mrf.mxu1  ;;  %v3476_v46 = vpop.f32.mrf.mxu0 }
 0x7cd   : > { %4221 = vmatmul.mubr.msk.bf16.vlgmr.msra.gmra.mxu1 %vm6365_vm6, %v3589_v63  ;;  %4227 = vmatmul.mubr.msk.bf16.vlgmr.msra.gmra.mxu0 %vm6366_vm15, %v3639_v18 }
 0x7ce   : > { %v4199_v47 = vpop.f32.mrf.mxu1  ;;  %v4205_v48 = vpop.f32.mrf.mxu0  ;;  %4234 = vmatprep.mubr.msk.bf16.mxu1 %vm6356_vm2, %v6354_v9  ;;  %4246 = vmatprep.mubr.msk.bf16.mxu0 %vm6356_vm2, %v6354_v9 }
 0x7cf   : > { %4231 = vmatpush3.bf16.msra.mxu1 %v4381_v27  ;;  %4239 = vmatpush3.bf16.msra.mxu0 %v4383_v53 }
 0x7d0   : > { %4232 = vmatprep.subr.bf16.mxu1 %v6354_v9  ;;  %4240 = vmatprep.subr.bf16.mxu0 %v6354_v9 }
 0x7d3   : > { %4233 = vmatpush3.bf16.msra.mxu1 %v4382_v35  ;;  %4241 = vmatpush3.bf16.msra.mxu0 %v4384_v59 }
 0x7d4   : > { %4242 = vmatprep.subr.bf16.mxu0 %v6354_v9 }
 0x7d7   : > { %4243 = vmatpush3.bf16.msra.mxu0 %v4385_v31 }
 0x7d8   : > { %4244 = vmatprep.subr.bf16.mxu0 %v6354_v9 }
 0x7db   : > { %4245 = vmatpush3.bf16.msra.mxu0 %v4386_v20 }
 0x821   : > { %v3526_v14 = vpop.f32.mrf.mxu1 }
 0x822   : > { %v3538_v49 = vadd.f32 %v4093_v61, %v3526_v14  ;;  %v4110_v61 = vld [vmem:[%s6372_s23] ss:$0 sm:$0xff] }
 0x823   : > { %v4210_v54 = vpop.f32.mrf.mxu1 }
 0x825   : > { %v3529_v51 = vpop.f32.mrf.mxu1 }
 0x827   : > { %v4211_v44 = vpop.f32.mrf.mxu1 }
 0x867   : > { %v3582_v3 = vpop.f32.mrf.mxu0 }
 0x868   : > { %v3588_v2 = vadd.f32 %v3582_v3, %v3538_v49 }
 0x869   : > { %v4216_v30 = vpop.f32.mrf.mxu0 }
 0x86b   : > { %v3585_v26 = vpop.f32.mrf.mxu0 }
 0x86c   : > { %v4109_v26 = vld [vmem:[%s6264_s11] ss:$0 sm:$0xff] }
 0x86d   : > { %v4217_v28 = vpop.f32.mrf.mxu0 }
 0x88d   : > { %v3632_v0 = vpop.f32.mrf.mxu1  ;;  %v3682_v45 = vpop.f32.mrf.mxu0 }
 0x88e   : > { %v3638_v56 = vadd.f32 %v3632_v0, %v3588_v2 }
 0x88f   : > { %v4222_v52 = vpop.f32.mrf.mxu1  ;;  %v4228_v55 = vpop.f32.mrf.mxu0 }
 0x890   : > { %v3688_v40 = vadd.f32 %v3682_v45, %v3638_v56 }
 0x891   : > { %v3635_v10 = vpop.f32.mrf.mxu1  ;;  %v3685_v17 = vpop.f32.mrf.mxu0 }
 0x892   : > { %v3689_v5 = vadd.f32 %v4463_v37, %v3688_v40 }
 0x893   : > { %v4223_v23 = vpop.f32.mrf.mxu1  ;;  %v4229_v32 = vpop.f32.mrf.mxu0 }
 0x894   : > { %v3690_v57 = vsel %vm6367_vm14, %v3689_v5, 0.0 }
 0x895   : > { %3691 = vadd.xlane.f32.xlu0 %v3690_v57 }
 0x91e   : > { %v3692_v8 = vpop.xlane.xlu0 %3691 }
 0x91f   : > { %v3694_v7 = vmul.f32 0.03125, %v3692_v8 }
 0x921   : > { %v3695_v22 = vsub.f32 %v3689_v5, %v3694_v7 }
 0x923   : > { %v3696_v12 = vmul.f32 %v3695_v22, %v3695_v22 }
 0x925   : > { %v3697_v6 = vsel %vm6368_vm10, %v3696_v12, 0.0 }
 0x926   : > { %3698 = vadd.xlane.f32.xlu1 %v3697_v6 }
 0x9af   : > { %v3699_v29 = vpop.xlane.xlu1 %3698 }
 0x9b0   : > { %v3700_v58 = vmul.f32 0.03125, %v3699_v29 }
 0x9b2   : > { %v3701_v13 = vadd.f32 1e-05, %v3700_v58 }
 0x9b4   : > { %4459 = vrsqrt.f32 %v3701_v13 }
 0x9c1   : > { %v4460_v25 = vpop.eup %4459 }
 0x9c2   : > { %v3703_v21 = vmul.f32 %v4460_v25, %v3695_v22 }
 0x9c4   : > { %v3711_v43 = vmul.f32 %v4097_v11, %v3703_v21 }
 0x9c6   : > { %v3719_v1 = vadd.f32 %v4098_v34, %v3711_v43 }
 0x9c8   : > { %v3720_v36 = vpack.c.bf16 %v3719_v1, %v3719_v1 }
 0x9ca   : > { %4235 = vmatmul.mubr.msk.bf16.vlgmr.msra.gmra.mxu1 %vm6369_vm13, %v3720_v36 }
 0xa8a   : > { %v3781_v41 = vpop.f32.mrf.mxu1 }
 0xa8b   : > { %v3782_v42 = vadd.f32 %v4099_v16, %v3781_v41 }
 0xa8c   : > { %v4236_v60 = vpop.f32.mrf.mxu1 }
 0xa8d   : > { %v3787_v33 = vmax.f32 %v3782_v42, 0.0 }
 0xa8e   : > { %v3784_v19 = vpop.f32.mrf.mxu1 }
 0xa8f   : > { %v3788_v50 = vpack.c.bf16 %v3787_v33, %v3787_v33 }
 0xa90   : > { %v4237_v38 = vpop.f32.mrf.mxu1 }
 0xa91   : > { %4247 = vmatmul.mubr.msk.bf16.vlgmr.msra.gmra.mxu0 %vm3828_vm0, %v3788_v50 }
 0xb51   : > { %v3866_v24 = vpop.f32.mrf.mxu0 }
 0xb52   : > { %v3867_v4 = vadd.f32 %v4103_v62, %v3866_v24 }
 0xb53   : > { %v4248_v39 = vpop.f32.mrf.mxu0 }
 0xb54   : > { %v3872_v63 = vadd.f32 %v3867_v4, %v3719_v1 }
 0xb55   : > { %v3869_v9 = vpop.f32.mrf.mxu0 }
 0xb56   : > { %v3873_v18 = vsel %vm6370_vm8, %v3872_v63, 0.0 }
 0xb57   : > { %3874 = vadd.xlane.f32.xlu0 %v3873_v18  ;;  %v4249_v15 = vpop.f32.mrf.mxu0 }
 0xbe0   : > { %v3875_v46 = vpop.xlane.xlu0 %3874 }
 0xbe1   : > { %v3876_v47 = vmul.f32 0.03125, %v3875_v46 }
 0xbe3   : > { %v3877_v48 = vsub.f32 %v3872_v63, %v3876_v47 }
 0xbe5   : > { %v3878_v14 = vmul.f32 %v3877_v48, %v3877_v48 }
 0xbe7   : > { %v3879_v54 = vsel %vm6371_vm12, %v3878_v14, 0.0 }
 0xbe8   : > { %3880 = vadd.xlane.f32.xlu0 %v3879_v54 }
 0xc71   : > { %v3881_v51 = vpop.xlane.xlu0 %3880 }
 0xc72   : > { %v3882_v44 = vmul.f32 0.03125, %v3881_v51 }
 0xc74   : > { %v3883_v3 = vadd.f32 1e-05, %v3882_v44 }
 0xc76   : > { %4461 = vrsqrt.f32 %v3883_v3 }
 0xc83   : > { %v4462_v30 = vpop.eup %4461 }
 0xc84   : > { %v3885_v28 = vmul.f32 %v4462_v30, %v3877_v48 }
 0xc86   : > { %v3893_v49 = vmul.f32 %v4109_v26, %v3885_v28 }
 0xc88   : > { %v3901_v2 = vadd.f32 %v4110_v61, %v3893_v49 }
 0xc8a   : > { %3902 = vst.msk [vmem:[%s549_s18] sm:$0xff] %vm6374_vm3, %v3901_v2 }
 0xc8b   : > { %4687 = shalt.err (!%p4684_p2)
}
 0xc8c   : > { %s4688_s1 = scalar_lea.hbm %s3915_s20, 128  ;;  %s4692_s15 = scalar_lea.hbm %s6373_s13, 256 }
 0xc8d   : > { %p4689_p5 = scmp.ne.s32.totalorder %s3915_s20, %s4688_s1  ;;  %p4693_p9 = scmp.lt.s32.totalorder %s3915_s20, %s6373_s13 }
 0xc8e   : > { %p4694_p10 = scmp.lt.s32.totalorder %s4692_s15, %s4688_s1 }
 0xc8f   : > { %p4690_p1 = pnand %p4689_p5, %p6375_p0 }
 0xc90   : > { %p4695_p11 = por %p4694_p10, %p4693_p9 }
 0xc91   : > { %p4691_p7 = pneg %p4690_p1 }
 0xc93   : > { %p4696_p13 = pnand %p4695_p11, %p4691_p7 }
 0xc95   : > { %4699 = shalt.err (!%p4696_p13)
}
 0xc96   : > { %4280 = dma.vmem_to_hbm [thread:$0]  (%p6375_p0), %s3918_s24, 128, %s3915_s20, %s3904_s29  }
 0xc97 PF: > { %s3929_s18 = sand.u32 1, %s4742_s25   ;;  %p6376_p8 = scmp.ne.s32.totalorder %s6312_s22, 0 }
 0xc98   : > { %p6377_p3 = scmp.ge.s32.totalorder %s4754_s28, 2  ;;  %s3930_s17 = scalar_lea.sflag [#allocation4], %s3929_s18 }
 0xc9a   : > { %p4309_p4 = pnand %p6377_p3, %p6376_p8 }
 0xc9c   : > { %p4310_p12 = pneg %p4309_p4 }
 0xc9e   : > { %4737 = dma.done.wait (%p4310_p12), %s3930_s17, 128  }
 0xc9f   : > { %4739 = vsyncadd (%p4310_p12), %s3930_s17, 4294967168  ;;  %p30_p6 = scmp.ge.s32.totalorder %s4958_s21, 4   ;;  %s6378_s25 = smov %s4746_s26 }
 0xca0   : > { %s6379_s26 = smov %s4750_s27  ;;  %s6380_s27 = smov %s4970_s12 }
 0xca1   : > { %s6381_s28 = smov %s4958_s21  ;;  %32 = sbr.rel (!%p30_p6) target bundleno = 18 (0x12), region = 148 }
 0xca6   :  { %3935 = vsyncpa [#allocation3], 1 }
 0xca7   :  { %3937 = vsyncpa [#allocation3 + $0x1], 1 }
 0xca8   :  { %3938 = vsyncpa [#allocation6], 1 }
 0xca9   :  { %3939 = vsyncpa [#allocation9], 1 }
 0xcaa   :  { %3940 = vsyncpa [#allocation12], 1 }
 0xcab   :  { %3941 = vsyncpa [#allocation15], 1 }
 0xcac   :  { %3942 = vsyncpa [#allocation4], 1 }
 0xcad   :  { %3944 = vsyncpa [#allocation4 + $0x1], 1 }

</bundles_post_ra>
